<compile_context>
chip_gen: v6e
topology: v6e:2x2x1
jax: 0.10.0
libtpu: 0.0.40
codegen_flags: <defaults>
</compile_context>

<pallas_src>
import jax
import jax.numpy as jnp
from jax.experimental import pallas as pl
from jax.experimental.pallas import tpu as pltpu

EPS = 1e-5
CP = 128     # channel padding (all channel counts in this net are <= 128)


def _round_up(x, m):
    return (x + m - 1) // m * m


def _m_tile(m):
    """Largest matmul row tile in {512,256,128} that divides round_up(m,128)."""
    mp = _round_up(m, 128)
    for t in (512, 256, 128):
        if mp % t == 0:
            return t
    return 128


def _row_tile(mp):
    """Largest elementwise row tile in {1024,...,128} that divides the padded M."""
    for t in (1024, 512, 256, 128):
        if mp % t == 0:
            return t
    return 128


# --------------------------------------------------------------------- Pallas kernels
def conv_mm_stats_kernel(a_ref, b_ref, y_ref, s_ref, sq_ref, acc_ref):
    """Tiled matmul (bf16 in, f32 VMEM accumulation, bf16 out) with fused BN
    per-channel sum / sum-of-squares epilogue computed from the f32 accumulator."""
    m = pl.program_id(0)
    k = pl.program_id(1)
    nk = pl.num_programs(1)

    @pl.when(k == 0)
    def _():
        acc_ref[...] = jnp.zeros_like(acc_ref)

    acc_ref[...] += jnp.dot(a_ref[...], b_ref[...],
                            preferred_element_type=jnp.float32)

    @pl.when(jnp.logical_and(k == nk - 1, m == 0))
    def _():
        s_ref[...] = jnp.zeros_like(s_ref)
        sq_ref[...] = jnp.zeros_like(sq_ref)

    @pl.when(k == nk - 1)
    def _():
        y = acc_ref[...]
        y_ref[...] = y.astype(y_ref.dtype)
        s_ref[...] += jnp.sum(y, axis=0, keepdims=True)
        sq_ref[...] += jnp.sum(y * y, axis=0, keepdims=True)


def affine_relu_kernel(x_ref, s_ref, b_ref, o_ref):
    y = x_ref[...].astype(jnp.float32) * s_ref[...] + b_ref[...]
    o_ref[...] = jnp.maximum(y, 0.0).astype(o_ref.dtype)


def affine_add_relu_kernel(x_ref, s_ref, b_ref, r_ref, o_ref):
    y = x_ref[...].astype(jnp.float32) * s_ref[...] + b_ref[...]
    y = y + r_ref[...].astype(jnp.float32)
    o_ref[...] = jnp.maximum(y, 0.0).astype(o_ref.dtype)


def affine2_add_relu_kernel(x_ref, s_ref, b_ref, r_ref, rs_ref, rb_ref, o_ref):
    """Main-path BN affine + downsample-path BN affine + add + ReLU (fully fused)."""
    y = x_ref[...].astype(jnp.float32) * s_ref[...] + b_ref[...]
    r = r_ref[...].astype(jnp.float32) * rs_ref[...] + rb_ref[...]
    o_ref[...] = jnp.maximum(y + r, 0.0).astype(o_ref.dtype)


def max9_kernel(t0, t1, t2, t3, t4, t5, t6, t7, t8, o_ref):
    m = jnp.maximum(t0[...], t1[...])
    m = jnp.maximum(m, t2[...])
    m = jnp.maximum(m, t3[...])
    m = jnp.maximum(m, t4[...])
    m = jnp.maximum(m, t5[...])
    m = jnp.maximum(m, t6[...])
    m = jnp.maximum(m, t7[...])
    m = jnp.maximum(m, t8[...])
    o_ref[...] = m


def fc_kernel(a_ref, w_ref, b_ref, o_ref):
    o_ref[...] = jnp.dot(a_ref[...], w_ref[...],
                         preferred_element_type=jnp.float32) + b_ref[...]


# ------------------------------------------------------------------------- wrappers
def conv_matmul_stats(a, b):
    """A(M,K) @ B(Kw,128) with fused per-channel sum / sum-sq.

    `b` is a pre-padded bf16 weight matrix (Kw = round_up(K,128), N = CP).
    Returns (y_padded (Mp, CP) bf16, sum (CP,) f32, sumsq (CP,) f32).
    """
    M, K = a.shape
    Kw, _ = b.shape
    tm = _m_tile(M)
    Mp = _round_up(M, tm)
    nk = -(-Kw // 512)                       # K tiles of at most 512
    tk = _round_up(-(-Kw // nk), 128)
    Kp = tk * nk
    ap = jnp.pad(a.astype(jnp.bfloat16), ((0, Mp - M), (0, Kp - K)))
    bp = jnp.pad(b, ((0, Kp - Kw), (0, 0)))

    y, s, sq = pl.pallas_call(
        conv_mm_stats_kernel,
        out_shape=(
            jax.ShapeDtypeStruct((Mp, CP), jnp.bfloat16),
            jax.ShapeDtypeStruct((1, CP), jnp.float32),
            jax.ShapeDtypeStruct((1, CP), jnp.float32),
        ),
        grid=(Mp // tm, nk),
        in_specs=[
            pl.BlockSpec((tm, tk), lambda i, k: (i, k)),
            pl.BlockSpec((tk, CP), lambda i, k: (k, 0)),
        ],
        out_specs=(
            pl.BlockSpec((tm, CP), lambda i, k: (i, 0)),
            pl.BlockSpec((1, CP), lambda i, k: (0, 0)),
            pl.BlockSpec((1, CP), lambda i, k: (0, 0)),
        ),
        scratch_shapes=[pltpu.VMEM((tm, CP), jnp.float32)],
        # Stats accumulate over the M axis too -> both axes must be "arbitrary".
        compiler_params=pltpu.CompilerParams(
            dimension_semantics=("arbitrary", "arbitrary")),
    )(ap, bp)
    return y, s[0], sq[0]


def _bn_coeffs(s, sq, m_real, gamma, beta):
    """Training-mode batch-norm -> per-channel (scale, bias) as (1, CP) f32."""
    mean = s / m_real
    var = jnp.maximum(sq / m_real - mean * mean, 0.0)
    scale = gamma * jax.lax.rsqrt(var + EPS)
    bias = beta - mean * scale
    return (scale.reshape(1, CP).astype(jnp.float32),
            bias.reshape(1, CP).astype(jnp.float32))


def bn_affine(y_pad, scale, bias, residual=None, res_affine=None):
    """Fused BN affine (+ residual [optionally with its own BN affine]) + ReLU."""
    mp = y_pad.shape[0]
    tr = _row_tile(mp)
    row_spec = pl.BlockSpec((tr, CP), lambda i: (i, 0))
    vec_spec = pl.BlockSpec((1, CP), lambda i: (0, 0))

    if residual is None:
        kernel = affine_relu_kernel
        in_specs = [row_spec, vec_spec, vec_spec]
        args = (y_pad, scale, bias)
    elif res_affine is None:
        kernel = affine_add_relu_kernel
        in_specs = [row_spec, vec_spec, vec_spec, row_spec]
        args = (y_pad, scale, bias, residual)
    else:
        kernel = affine2_add_relu_kernel
        in_specs = [row_spec, vec_spec, vec_spec, row_spec, vec_spec, vec_spec]
        args = (y_pad, scale, bias, residual, res_affine[0], res_affine[1])

    return pl.pallas_call(
        kernel,
        out_shape=jax.ShapeDtypeStruct((mp, CP), jnp.bfloat16),
        grid=(mp // tr,),
        in_specs=in_specs,
        out_specs=row_spec,
        compiler_params=pltpu.CompilerParams(dimension_semantics=("parallel",)),
    )(*args)


# TODO(synk): tap gathering still materializes patch slices in HBM; an in-kernel
# strided spatial gather would remove that traffic but is left out for robustness.
def im2col(x, kh, kw, stride, pad):
    """NHWC -> (N*OH*OW, kh*kw*C) patch matrix. All slice params are static ints."""
    n, h, w, c = x.shape
    xp = jnp.pad(x, ((0, 0), (pad, pad), (pad, pad), (0, 0)))
    oh = (h + 2 * pad - kh) // stride + 1
    ow = (w + 2 * pad - kw) // stride + 1
    cols = []
    for i in range(kh):
        for j in range(kw):
            cols.append(xp[:, i:i + (oh - 1) * stride + 1:stride,
                              j:j + (ow - 1) * stride + 1:stride, :])
    a = jnp.concatenate(cols, axis=-1)          # column order: (kh, kw, C)
    return a.reshape(n * oh * ow, kh * kw * c), (n, oh, ow)


def conv_bn(x, wmat, kh, kw, stride, pad, gamma, beta,
            residual=None, res_affine=None):
    """conv (matmul + fused BN stats) + fused BN affine (+residual) + ReLU.

    Returns (flat padded bf16 output (Mp, CP), (N, OH, OW), M_real).
    """
    a, (n, oh, ow) = im2col(x, kh, kw, stride, pad)
    m_real = n * oh * ow
    y, s, sq = conv_matmul_stats(a, wmat)
    scale, bias = _bn_coeffs(s, sq, m_real, gamma, beta)
    out = bn_affine(y, scale, bias, residual=residual, res_affine=res_affine)
    return out, (n, oh, ow), m_real


def maxpool_3x3_s2(x):
    """MaxPool2d(kernel=3, stride=2, padding=1) on NHWC (input is post-ReLU, >= 0,
    so zero spatial padding is equivalent to -inf padding)."""
    n, h, w, c = x.shape
    k, s, pad = 3, 2, 1
    oh = (h + 2 * pad - k) // s + 1
    ow = (w + 2 * pad - k) // s + 1
    xp = jnp.pad(x, ((0, 0), (pad, pad), (pad, pad), (0, 0)))
    m = n * oh * ow
    mp = _round_up(m, _m_tile(m))
    taps = []
    for i in range(k):
        for j in range(k):
            t = xp[:, i:i + (oh - 1) * s + 1:s, j:j + (ow - 1) * s + 1:s, :]
            taps.append(jnp.pad(t.reshape(m, c), ((0, mp - m), (0, 0))))
    tr = _row_tile(mp)
    spec = pl.BlockSpec((tr, c), lambda i: (i, 0))
    out = pl.pallas_call(
        max9_kernel,
        out_shape=jax.ShapeDtypeStruct((mp, c), x.dtype),
        grid=(mp // tr,),
        in_specs=[spec] * 9,
        out_specs=spec,
        compiler_params=pltpu.CompilerParams(dimension_semantics=("parallel",)),
    )(*taps)
    return out[:m].reshape(n, oh, ow, c)


# ---------------------------------------------------------------------------- model
def basic_block(x, blk, stride):
    """Post-activation BasicBlock: relu(bn2(conv2(relu(bn1(conv1(x))))) + identity)."""
    n, h, w, _ = x.shape
    out1, (bn_, oh, ow), m1 = conv_bn(x, blk["conv1_w"], 3, 3, stride, 1,
                                      blk["bn1_g"], blk["bn1_b"])
    out1_nhwc = out1[:m1].reshape(bn_, oh, ow, CP)

    if "down_w" in blk:
        # Downsample conv; its BN affine is fused into conv2's epilogue kernel.
        a_ds, _ = im2col(x, 1, 1, stride, 0)
        y_ds, s_ds, sq_ds = conv_matmul_stats(a_ds, blk["down_w"])
        ds_scale, ds_bias = _bn_coeffs(s_ds, sq_ds, bn_ * oh * ow,
                                       blk["dbn_g"], blk["dbn_b"])
        residual, res_affine = y_ds, (ds_scale, ds_bias)
    else:
        m_id = n * h * w
        mp_id = _round_up(m_id, _m_tile(m_id))
        residual = jnp.pad(x.reshape(m_id, CP), ((0, mp_id - m_id), (0, 0)))
        res_affine = None

    out2, _, m2 = conv_bn(out1_nhwc, blk["conv2_w"], 3, 3, 1, 1,
                          blk["bn2_g"], blk["bn2_b"],
                          residual=residual, res_affine=res_affine)
    return out2[:m2].reshape(bn_, oh, ow, CP)


def forward(params, x_nchw):
    x = jnp.transpose(x_nchw, (0, 2, 3, 1)).astype(jnp.bfloat16)  # NCHW -> NHWC (3 ch)

    # stem: 7x7/2 conv + BN + ReLU; channels padded to 128 lanes from here on
    out, (n, oh, ow), m = conv_bn(x, params["conv1_w"], 7, 7, 2, 3,
                                  params["bn1_g"], params["bn1_b"])
    x = out[:m].reshape(n, oh, ow, CP)
    x = maxpool_3x3_s2(x)

    layer_strides = (1, 2, 2, 2)                                  # static architecture config
    for li, layer in enumerate(params["layers"]):
        for bi, blk in enumerate(layer):
            s = layer_strides[li] if bi == 0 else 1
            x = basic_block(x, blk, s)

    feat = jnp.mean(x.astype(jnp.float32), axis=(1, 2))           # AdaptiveAvgPool2d((1,1))
    nc = params["fc_b"].shape[0]
    b = feat.shape[0]
    bp = _round_up(b, 8)
    a = jnp.pad(feat, ((0, bp - b), (0, 0))).astype(jnp.bfloat16)
    bias = jnp.pad(params["fc_b"], (0, CP - nc)).reshape(1, CP)
    y = pl.pallas_call(
        fc_kernel,
        out_shape=jax.ShapeDtypeStruct((bp, CP), jnp.float32),
    )(a, params["fc_w"], bias)
    return y[:b, :nc]


# ------------------------------------------------------------------------- parameters
def _prep_conv(w, cin_pad):
    """(cout, cin, kh, kw) f32 -> bf16 (round_up(kh*kw*cin_pad,128), CP) matmul weight."""
    cout, cin, kh, kw = w.shape
    wm = jnp.transpose(w, (2, 3, 1, 0))                           # (kh, kw, cin, cout)
    wm = jnp.pad(wm, ((0, 0), (0, 0), (0, cin_pad - cin), (0, CP - cout)))
    wm = wm.reshape(kh * kw * cin_pad, CP)
    k128 = _round_up(wm.shape[0], 128)
    wm = jnp.pad(wm, ((0, k128 - wm.shape[0]), (0, 0)))
    return wm.astype(jnp.bfloat16)


def make_params(key, num_classes=20, blocks_num_list=(2, 2, 2, 2)):
    keys = iter(jax.random.split(key, 64))

    def conv_w(cout, cin, k):
        # kaiming_normal_, mode='fan_out', nonlinearity='relu'
        std = (2.0 / (cout * k * k)) ** 0.5
        return jax.random.normal(next(keys), (cout, cin, k, k), jnp.float32) * std

    def bn_pair(c):
        return (jnp.pad(jnp.ones((c,), jnp.float32), (0, CP - c)),
                jnp.pad(jnp.zeros((c,), jnp.float32), (0, CP - c)))

    params = {"conv1_w": _prep_conv(conv_w(16, 3, 7), cin_pad=3)}
    params["bn1_g"], params["bn1_b"] = bn_pair(16)

    layers = []
    inplanes = 16
    for planes, nblocks, stride in zip((16, 32, 64, 128), blocks_num_list, (1, 2, 2, 2)):
        blocks = []
        for bi in range(nblocks):
            s = stride if bi == 0 else 1
            blk = {
                "conv1_w": _prep_conv(conv_w(planes, inplanes, 3), cin_pad=CP),
                "conv2_w": _prep_conv(conv_w(planes, planes, 3), cin_pad=CP),
            }
            blk["bn1_g"], blk["bn1_b"] = bn_pair(planes)
            blk["bn2_g"], blk["bn2_b"] = bn_pair(planes)
            if s != 1 or inplanes != planes:
                blk["down_w"] = _prep_conv(conv_w(planes, inplanes, 1), cin_pad=CP)
                blk["dbn_g"], blk["dbn_b"] = bn_pair(planes)
            blocks.append(blk)
            inplanes = planes
        layers.append(blocks)
    params["layers"] = layers

    # nn.Linear default init: U(-1/sqrt(fan_in), 1/sqrt(fan_in))
    fan_in = 128
    bound = 1.0 / (fan_in ** 0.5)
    fc_w = jax.random.uniform(next(keys), (num_classes, fan_in), jnp.float32, -bound, bound)
    params["fc_w"] = jnp.pad(fc_w.T, ((0, 0), (0, CP - num_classes))).astype(jnp.bfloat16)
    params["fc_b"] = jax.random.uniform(next(keys), (num_classes,), jnp.float32, -bound, bound)
    return params


if __name__ == "__main__":
    key = jax.random.PRNGKey(0)
    pkey, xkey = jax.random.split(key)
    params = make_params(pkey, num_classes=20)
    x = jax.random.normal(xkey, (2, 3, 32, 32), jnp.float32)      # NCHW, like PyTorch

    fwd = jax.jit(forward)
    out = jax.block_until_ready(fwd(params, x))
    assert out.shape == (2, 20), out.shape
    assert bool(jnp.all(jnp.isfinite(out)))
    print("KERNEL_OK")
</pallas_src>

<mosaic_0001>
module attributes {stable_mosaic.version = 11 : i64} {
  func.func @affine_relu_kernel(%arg0: i32, %arg1: memref<512x128xbf16, #tpu.memory_space<vmem>>, %arg2: memref<1x128xf32, #tpu.memory_space<vmem>>, %arg3: memref<1x128xf32, #tpu.memory_space<vmem>>, %arg4: memref<512x128xbf16, #tpu.memory_space<vmem>>) attributes {dimension_semantics = [#tpu.dimension_semantics<parallel>], iteration_bounds = array<i64: 1>, scalar_prefetch = 0 : i64, scratch_operands = 0 : i64, tpu.core_type = #tpu.core_type<tc>, window_params = [{transform_indices = @transform_0, window_bounds = array<i64: 512, 128>}, {pipeline_mode = #tpu.pipeline_mode<synchronous>, transform_indices = @transform_1, window_bounds = array<i64: 1, 128>}, {pipeline_mode = #tpu.pipeline_mode<synchronous>, transform_indices = @transform_2, window_bounds = array<i64: 1, 128>}, {transform_indices = @transform_3, window_bounds = array<i64: 512, 128>}]} {
    %c0 = arith.constant 0 : index
    %c0_0 = arith.constant 0 : index
    %0 = vector.load %arg1[%c0, %c0_0] : memref<512x128xbf16, #tpu.memory_space<vmem>>, vector<512x128xbf16>
    %1 = arith.extf %0 : vector<512x128xbf16> to vector<512x128xf32>
    %c0_1 = arith.constant 0 : index
    %c0_2 = arith.constant 0 : index
    %2 = vector.load %arg2[%c0_1, %c0_2] : memref<1x128xf32, #tpu.memory_space<vmem>>, vector<1x128xf32>
    %3 = vector.broadcast %2 : vector<1x128xf32> to vector<512x128xf32>
    %4 = arith.mulf %1, %3 : vector<512x128xf32>
    %c0_3 = arith.constant 0 : index
    %c0_4 = arith.constant 0 : index
    %5 = vector.load %arg3[%c0_3, %c0_4] : memref<1x128xf32, #tpu.memory_space<vmem>>, vector<1x128xf32>
    %6 = vector.broadcast %5 : vector<1x128xf32> to vector<512x128xf32>
    %7 = arith.addf %4, %6 : vector<512x128xf32>
    %cst = arith.constant 0.000000e+00 : f32
    %8 = vector.broadcast %cst : f32 to vector<512x128xf32>
    %9 = arith.maximumf %7, %8 : vector<512x128xf32>
    %10 = arith.truncf %9 : vector<512x128xf32> to vector<512x128xbf16>
    %c0_5 = arith.constant 0 : index
    %c0_6 = arith.constant 0 : index
    %11 = vector.load %arg4[%c0_5, %c0_6] : memref<512x128xbf16, #tpu.memory_space<vmem>>, vector<512x128xbf16>
    tpu.vector_store %arg4[%c0_5, %c0_6], %10 {strides = array<i32>} : memref<512x128xbf16, #tpu.memory_space<vmem>>, vector<512x128xbf16>,
    return
  }
  func.func @transform_0(%arg0: i32) -> (i32, i32) {
    %c0_i32 = arith.constant 0 : i32
    %c0_i32_0 = arith.constant 0 : i32
    return %arg0, %c0_i32 : i32, i32
  }
  func.func @transform_1(%arg0: i32) -> (i32, i32) {
    %c0_i32 = arith.constant 0 : i32
    %c0_i32_0 = arith.constant 0 : i32
    %c0_i32_1 = arith.constant 0 : i32
    return %c0_i32, %c0_i32_0 : i32, i32
  }
  func.func @transform_2(%arg0: i32) -> (i32, i32) {
    %c0_i32 = arith.constant 0 : i32
    %c0_i32_0 = arith.constant 0 : i32
    %c0_i32_1 = arith.constant 0 : i32
    return %c0_i32, %c0_i32_0 : i32, i32
  }
  func.func @transform_3(%arg0: i32) -> (i32, i32) {
    %c0_i32 = arith.constant 0 : i32
    %c0_i32_0 = arith.constant 0 : i32
    return %arg0, %c0_i32 : i32, i32
  }
}

module attributes {stable_mosaic.version = 11 : i64} {
  func.func @conv_mm_stats_kernel(%arg0: i32, %arg1: i32, %arg2: memref<512x256xbf16, #tpu.memory_space<vmem>>, %arg3: memref<256x128xbf16, #tpu.memory_space<vmem>>, %arg4: memref<512x128xbf16, #tpu.memory_space<vmem>>, %arg5: memref<1x128xf32, #tpu.memory_space<vmem>>, %arg6: memref<1x128xf32, #tpu.memory_space<vmem>>, %arg7: memref<512x128xf32, #tpu.memory_space<vmem>>) attributes {dimension_semantics = [#tpu.dimension_semantics<arbitrary>, #tpu.dimension_semantics<arbitrary>], iteration_bounds = array<i64: 1, 1>, scalar_prefetch = 0 : i64, scratch_operands = 1 : i64, tpu.core_type = #tpu.core_type<tc>, window_params = [{transform_indices = @transform_0, window_bounds = array<i64: 512, 256>}, {transform_indices = @transform_1, window_bounds = array<i64: 256, 128>}, {transform_indices = @transform_2, window_bounds = array<i64: 512, 128>}, {pipeline_mode = #tpu.pipeline_mode<synchronous>, transform_indices = @transform_3, window_bounds = array<i64: 1, 128>}, {pipeline_mode = #tpu.pipeline_mode<synchronous>, transform_indices = @transform_4, window_bounds = array<i64: 1, 128>}]} {
    %c0_i32 = arith.constant 0 : i32
    %0 = arith.cmpi eq, %arg1, %c0_i32 : i32
    %1 = arith.extui %0 : i1 to i32
    %c0_i32_0 = arith.constant 0 : i32
    %2 = arith.cmpi ne, %1, %c0_i32_0 : i32
    scf.if %2 {
      %cst_13 = arith.constant 0.000000e+00 : f32
      %17 = vector.broadcast %cst_13 : f32 to vector<512x128xf32>
      %c0_14 = arith.constant 0 : index
      %c0_15 = arith.constant 0 : index
      %18 = vector.load %arg7[%c0_14, %c0_15] : memref<512x128xf32, #tpu.memory_space<vmem>>, vector<512x128xf32>
      tpu.vector_store %arg7[%c0_14, %c0_15], %17 {strides = array<i32>} : memref<512x128xf32, #tpu.memory_space<vmem>>, vector<512x128xf32>,
    } else {
    }
    %c0 = arith.constant 0 : index
    %c0_1 = arith.constant 0 : index
    %3 = vector.load %arg7[%c0, %c0_1] : memref<512x128xf32, #tpu.memory_space<vmem>>, vector<512x128xf32>
    %c0_2 = arith.constant 0 : index
    %c0_3 = arith.constant 0 : index
    %4 = vector.load %arg2[%c0_2, %c0_3] : memref<512x256xbf16, #tpu.memory_space<vmem>>, vector<512x256xbf16>
    %c0_4 = arith.constant 0 : index
    %c0_5 = arith.constant 0 : index
    %5 = vector.load %arg3[%c0_4, %c0_5] : memref<256x128xbf16, #tpu.memory_space<vmem>>, vector<256x128xbf16>
    %cst = arith.constant dense<0.000000e+00> : vector<512x128xf32>
    %6 = tpu.matmul %4, %5, %cst {dimension_numbers = #tpu.dot_dimension_numbers<[1], [0], [0], [1], [0, 0, 1, 1], [], []>} : vector<512x256xbf16>, vector<256x128xbf16>, vector<512x128xf32> -> vector<512x128xf32>
    %7 = arith.addf %3, %6 : vector<512x128xf32>
    %c0_6 = arith.constant 0 : index
    %c0_7 = arith.constant 0 : index
    %8 = vector.load %arg7[%c0_6, %c0_7] : memref<512x128xf32, #tpu.memory_space<vmem>>, vector<512x128xf32>
    tpu.vector_store %arg7[%c0_6, %c0_7], %7 {strides = array<i32>} : memref<512x128xf32, #tpu.memory_space<vmem>>, vector<512x128xf32>,
    %c0_i32_8 = arith.constant 0 : i32
    %9 = arith.cmpi eq, %arg1, %c0_i32_8 : i32
    %c0_i32_9 = arith.constant 0 : i32
    %10 = arith.cmpi eq, %arg0, %c0_i32_9 : i32
    %11 = arith.andi %9, %10 : i1
    %12 = arith.extui %11 : i1 to i32
    %c0_i32_10 = arith.constant 0 : i32
    %13 = arith.cmpi ne, %12, %c0_i32_10 : i32
    scf.if %13 {
      %cst_13 = arith.constant 0.000000e+00 : f32
      %17 = vector.broadcast %cst_13 : f32 to vector<1x128xf32>
      %c0_14 = arith.constant 0 : index
      %c0_15 = arith.constant 0 : index
      %18 = vector.load %arg5[%c0_14, %c0_15] : memref<1x128xf32, #tpu.memory_space<vmem>>, vector<1x128xf32>
      tpu.vector_store %arg5[%c0_14, %c0_15], %17 {strides = array<i32>} : memref<1x128xf32, #tpu.memory_space<vmem>>, vector<1x128xf32>,
      %cst_16 = arith.constant 0.000000e+00 : f32
      %19 = vector.broadcast %cst_16 : f32 to vector<1x128xf32>
      %c0_17 = arith.constant 0 : index
      %c0_18 = arith.constant 0 : index
      %20 = vector.load %arg6[%c0_17, %c0_18] : memref<1x128xf32, #tpu.memory_space<vmem>>, vector<1x128xf32>
      tpu.vector_store %arg6[%c0_17, %c0_18], %19 {strides = array<i32>} : memref<1x128xf32, #tpu.memory_space<vmem>>, vector<1x128xf32>,
    } else {
    }
    %c0_i32_11 = arith.constant 0 : i32
    %14 = arith.cmpi eq, %arg1, %c0_i32_11 : i32
    %15 = arith.extui %14 : i1 to i32
    %c0_i32_12 = arith.constant 0 : i32
    %16 = arith.cmpi ne, %15, %c0_i32_12 : i32
    scf.if %16 {
      %c0_13 = arith.constant 0 : index
      %c0_14 = arith.constant 0 : index
      %17 = vector.load %arg7[%c0_13, %c0_14] : memref<512x128xf32, #tpu.memory_space<vmem>>, vector<512x128xf32>
      %18 = arith.truncf %17 : vector<512x128xf32> to vector<512x128xbf16>
      %c0_15 = arith.constant 0 : index
      %c0_16 = arith.constant 0 : index
      %19 = vector.load %arg4[%c0_15, %c0_16] : memref<512x128xbf16, #tpu.memory_space<vmem>>, vector<512x128xbf16>
      tpu.vector_store %arg4[%c0_15, %c0_16], %18 {strides = array<i32>} : memref<512x128xbf16, #tpu.memory_space<vmem>>, vector<512x128xbf16>,
      %c0_17 = arith.constant 0 : index
      %c0_18 = arith.constant 0 : index
      %20 = vector.load %arg5[%c0_17, %c0_18] : memref<1x128xf32, #tpu.memory_space<vmem>>, vector<1x128xf32>
      %cst_19 = arith.constant dense<0.000000e+00> : vector<128xf32>
      %21 = vector.multi_reduction <add>, %17, %cst_19 [0] : vector<512x128xf32> to vector<128xf32>
      %22 = vector.shape_cast %21 : vector<128xf32> to vector<1x128xf32>
      %23 = arith.addf %20, %22 : vector<1x128xf32>
      %c0_20 = arith.constant 0 : index
      %c0_21 = arith.constant 0 : index
      %24 = vector.load %arg5[%c0_20, %c0_21] : memref<1x128xf32, #tpu.memory_space<vmem>>, vector<1x128xf32>
      tpu.vector_store %arg5[%c0_20, %c0_21], %23 {strides = array<i32>} : memref<1x128xf32, #tpu.memory_space<vmem>>, vector<1x128xf32>,
      %c0_22 = arith.constant 0 : index
      %c0_23 = arith.constant 0 : index
      %25 = vector.load %arg6[%c0_22, %c0_23] : memref<1x128xf32, #tpu.memory_space<vmem>>, vector<1x128xf32>
      %26 = arith.mulf %17, %17 : vector<512x128xf32>
      %cst_24 = arith.constant dense<0.000000e+00> : vector<128xf32>
      %27 = vector.multi_reduction <add>, %26, %cst_24 [0] : vector<512x128xf32> to vector<128xf32>
      %28 = vector.shape_cast %27 : vector<128xf32> to vector<1x128xf32>
      %29 = arith.addf %25, %28 : vector<1x128xf32>
      %c0_25 = arith.constant 0 : index
      %c0_26 = arith.constant 0 : index
      %30 = vector.load %arg6[%c0_25, %c0_26] : memref<1x128xf32, #tpu.memory_space<vmem>>, vector<1x128xf32>
      tpu.vector_store %arg6[%c0_25, %c0_26], %29 {strides = array<i32>} : memref<1x128xf32, #tpu.memory_space<vmem>>, vector<1x128xf32>,
    } else {
    }
    return
  }
  func.func @transform_0(%arg0: i32, %arg1: i32) -> (i32, i32) {
    %c0_i32 = arith.constant 0 : i32
    return %arg0, %arg1 : i32, i32
  }
  func.func @transform_1(%arg0: i32, %arg1: i32) -> (i32, i32) {
    %c0_i32 = arith.constant 0 : i32
    %c0_i32_0 = arith.constant 0 : i32
    return %arg1, %c0_i32 : i32, i32
  }
  func.func @transform_2(%arg0: i32, %arg1: i32) -> (i32, i32) {
    %c0_i32 = arith.constant 0 : i32
    %c0_i32_0 = arith.constant 0 : i32
    return %arg0, %c0_i32 : i32, i32
  }
  func.func @transform_3(%arg0: i32, %arg1: i32) -> (i32, i32) {
    %c0_i32 = arith.constant 0 : i32
    %c0_i32_0 = arith.constant 0 : i32
    %c0_i32_1 = arith.constant 0 : i32
    return %c0_i32, %c0_i32_0 : i32, i32
  }
  func.func @transform_4(%arg0: i32, %arg1: i32) -> (i32, i32) {
    %c0_i32 = arith.constant 0 : i32
    %c0_i32_0 = arith.constant 0 : i32
    %c0_i32_1 = arith.constant 0 : i32
    return %c0_i32, %c0_i32_0 : i32, i32
  }
}

module attributes {stable_mosaic.version = 11 : i64} {
  func.func @max9_kernel(%arg0: i32, %arg1: memref<128x128xbf16, #tpu.memory_space<vmem>>, %arg2: memref<128x128xbf16, #tpu.memory_space<vmem>>, %arg3: memref<128x128xbf16, #tpu.memory_space<vmem>>, %arg4: memref<128x128xbf16, #tpu.memory_space<vmem>>, %arg5: memref<128x128xbf16, #tpu.memory_space<vmem>>, %arg6: memref<128x128xbf16, #tpu.memory_space<vmem>>, %arg7: memref<128x128xbf16, #tpu.memory_space<vmem>>, %arg8: memref<128x128xbf16, #tpu.memory_space<vmem>>, %arg9: memref<128x128xbf16, #tpu.memory_space<vmem>>, %arg10: memref<128x128xbf16, #tpu.memory_space<vmem>>) attributes {dimension_semantics = [#tpu.dimension_semantics<parallel>], iteration_bounds = array<i64: 1>, scalar_prefetch = 0 : i64, scratch_operands = 0 : i64, tpu.core_type = #tpu.core_type<tc>, window_params = [{transform_indices = @transform_0, window_bounds = array<i64: 128, 128>}, {transform_indices = @transform_1, window_bounds = array<i64: 128, 128>}, {transform_indices = @transform_2, window_bounds = array<i64: 128, 128>}, {transform_indices = @transform_3, window_bounds = array<i64: 128, 128>}, {transform_indices = @transform_4, window_bounds = array<i64: 128, 128>}, {transform_indices = @transform_5, window_bounds = array<i64: 128, 128>}, {transform_indices = @transform_6, window_bounds = array<i64: 128, 128>}, {transform_indices = @transform_7, window_bounds = array<i64: 128, 128>}, {transform_indices = @transform_8, window_bounds = array<i64: 128, 128>}, {transform_indices = @transform_9, window_bounds = array<i64: 128, 128>}]} {
    %c0 = arith.constant 0 : index
    %c0_0 = arith.constant 0 : index
    %0 = vector.load %arg1[%c0, %c0_0] : memref<128x128xbf16, #tpu.memory_space<vmem>>, vector<128x128xbf16>
    %c0_1 = arith.constant 0 : index
    %c0_2 = arith.constant 0 : index
    %1 = vector.load %arg2[%c0_1, %c0_2] : memref<128x128xbf16, #tpu.memory_space<vmem>>, vector<128x128xbf16>
    %2 = arith.maximumf %0, %1 : vector<128x128xbf16>
    %c0_3 = arith.constant 0 : index
    %c0_4 = arith.constant 0 : index
    %3 = vector.load %arg3[%c0_3, %c0_4] : memref<128x128xbf16, #tpu.memory_space<vmem>>, vector<128x128xbf16>
    %4 = arith.maximumf %2, %3 : vector<128x128xbf16>
    %c0_5 = arith.constant 0 : index
    %c0_6 = arith.constant 0 : index
    %5 = vector.load %arg4[%c0_5, %c0_6] : memref<128x128xbf16, #tpu.memory_space<vmem>>, vector<128x128xbf16>
    %6 = arith.maximumf %4, %5 : vector<128x128xbf16>
    %c0_7 = arith.constant 0 : index
    %c0_8 = arith.constant 0 : index
    %7 = vector.load %arg5[%c0_7, %c0_8] : memref<128x128xbf16, #tpu.memory_space<vmem>>, vector<128x128xbf16>
    %8 = arith.maximumf %6, %7 : vector<128x128xbf16>
    %c0_9 = arith.constant 0 : index
    %c0_10 = arith.constant 0 : index
    %9 = vector.load %arg6[%c0_9, %c0_10] : memref<128x128xbf16, #tpu.memory_space<vmem>>, vector<128x128xbf16>
    %10 = arith.maximumf %8, %9 : vector<128x128xbf16>
    %c0_11 = arith.constant 0 : index
    %c0_12 = arith.constant 0 : index
    %11 = vector.load %arg7[%c0_11, %c0_12] : memref<128x128xbf16, #tpu.memory_space<vmem>>, vector<128x128xbf16>
    %12 = arith.maximumf %10, %11 : vector<128x128xbf16>
    %c0_13 = arith.constant 0 : index
    %c0_14 = arith.constant 0 : index
    %13 = vector.load %arg8[%c0_13, %c0_14] : memref<128x128xbf16, #tpu.memory_space<vmem>>, vector<128x128xbf16>
    %14 = arith.maximumf %12, %13 : vector<128x128xbf16>
    %c0_15 = arith.constant 0 : index
    %c0_16 = arith.constant 0 : index
    %15 = vector.load %arg9[%c0_15, %c0_16] : memref<128x128xbf16, #tpu.memory_space<vmem>>, vector<128x128xbf16>
    %16 = arith.maximumf %14, %15 : vector<128x128xbf16>
    %c0_17 = arith.constant 0 : index
    %c0_18 = arith.constant 0 : index
    %17 = vector.load %arg10[%c0_17, %c0_18] : memref<128x128xbf16, #tpu.memory_space<vmem>>, vector<128x128xbf16>
    tpu.vector_store %arg10[%c0_17, %c0_18], %16 {strides = array<i32>} : memref<128x128xbf16, #tpu.memory_space<vmem>>, vector<128x128xbf16>,
    return
  }
  func.func @transform_0(%arg0: i32) -> (i32, i32) {
    %c0_i32 = arith.constant 0 : i32
    %c0_i32_0 = arith.constant 0 : i32
    return %arg0, %c0_i32 : i32, i32
  }
  func.func @transform_1(%arg0: i32) -> (i32, i32) {
    %c0_i32 = arith.constant 0 : i32
    %c0_i32_0 = arith.constant 0 : i32
    return %arg0, %c0_i32 : i32, i32
  }
  func.func @transform_2(%arg0: i32) -> (i32, i32) {
    %c0_i32 = arith.constant 0 : i32
    %c0_i32_0 = arith.constant 0 : i32
    return %arg0, %c0_i32 : i32, i32
  }
  func.func @transform_3(%arg0: i32) -> (i32, i32) {
    %c0_i32 = arith.constant 0 : i32
    %c0_i32_0 = arith.constant 0 : i32
    return %arg0, %c0_i32 : i32, i32
  }
  func.func @transform_4(%arg0: i32) -> (i32, i32) {
    %c0_i32 = arith.constant 0 : i32
    %c0_i32_0 = arith.constant 0 : i32
    return %arg0, %c0_i32 : i32, i32
  }
  func.func @transform_5(%arg0: i32) -> (i32, i32) {
    %c0_i32 = arith.constant 0 : i32
    %c0_i32_0 = arith.constant 0 : i32
    return %arg0, %c0_i32 : i32, i32
  }
  func.func @transform_6(%arg0: i32) -> (i32, i32) {
    %c0_i32 = arith.constant 0 : i32
    %c0_i32_0 = arith.constant 0 : i32
    return %arg0, %c0_i32 : i32, i32
  }
  func.func @transform_7(%arg0: i32) -> (i32, i32) {
    %c0_i32 = arith.constant 0 : i32
    %c0_i32_0 = arith.constant 0 : i32
    return %arg0, %c0_i32 : i32, i32
  }
  func.func @transform_8(%arg0: i32) -> (i32, i32) {
    %c0_i32 = arith.constant 0 : i32
    %c0_i32_0 = arith.constant 0 : i32
    return %arg0, %c0_i32 : i32, i32
  }
  func.func @transform_9(%arg0: i32) -> (i32, i32) {
    %c0_i32 = arith.constant 0 : i32
    %c0_i32_0 = arith.constant 0 : i32
    return %arg0, %c0_i32 : i32, i32
  }
}

module attributes {stable_mosaic.version = 11 : i64} {
  func.func @conv_mm_stats_kernel(%arg0: i32, %arg1: i32, %arg2: memref<128x384xbf16, #tpu.memory_space<vmem>>, %arg3: memref<384x128xbf16, #tpu.memory_space<vmem>>, %arg4: memref<128x128xbf16, #tpu.memory_space<vmem>>, %arg5: memref<1x128xf32, #tpu.memory_space<vmem>>, %arg6: memref<1x128xf32, #tpu.memory_space<vmem>>, %arg7: memref<128x128xf32, #tpu.memory_space<vmem>>) attributes {dimension_semantics = [#tpu.dimension_semantics<arbitrary>, #tpu.dimension_semantics<arbitrary>], iteration_bounds = array<i64: 1, 3>, scalar_prefetch = 0 : i64, scratch_operands = 1 : i64, tpu.core_type = #tpu.core_type<tc>, window_params = [{transform_indices = @transform_0, window_bounds = array<i64: 128, 384>}, {transform_indices = @transform_1, window_bounds = array<i64: 384, 128>}, {transform_indices = @transform_2, window_bounds = array<i64: 128, 128>}, {pipeline_mode = #tpu.pipeline_mode<synchronous>, transform_indices = @transform_3, window_bounds = array<i64: 1, 128>}, {pipeline_mode = #tpu.pipeline_mode<synchronous>, transform_indices = @transform_4, window_bounds = array<i64: 1, 128>}]} {
    %c0_i32 = arith.constant 0 : i32
    %0 = arith.cmpi eq, %arg1, %c0_i32 : i32
    %1 = arith.extui %0 : i1 to i32
    %c0_i32_0 = arith.constant 0 : i32
    %2 = arith.cmpi ne, %1, %c0_i32_0 : i32
    scf.if %2 {
      %cst_12 = arith.constant 0.000000e+00 : f32
      %17 = vector.broadcast %cst_12 : f32 to vector<128x128xf32>
      %c0_13 = arith.constant 0 : index
      %c0_14 = arith.constant 0 : index
      %18 = vector.load %arg7[%c0_13, %c0_14] : memref<128x128xf32, #tpu.memory_space<vmem>>, vector<128x128xf32>
      tpu.vector_store %arg7[%c0_13, %c0_14], %17 {strides = array<i32>} : memref<128x128xf32, #tpu.memory_space<vmem>>, vector<128x128xf32>,
    } else {
    }
    %c0 = arith.constant 0 : index
    %c0_1 = arith.constant 0 : index
    %3 = vector.load %arg7[%c0, %c0_1] : memref<128x128xf32, #tpu.memory_space<vmem>>, vector<128x128xf32>
    %c0_2 = arith.constant 0 : index
    %c0_3 = arith.constant 0 : index
    %4 = vector.load %arg2[%c0_2, %c0_3] : memref<128x384xbf16, #tpu.memory_space<vmem>>, vector<128x384xbf16>
    %c0_4 = arith.constant 0 : index
    %c0_5 = arith.constant 0 : index
    %5 = vector.load %arg3[%c0_4, %c0_5] : memref<384x128xbf16, #tpu.memory_space<vmem>>, vector<384x128xbf16>
    %cst = arith.constant dense<0.000000e+00> : vector<128x128xf32>
    %6 = tpu.matmul %4, %5, %cst {dimension_numbers = #tpu.dot_dimension_numbers<[1], [0], [0], [1], [0, 0, 1, 1], [], []>} : vector<128x384xbf16>, vector<384x128xbf16>, vector<128x128xf32> -> vector<128x128xf32>
    %7 = arith.addf %3, %6 : vector<128x128xf32>
    %c0_6 = arith.constant 0 : index
    %c0_7 = arith.constant 0 : index
    %8 = vector.load %arg7[%c0_6, %c0_7] : memref<128x128xf32, #tpu.memory_space<vmem>>, vector<128x128xf32>
    tpu.vector_store %arg7[%c0_6, %c0_7], %7 {strides = array<i32>} : memref<128x128xf32, #tpu.memory_space<vmem>>, vector<128x128xf32>,
    %c2_i32 = arith.constant 2 : i32
    %9 = arith.cmpi eq, %arg1, %c2_i32 : i32
    %c0_i32_8 = arith.constant 0 : i32
    %10 = arith.cmpi eq, %arg0, %c0_i32_8 : i32
    %11 = arith.andi %9, %10 : i1
    %12 = arith.extui %11 : i1 to i32
    %c0_i32_9 = arith.constant 0 : i32
    %13 = arith.cmpi ne, %12, %c0_i32_9 : i32
    scf.if %13 {
      %cst_12 = arith.constant 0.000000e+00 : f32
      %17 = vector.broadcast %cst_12 : f32 to vector<1x128xf32>
      %c0_13 = arith.constant 0 : index
      %c0_14 = arith.constant 0 : index
      %18 = vector.load %arg5[%c0_13, %c0_14] : memref<1x128xf32, #tpu.memory_space<vmem>>, vector<1x128xf32>
      tpu.vector_store %arg5[%c0_13, %c0_14], %17 {strides = array<i32>} : memref<1x128xf32, #tpu.memory_space<vmem>>, vector<1x128xf32>,
      %cst_15 = arith.constant 0.000000e+00 : f32
      %19 = vector.broadcast %cst_15 : f32 to vector<1x128xf32>
      %c0_16 = arith.constant 0 : index
      %c0_17 = arith.constant 0 : index
      %20 = vector.load %arg6[%c0_16, %c0_17] : memref<1x128xf32, #tpu.memory_space<vmem>>, vector<1x128xf32>
      tpu.vector_store %arg6[%c0_16, %c0_17], %19 {strides = array<i32>} : memref<1x128xf32, #tpu.memory_space<vmem>>, vector<1x128xf32>,
    } else {
    }
    %c2_i32_10 = arith.constant 2 : i32
    %14 = arith.cmpi eq, %arg1, %c2_i32_10 : i32
    %15 = arith.extui %14 : i1 to i32
    %c0_i32_11 = arith.constant 0 : i32
    %16 = arith.cmpi ne, %15, %c0_i32_11 : i32
    scf.if %16 {
      %c0_12 = arith.constant 0 : index
      %c0_13 = arith.constant 0 : index
      %17 = vector.load %arg7[%c0_12, %c0_13] : memref<128x128xf32, #tpu.memory_space<vmem>>, vector<128x128xf32>
      %18 = arith.truncf %17 : vector<128x128xf32> to vector<128x128xbf16>
      %c0_14 = arith.constant 0 : index
      %c0_15 = arith.constant 0 : index
      %19 = vector.load %arg4[%c0_14, %c0_15] : memref<128x128xbf16, #tpu.memory_space<vmem>>, vector<128x128xbf16>
      tpu.vector_store %arg4[%c0_14, %c0_15], %18 {strides = array<i32>} : memref<128x128xbf16, #tpu.memory_space<vmem>>, vector<128x128xbf16>,
      %c0_16 = arith.constant 0 : index
      %c0_17 = arith.constant 0 : index
      %20 = vector.load %arg5[%c0_16, %c0_17] : memref<1x128xf32, #tpu.memory_space<vmem>>, vector<1x128xf32>
      %cst_18 = arith.constant dense<0.000000e+00> : vector<128xf32>
      %21 = vector.multi_reduction <add>, %17, %cst_18 [0] : vector<128x128xf32> to vector<128xf32>
      %22 = vector.shape_cast %21 : vector<128xf32> to vector<1x128xf32>
      %23 = arith.addf %20, %22 : vector<1x128xf32>
      %c0_19 = arith.constant 0 : index
      %c0_20 = arith.constant 0 : index
      %24 = vector.load %arg5[%c0_19, %c0_20] : memref<1x128xf32, #tpu.memory_space<vmem>>, vector<1x128xf32>
      tpu.vector_store %arg5[%c0_19, %c0_20], %23 {strides = array<i32>} : memref<1x128xf32, #tpu.memory_space<vmem>>, vector<1x128xf32>,
      %c0_21 = arith.constant 0 : index
      %c0_22 = arith.constant 0 : index
      %25 = vector.load %arg6[%c0_21, %c0_22] : memref<1x128xf32, #tpu.memory_space<vmem>>, vector<1x128xf32>
      %26 = arith.mulf %17, %17 : vector<128x128xf32>
      %cst_23 = arith.constant dense<0.000000e+00> : vector<128xf32>
      %27 = vector.multi_reduction <add>, %26, %cst_23 [0] : vector<128x128xf32> to vector<128xf32>
      %28 = vector.shape_cast %27 : vector<128xf32> to vector<1x128xf32>
      %29 = arith.addf %25, %28 : vector<1x128xf32>
      %c0_24 = arith.constant 0 : index
      %c0_25 = arith.constant 0 : index
      %30 = vector.load %arg6[%c0_24, %c0_25] : memref<1x128xf32, #tpu.memory_space<vmem>>, vector<1x128xf32>
      tpu.vector_store %arg6[%c0_24, %c0_25], %29 {strides = array<i32>} : memref<1x128xf32, #tpu.memory_space<vmem>>, vector<1x128xf32>,
    } else {
    }
    return
  }
  func.func @transform_0(%arg0: i32, %arg1: i32) -> (i32, i32) {
    %c0_i32 = arith.constant 0 : i32
    return %arg0, %arg1 : i32, i32
  }
  func.func @transform_1(%arg0: i32, %arg1: i32) -> (i32, i32) {
    %c0_i32 = arith.constant 0 : i32
    %c0_i32_0 = arith.constant 0 : i32
    return %arg1, %c0_i32 : i32, i32
  }
  func.func @transform_2(%arg0: i32, %arg1: i32) -> (i32, i32) {
    %c0_i32 = arith.constant 0 : i32
    %c0_i32_0 = arith.constant 0 : i32
    return %arg0, %c0_i32 : i32, i32
  }
  func.func @transform_3(%arg0: i32, %arg1: i32) -> (i32, i32) {
    %c0_i32 = arith.constant 0 : i32
    %c0_i32_0 = arith.constant 0 : i32
    %c0_i32_1 = arith.constant 0 : i32
    return %c0_i32, %c0_i32_0 : i32, i32
  }
  func.func @transform_4(%arg0: i32, %arg1: i32) -> (i32, i32) {
    %c0_i32 = arith.constant 0 : i32
    %c0_i32_0 = arith.constant 0 : i32
    %c0_i32_1 = arith.constant 0 : i32
    return %c0_i32, %c0_i32_0 : i32, i32
  }
}

module attributes {stable_mosaic.version = 11 : i64} {
  func.func @affine_add_relu_kernel(%arg0: i32, %arg1: memref<128x128xbf16, #tpu.memory_space<vmem>>, %arg2: memref<1x128xf32, #tpu.memory_space<vmem>>, %arg3: memref<1x128xf32, #tpu.memory_space<vmem>>, %arg4: memref<128x128xbf16, #tpu.memory_space<vmem>>, %arg5: memref<128x128xbf16, #tpu.memory_space<vmem>>) attributes {dimension_semantics = [#tpu.dimension_semantics<parallel>], iteration_bounds = array<i64: 1>, scalar_prefetch = 0 : i64, scratch_operands = 0 : i64, tpu.core_type = #tpu.core_type<tc>, window_params = [{transform_indices = @transform_0, window_bounds = array<i64: 128, 128>}, {pipeline_mode = #tpu.pipeline_mode<synchronous>, transform_indices = @transform_1, window_bounds = array<i64: 1, 128>}, {pipeline_mode = #tpu.pipeline_mode<synchronous>, transform_indices = @transform_2, window_bounds = array<i64: 1, 128>}, {transform_indices = @transform_3, window_bounds = array<i64: 128, 128>}, {transform_indices = @transform_4, window_bounds = array<i64: 128, 128>}]} {
    %c0 = arith.constant 0 : index
    %c0_0 = arith.constant 0 : index
    %0 = vector.load %arg1[%c0, %c0_0] : memref<128x128xbf16, #tpu.memory_space<vmem>>, vector<128x128xbf16>
    %1 = arith.extf %0 : vector<128x128xbf16> to vector<128x128xf32>
    %c0_1 = arith.constant 0 : index
    %c0_2 = arith.constant 0 : index
    %2 = vector.load %arg2[%c0_1, %c0_2] : memref<1x128xf32, #tpu.memory_space<vmem>>, vector<1x128xf32>
    %3 = vector.broadcast %2 : vector<1x128xf32> to vector<128x128xf32>
    %4 = arith.mulf %1, %3 : vector<128x128xf32>
    %c0_3 = arith.constant 0 : index
    %c0_4 = arith.constant 0 : index
    %5 = vector.load %arg3[%c0_3, %c0_4] : memref<1x128xf32, #tpu.memory_space<vmem>>, vector<1x128xf32>
    %6 = vector.broadcast %5 : vector<1x128xf32> to vector<128x128xf32>
    %7 = arith.addf %4, %6 : vector<128x128xf32>
    %c0_5 = arith.constant 0 : index
    %c0_6 = arith.constant 0 : index
    %8 = vector.load %arg4[%c0_5, %c0_6] : memref<128x128xbf16, #tpu.memory_space<vmem>>, vector<128x128xbf16>
    %9 = arith.extf %8 : vector<128x128xbf16> to vector<128x128xf32>
    %10 = arith.addf %7, %9 : vector<128x128xf32>
    %cst = arith.constant 0.000000e+00 : f32
    %11 = vector.broadcast %cst : f32 to vector<128x128xf32>
    %12 = arith.maximumf %10, %11 : vector<128x128xf32>
    %13 = arith.truncf %12 : vector<128x128xf32> to vector<128x128xbf16>
    %c0_7 = arith.constant 0 : index
    %c0_8 = arith.constant 0 : index
    %14 = vector.load %arg5[%c0_7, %c0_8] : memref<128x128xbf16, #tpu.memory_space<vmem>>, vector<128x128xbf16>
    tpu.vector_store %arg5[%c0_7, %c0_8], %13 {strides = array<i32>} : memref<128x128xbf16, #tpu.memory_space<vmem>>, vector<128x128xbf16>,
    return
  }
  func.func @transform_0(%arg0: i32) -> (i32, i32) {
    %c0_i32 = arith.constant 0 : i32
    %c0_i32_0 = arith.constant 0 : i32
    return %arg0, %c0_i32 : i32, i32
  }
  func.func @transform_1(%arg0: i32) -> (i32, i32) {
    %c0_i32 = arith.constant 0 : i32
    %c0_i32_0 = arith.constant 0 : i32
    %c0_i32_1 = arith.constant 0 : i32
    return %c0_i32, %c0_i32_0 : i32, i32
  }
  func.func @transform_2(%arg0: i32) -> (i32, i32) {
    %c0_i32 = arith.constant 0 : i32
    %c0_i32_0 = arith.constant 0 : i32
    %c0_i32_1 = arith.constant 0 : i32
    return %c0_i32, %c0_i32_0 : i32, i32
  }
  func.func @transform_3(%arg0: i32) -> (i32, i32) {
    %c0_i32 = arith.constant 0 : i32
    %c0_i32_0 = arith.constant 0 : i32
    return %arg0, %c0_i32 : i32, i32
  }
  func.func @transform_4(%arg0: i32) -> (i32, i32) {
    %c0_i32 = arith.constant 0 : i32
    %c0_i32_0 = arith.constant 0 : i32
    return %arg0, %c0_i32 : i32, i32
  }
}

module attributes {stable_mosaic.version = 11 : i64} {
  func.func @affine_relu_kernel(%arg0: i32, %arg1: memref<128x128xbf16, #tpu.memory_space<vmem>>, %arg2: memref<1x128xf32, #tpu.memory_space<vmem>>, %arg3: memref<1x128xf32, #tpu.memory_space<vmem>>, %arg4: memref<128x128xbf16, #tpu.memory_space<vmem>>) attributes {dimension_semantics = [#tpu.dimension_semantics<parallel>], iteration_bounds = array<i64: 1>, scalar_prefetch = 0 : i64, scratch_operands = 0 : i64, tpu.core_type = #tpu.core_type<tc>, window_params = [{transform_indices = @transform_0, window_bounds = array<i64: 128, 128>}, {pipeline_mode = #tpu.pipeline_mode<synchronous>, transform_indices = @transform_1, window_bounds = array<i64: 1, 128>}, {pipeline_mode = #tpu.pipeline_mode<synchronous>, transform_indices = @transform_2, window_bounds = array<i64: 1, 128>}, {transform_indices = @transform_3, window_bounds = array<i64: 128, 128>}]} {
    %c0 = arith.constant 0 : index
    %c0_0 = arith.constant 0 : index
    %0 = vector.load %arg1[%c0, %c0_0] : memref<128x128xbf16, #tpu.memory_space<vmem>>, vector<128x128xbf16>
    %1 = arith.extf %0 : vector<128x128xbf16> to vector<128x128xf32>
    %c0_1 = arith.constant 0 : index
    %c0_2 = arith.constant 0 : index
    %2 = vector.load %arg2[%c0_1, %c0_2] : memref<1x128xf32, #tpu.memory_space<vmem>>, vector<1x128xf32>
    %3 = vector.broadcast %2 : vector<1x128xf32> to vector<128x128xf32>
    %4 = arith.mulf %1, %3 : vector<128x128xf32>
    %c0_3 = arith.constant 0 : index
    %c0_4 = arith.constant 0 : index
    %5 = vector.load %arg3[%c0_3, %c0_4] : memref<1x128xf32, #tpu.memory_space<vmem>>, vector<1x128xf32>
    %6 = vector.broadcast %5 : vector<1x128xf32> to vector<128x128xf32>
    %7 = arith.addf %4, %6 : vector<128x128xf32>
    %cst = arith.constant 0.000000e+00 : f32
    %8 = vector.broadcast %cst : f32 to vector<128x128xf32>
    %9 = arith.maximumf %7, %8 : vector<128x128xf32>
    %10 = arith.truncf %9 : vector<128x128xf32> to vector<128x128xbf16>
    %c0_5 = arith.constant 0 : index
    %c0_6 = arith.constant 0 : index
    %11 = vector.load %arg4[%c0_5, %c0_6] : memref<128x128xbf16, #tpu.memory_space<vmem>>, vector<128x128xbf16>
    tpu.vector_store %arg4[%c0_5, %c0_6], %10 {strides = array<i32>} : memref<128x128xbf16, #tpu.memory_space<vmem>>, vector<128x128xbf16>,
    return
  }
  func.func @transform_0(%arg0: i32) -> (i32, i32) {
    %c0_i32 = arith.constant 0 : i32
    %c0_i32_0 = arith.constant 0 : i32
    return %arg0, %c0_i32 : i32, i32
  }
  func.func @transform_1(%arg0: i32) -> (i32, i32) {
    %c0_i32 = arith.constant 0 : i32
    %c0_i32_0 = arith.constant 0 : i32
    %c0_i32_1 = arith.constant 0 : i32
    return %c0_i32, %c0_i32_0 : i32, i32
  }
  func.func @transform_2(%arg0: i32) -> (i32, i32) {
    %c0_i32 = arith.constant 0 : i32
    %c0_i32_0 = arith.constant 0 : i32
    %c0_i32_1 = arith.constant 0 : i32
    return %c0_i32, %c0_i32_0 : i32, i32
  }
  func.func @transform_3(%arg0: i32) -> (i32, i32) {
    %c0_i32 = arith.constant 0 : i32
    %c0_i32_0 = arith.constant 0 : i32
    return %arg0, %c0_i32 : i32, i32
  }
}

module attributes {stable_mosaic.version = 11 : i64} {
  func.func @affine2_add_relu_kernel(%arg0: i32, %arg1: memref<128x128xbf16, #tpu.memory_space<vmem>>, %arg2: memref<1x128xf32, #tpu.memory_space<vmem>>, %arg3: memref<1x128xf32, #tpu.memory_space<vmem>>, %arg4: memref<128x128xbf16, #tpu.memory_space<vmem>>, %arg5: memref<1x128xf32, #tpu.memory_space<vmem>>, %arg6: memref<1x128xf32, #tpu.memory_space<vmem>>, %arg7: memref<128x128xbf16, #tpu.memory_space<vmem>>) attributes {dimension_semantics = [#tpu.dimension_semantics<parallel>], iteration_bounds = array<i64: 1>, scalar_prefetch = 0 : i64, scratch_operands = 0 : i64, tpu.core_type = #tpu.core_type<tc>, window_params = [{transform_indices = @transform_0, window_bounds = array<i64: 128, 128>}, {pipeline_mode = #tpu.pipeline_mode<synchronous>, transform_indices = @transform_1, window_bounds = array<i64: 1, 128>}, {pipeline_mode = #tpu.pipeline_mode<synchronous>, transform_indices = @transform_2, window_bounds = array<i64: 1, 128>}, {transform_indices = @transform_3, window_bounds = array<i64: 128, 128>}, {pipeline_mode = #tpu.pipeline_mode<synchronous>, transform_indices = @transform_4, window_bounds = array<i64: 1, 128>}, {pipeline_mode = #tpu.pipeline_mode<synchronous>, transform_indices = @transform_5, window_bounds = array<i64: 1, 128>}, {transform_indices = @transform_6, window_bounds = array<i64: 128, 128>}]} {
    %c0 = arith.constant 0 : index
    %c0_0 = arith.constant 0 : index
    %0 = vector.load %arg1[%c0, %c0_0] : memref<128x128xbf16, #tpu.memory_space<vmem>>, vector<128x128xbf16>
    %1 = arith.extf %0 : vector<128x128xbf16> to vector<128x128xf32>
    %c0_1 = arith.constant 0 : index
    %c0_2 = arith.constant 0 : index
    %2 = vector.load %arg2[%c0_1, %c0_2] : memref<1x128xf32, #tpu.memory_space<vmem>>, vector<1x128xf32>
    %3 = vector.broadcast %2 : vector<1x128xf32> to vector<128x128xf32>
    %4 = arith.mulf %1, %3 : vector<128x128xf32>
    %c0_3 = arith.constant 0 : index
    %c0_4 = arith.constant 0 : index
    %5 = vector.load %arg3[%c0_3, %c0_4] : memref<1x128xf32, #tpu.memory_space<vmem>>, vector<1x128xf32>
    %6 = vector.broadcast %5 : vector<1x128xf32> to vector<128x128xf32>
    %7 = arith.addf %4, %6 : vector<128x128xf32>
    %c0_5 = arith.constant 0 : index
    %c0_6 = arith.constant 0 : index
    %8 = vector.load %arg4[%c0_5, %c0_6] : memref<128x128xbf16, #tpu.memory_space<vmem>>, vector<128x128xbf16>
    %9 = arith.extf %8 : vector<128x128xbf16> to vector<128x128xf32>
    %c0_7 = arith.constant 0 : index
    %c0_8 = arith.constant 0 : index
    %10 = vector.load %arg5[%c0_7, %c0_8] : memref<1x128xf32, #tpu.memory_space<vmem>>, vector<1x128xf32>
    %11 = vector.broadcast %10 : vector<1x128xf32> to vector<128x128xf32>
    %12 = arith.mulf %9, %11 : vector<128x128xf32>
    %c0_9 = arith.constant 0 : index
    %c0_10 = arith.constant 0 : index
    %13 = vector.load %arg6[%c0_9, %c0_10] : memref<1x128xf32, #tpu.memory_space<vmem>>, vector<1x128xf32>
    %14 = vector.broadcast %13 : vector<1x128xf32> to vector<128x128xf32>
    %15 = arith.addf %12, %14 : vector<128x128xf32>
    %16 = arith.addf %7, %15 : vector<128x128xf32>
    %cst = arith.constant 0.000000e+00 : f32
    %17 = vector.broadcast %cst : f32 to vector<128x128xf32>
    %18 = arith.maximumf %16, %17 : vector<128x128xf32>
    %19 = arith.truncf %18 : vector<128x128xf32> to vector<128x128xbf16>
    %c0_11 = arith.constant 0 : index
    %c0_12 = arith.constant 0 : index
    %20 = vector.load %arg7[%c0_11, %c0_12] : memref<128x128xbf16, #tpu.memory_space<vmem>>, vector<128x128xbf16>
    tpu.vector_store %arg7[%c0_11, %c0_12], %19 {strides = array<i32>} : memref<128x128xbf16, #tpu.memory_space<vmem>>, vector<128x128xbf16>,
    return
  }
  func.func @transform_0(%arg0: i32) -> (i32, i32) {
    %c0_i32 = arith.constant 0 : i32
    %c0_i32_0 = arith.constant 0 : i32
    return %arg0, %c0_i32 : i32, i32
  }
  func.func @transform_1(%arg0: i32) -> (i32, i32) {
    %c0_i32 = arith.constant 0 : i32
    %c0_i32_0 = arith.constant 0 : i32
    %c0_i32_1 = arith.constant 0 : i32
    return %c0_i32, %c0_i32_0 : i32, i32
  }
  func.func @transform_2(%arg0: i32) -> (i32, i32) {
    %c0_i32 = arith.constant 0 : i32
    %c0_i32_0 = arith.constant 0 : i32
    %c0_i32_1 = arith.constant 0 : i32
    return %c0_i32, %c0_i32_0 : i32, i32
  }
  func.func @transform_3(%arg0: i32) -> (i32, i32) {
    %c0_i32 = arith.constant 0 : i32
    %c0_i32_0 = arith.constant 0 : i32
    return %arg0, %c0_i32 : i32, i32
  }
  func.func @transform_4(%arg0: i32) -> (i32, i32) {
    %c0_i32 = arith.constant 0 : i32
    %c0_i32_0 = arith.constant 0 : i32
    %c0_i32_1 = arith.constant 0 : i32
    return %c0_i32, %c0_i32_0 : i32, i32
  }
  func.func @transform_5(%arg0: i32) -> (i32, i32) {
    %c0_i32 = arith.constant 0 : i32
    %c0_i32_0 = arith.constant 0 : i32
    %c0_i32_1 = arith.constant 0 : i32
    return %c0_i32, %c0_i32_0 : i32, i32
  }
  func.func @transform_6(%arg0: i32) -> (i32, i32) {
    %c0_i32 = arith.constant 0 : i32
    %c0_i32_0 = arith.constant 0 : i32
    return %arg0, %c0_i32 : i32, i32
  }
}

module attributes {stable_mosaic.version = 11 : i64} {
  func.func @conv_mm_stats_kernel(%arg0: i32, %arg1: i32, %arg2: memref<128x128xbf16, #tpu.memory_space<vmem>>, %arg3: memref<128x128xbf16, #tpu.memory_space<vmem>>, %arg4: memref<128x128xbf16, #tpu.memory_space<vmem>>, %arg5: memref<1x128xf32, #tpu.memory_space<vmem>>, %arg6: memref<1x128xf32, #tpu.memory_space<vmem>>, %arg7: memref<128x128xf32, #tpu.memory_space<vmem>>) attributes {dimension_semantics = [#tpu.dimension_semantics<arbitrary>, #tpu.dimension_semantics<arbitrary>], iteration_bounds = array<i64: 1, 1>, scalar_prefetch = 0 : i64, scratch_operands = 1 : i64, tpu.core_type = #tpu.core_type<tc>, window_params = [{transform_indices = @transform_0, window_bounds = array<i64: 128, 128>}, {transform_indices = @transform_1, window_bounds = array<i64: 128, 128>}, {transform_indices = @transform_2, window_bounds = array<i64: 128, 128>}, {pipeline_mode = #tpu.pipeline_mode<synchronous>, transform_indices = @transform_3, window_bounds = array<i64: 1, 128>}, {pipeline_mode = #tpu.pipeline_mode<synchronous>, transform_indices = @transform_4, window_bounds = array<i64: 1, 128>}]} {
    %c0_i32 = arith.constant 0 : i32
    %0 = arith.cmpi eq, %arg1, %c0_i32 : i32
    %1 = arith.extui %0 : i1 to i32
    %c0_i32_0 = arith.constant 0 : i32
    %2 = arith.cmpi ne, %1, %c0_i32_0 : i32
    scf.if %2 {
      %cst_13 = arith.constant 0.000000e+00 : f32
      %17 = vector.broadcast %cst_13 : f32 to vector<128x128xf32>
      %c0_14 = arith.constant 0 : index
      %c0_15 = arith.constant 0 : index
      %18 = vector.load %arg7[%c0_14, %c0_15] : memref<128x128xf32, #tpu.memory_space<vmem>>, vector<128x128xf32>
      tpu.vector_store %arg7[%c0_14, %c0_15], %17 {strides = array<i32>} : memref<128x128xf32, #tpu.memory_space<vmem>>, vector<128x128xf32>,
    } else {
    }
    %c0 = arith.constant 0 : index
    %c0_1 = arith.constant 0 : index
    %3 = vector.load %arg7[%c0, %c0_1] : memref<128x128xf32, #tpu.memory_space<vmem>>, vector<128x128xf32>
    %c0_2 = arith.constant 0 : index
    %c0_3 = arith.constant 0 : index
    %4 = vector.load %arg2[%c0_2, %c0_3] : memref<128x128xbf16, #tpu.memory_space<vmem>>, vector<128x128xbf16>
    %c0_4 = arith.constant 0 : index
    %c0_5 = arith.constant 0 : index
    %5 = vector.load %arg3[%c0_4, %c0_5] : memref<128x128xbf16, #tpu.memory_space<vmem>>, vector<128x128xbf16>
    %cst = arith.constant dense<0.000000e+00> : vector<128x128xf32>
    %6 = tpu.matmul %4, %5, %cst {dimension_numbers = #tpu.dot_dimension_numbers<[1], [0], [0], [1], [0, 0, 1, 1], [], []>} : vector<128x128xbf16>, vector<128x128xbf16>, vector<128x128xf32> -> vector<128x128xf32>
    %7 = arith.addf %3, %6 : vector<128x128xf32>
    %c0_6 = arith.constant 0 : index
    %c0_7 = arith.constant 0 : index
    %8 = vector.load %arg7[%c0_6, %c0_7] : memref<128x128xf32, #tpu.memory_space<vmem>>, vector<128x128xf32>
    tpu.vector_store %arg7[%c0_6, %c0_7], %7 {strides = array<i32>} : memref<128x128xf32, #tpu.memory_space<vmem>>, vector<128x128xf32>,
    %c0_i32_8 = arith.constant 0 : i32
    %9 = arith.cmpi eq, %arg1, %c0_i32_8 : i32
    %c0_i32_9 = arith.constant 0 : i32
    %10 = arith.cmpi eq, %arg0, %c0_i32_9 : i32
    %11 = arith.andi %9, %10 : i1
    %12 = arith.extui %11 : i1 to i32
    %c0_i32_10 = arith.constant 0 : i32
    %13 = arith.cmpi ne, %12, %c0_i32_10 : i32
    scf.if %13 {
      %cst_13 = arith.constant 0.000000e+00 : f32
      %17 = vector.broadcast %cst_13 : f32 to vector<1x128xf32>
      %c0_14 = arith.constant 0 : index
      %c0_15 = arith.constant 0 : index
      %18 = vector.load %arg5[%c0_14, %c0_15] : memref<1x128xf32, #tpu.memory_space<vmem>>, vector<1x128xf32>
      tpu.vector_store %arg5[%c0_14, %c0_15], %17 {strides = array<i32>} : memref<1x128xf32, #tpu.memory_space<vmem>>, vector<1x128xf32>,
      %cst_16 = arith.constant 0.000000e+00 : f32
      %19 = vector.broadcast %cst_16 : f32 to vector<1x128xf32>
      %c0_17 = arith.constant 0 : index
      %c0_18 = arith.constant 0 : index
      %20 = vector.load %arg6[%c0_17, %c0_18] : memref<1x128xf32, #tpu.memory_space<vmem>>, vector<1x128xf32>
      tpu.vector_store %arg6[%c0_17, %c0_18], %19 {strides = array<i32>} : memref<1x128xf32, #tpu.memory_space<vmem>>, vector<1x128xf32>,
    } else {
    }
    %c0_i32_11 = arith.constant 0 : i32
    %14 = arith.cmpi eq, %arg1, %c0_i32_11 : i32
    %15 = arith.extui %14 : i1 to i32
    %c0_i32_12 = arith.constant 0 : i32
    %16 = arith.cmpi ne, %15, %c0_i32_12 : i32
    scf.if %16 {
      %c0_13 = arith.constant 0 : index
      %c0_14 = arith.constant 0 : index
      %17 = vector.load %arg7[%c0_13, %c0_14] : memref<128x128xf32, #tpu.memory_space<vmem>>, vector<128x128xf32>
      %18 = arith.truncf %17 : vector<128x128xf32> to vector<128x128xbf16>
      %c0_15 = arith.constant 0 : index
      %c0_16 = arith.constant 0 : index
      %19 = vector.load %arg4[%c0_15, %c0_16] : memref<128x128xbf16, #tpu.memory_space<vmem>>, vector<128x128xbf16>
      tpu.vector_store %arg4[%c0_15, %c0_16], %18 {strides = array<i32>} : memref<128x128xbf16, #tpu.memory_space<vmem>>, vector<128x128xbf16>,
      %c0_17 = arith.constant 0 : index
      %c0_18 = arith.constant 0 : index
      %20 = vector.load %arg5[%c0_17, %c0_18] : memref<1x128xf32, #tpu.memory_space<vmem>>, vector<1x128xf32>
      %cst_19 = arith.constant dense<0.000000e+00> : vector<128xf32>
      %21 = vector.multi_reduction <add>, %17, %cst_19 [0] : vector<128x128xf32> to vector<128xf32>
      %22 = vector.shape_cast %21 : vector<128xf32> to vector<1x128xf32>
      %23 = arith.addf %20, %22 : vector<1x128xf32>
      %c0_20 = arith.constant 0 : index
      %c0_21 = arith.constant 0 : index
      %24 = vector.load %arg5[%c0_20, %c0_21] : memref<1x128xf32, #tpu.memory_space<vmem>>, vector<1x128xf32>
      tpu.vector_store %arg5[%c0_20, %c0_21], %23 {strides = array<i32>} : memref<1x128xf32, #tpu.memory_space<vmem>>, vector<1x128xf32>,
      %c0_22 = arith.constant 0 : index
      %c0_23 = arith.constant 0 : index
      %25 = vector.load %arg6[%c0_22, %c0_23] : memref<1x128xf32, #tpu.memory_space<vmem>>, vector<1x128xf32>
      %26 = arith.mulf %17, %17 : vector<128x128xf32>
      %cst_24 = arith.constant dense<0.000000e+00> : vector<128xf32>
      %27 = vector.multi_reduction <add>, %26, %cst_24 [0] : vector<128x128xf32> to vector<128xf32>
      %28 = vector.shape_cast %27 : vector<128xf32> to vector<1x128xf32>
      %29 = arith.addf %25, %28 : vector<1x128xf32>
      %c0_25 = arith.constant 0 : index
      %c0_26 = arith.constant 0 : index
      %30 = vector.load %arg6[%c0_25, %c0_26] : memref<1x128xf32, #tpu.memory_space<vmem>>, vector<1x128xf32>
      tpu.vector_store %arg6[%c0_25, %c0_26], %29 {strides = array<i32>} : memref<1x128xf32, #tpu.memory_space<vmem>>, vector<1x128xf32>,
    } else {
    }
    return
  }
  func.func @transform_0(%arg0: i32, %arg1: i32) -> (i32, i32) {
    %c0_i32 = arith.constant 0 : i32
    return %arg0, %arg1 : i32, i32
  }
  func.func @transform_1(%arg0: i32, %arg1: i32) -> (i32, i32) {
    %c0_i32 = arith.constant 0 : i32
    %c0_i32_0 = arith.constant 0 : i32
    return %arg1, %c0_i32 : i32, i32
  }
  func.func @transform_2(%arg0: i32, %arg1: i32) -> (i32, i32) {
    %c0_i32 = arith.constant 0 : i32
    %c0_i32_0 = arith.constant 0 : i32
    return %arg0, %c0_i32 : i32, i32
  }
  func.func @transform_3(%arg0: i32, %arg1: i32) -> (i32, i32) {
    %c0_i32 = arith.constant 0 : i32
    %c0_i32_0 = arith.constant 0 : i32
    %c0_i32_1 = arith.constant 0 : i32
    return %c0_i32, %c0_i32_0 : i32, i32
  }
  func.func @transform_4(%arg0: i32, %arg1: i32) -> (i32, i32) {
    %c0_i32 = arith.constant 0 : i32
    %c0_i32_0 = arith.constant 0 : i32
    %c0_i32_1 = arith.constant 0 : i32
    return %c0_i32, %c0_i32_0 : i32, i32
  }
}

module attributes {stable_mosaic.version = 11 : i64} {
  func.func @fc_kernel(%arg0: memref<8x128xbf16, #tpu.memory_space<vmem>>, %arg1: memref<128x128xbf16, #tpu.memory_space<vmem>>, %arg2: memref<1x128xf32, #tpu.memory_space<vmem>>, %arg3: memref<8x128xf32, #tpu.memory_space<vmem>>) attributes {dimension_semantics = [], scalar_prefetch = 0 : i64, scratch_operands = 0 : i64, tpu.core_type = #tpu.core_type<tc>} {
    %c0 = arith.constant 0 : index
    %c0_0 = arith.constant 0 : index
    %0 = vector.load %arg0[%c0, %c0_0] : memref<8x128xbf16, #tpu.memory_space<vmem>>, vector<8x128xbf16>
    %c0_1 = arith.constant 0 : index
    %c0_2 = arith.constant 0 : index
    %1 = vector.load %arg1[%c0_1, %c0_2] : memref<128x128xbf16, #tpu.memory_space<vmem>>, vector<128x128xbf16>
    %cst = arith.constant dense<0.000000e+00> : vector<8x128xf32>
    %2 = tpu.matmul %0, %1, %cst {dimension_numbers = #tpu.dot_dimension_numbers<[1], [0], [0], [1], [0, 0, 1, 1], [], []>} : vector<8x128xbf16>, vector<128x128xbf16>, vector<8x128xf32> -> vector<8x128xf32>
    %c0_3 = arith.constant 0 : index
    %c0_4 = arith.constant 0 : index
    %3 = vector.load %arg2[%c0_3, %c0_4] : memref<1x128xf32, #tpu.memory_space<vmem>>, vector<1x128xf32>
    %4 = vector.broadcast %3 : vector<1x128xf32> to vector<8x128xf32>
    %5 = arith.addf %2, %4 : vector<8x128xf32>
    %c0_5 = arith.constant 0 : index
    %c0_6 = arith.constant 0 : index
    %6 = vector.load %arg3[%c0_5, %c0_6] : memref<8x128xf32, #tpu.memory_space<vmem>>, vector<8x128xf32>
    tpu.vector_store %arg3[%c0_5, %c0_6], %5 {strides = array<i32>} : memref<8x128xf32, #tpu.memory_space<vmem>>, vector<8x128xf32>,
    return
  }
}

</mosaic_0001>

<bundles_post_ra>
// kernel: forward.40
= control target key start
LH: loop header
LB: loop body
LE: loop exit
PB: predicated region body
PF: predicated region fallthrough
CT: control target
= control target key end

     0   :  { %s1502_s0 = inlined_call_operand.vmem [shape: bf16[512,128], index: 0, kind: input, shape index: {}]   ;;  %s1503_s1 = inlined_call_operand.vmem [shape: f32[1,128], index: 1, kind: input, shape index: {}]   ;;  %s1504_s2 = inlined_call_operand.vmem [shape: f32[1,128], index: 2, kind: input, shape index: {}]   ;;  %s1505_s3 = inlined_call_operand.vmem [shape: bf16[512,128], index: 3, kind: output, shape index: {}]  }
   0x1   :  { %v803_v0 = vld [vmem:[%s1502_s0] sm:$0xff]   ;;  %v1090_v4 = vld [vmem:[%s1502_s0 + $0x8] sm:$0xff]   ;;  %v1091_v5 = vld [vmem:[%s1502_s0 + $0x10] sm:$0xff]  }
   0x2   :  { %v1178_v1 = vld [vmem:[%s1503_s1] ss:$0 sm:$0xff]  ;;  %v804_v2 = vunpack.c.l.bf16 %v803_v0  ;;  %v805_v3 = vunpack.c.h.bf16 %v803_v0  ;;  %v1092_v6 = vld [vmem:[%s1502_s0 + $0x18] sm:$0xff]   ;;  %v808_v8 = vunpack.c.l.bf16 %v1090_v4  ;;  %v809_v9 = vunpack.c.h.bf16 %v1090_v4  ;;  %v1094_v33 = vld [vmem:[%s1502_s0 + $0x28] sm:$0xff]  }
   0x3   :  { %v1192_v7 = vld [vmem:[%s1504_s2] ss:$0 sm:$0xff]  ;;  %v812_v10 = vunpack.c.l.bf16 %v1091_v5  ;;  %v813_v11 = vunpack.c.h.bf16 %v1091_v5  ;;  %v816_v14 = vunpack.c.l.bf16 %v1092_v6  ;;  %v817_v15 = vunpack.c.h.bf16 %v1092_v6  ;;  %v1095_v38 = vld [vmem:[%s1502_s0 + $0x30] sm:$0xff]   ;;  %v1096_v43 = vld [vmem:[%s1502_s0 + $0x38] sm:$0xff]  }
   0x4   :  { %v149_v12 = vmul.f32 %v804_v2, %v1178_v1  ;;  %v150_v13 = vmul.f32 %v805_v3, %v1178_v1  ;;  %v151_v16 = vmul.f32 %v808_v8, %v1178_v1  ;;  %v152_v17 = vmul.f32 %v809_v9, %v1178_v1  ;;  %v1093_v28 = vld [vmem:[%s1502_s0 + $0x20] sm:$0xff]  }
   0x5   :  { %v153_v18 = vmul.f32 %v812_v10, %v1178_v1  ;;  %v154_v19 = vmul.f32 %v813_v11, %v1178_v1  ;;  %v155_v22 = vmul.f32 %v816_v14, %v1178_v1  ;;  %v156_v23 = vmul.f32 %v817_v15, %v1178_v1  ;;  %v1097_v0 = vld [vmem:[%s1502_s0 + $0x40] sm:$0xff]   ;;  %v1098_v11 = vld [vmem:[%s1502_s0 + $0x48] sm:$0xff]  }
   0x6   :  { %v220_v20 = vadd.f32 %v1192_v7, %v149_v12  ;;  %v221_v21 = vadd.f32 %v1192_v7, %v150_v13  ;;  %v222_v24 = vadd.f32 %v1192_v7, %v151_v16  ;;  %v223_v25 = vadd.f32 %v1192_v7, %v152_v17  ;;  %v1099_v16 = vld [vmem:[%s1502_s0 + $0x50] sm:$0xff]  }
   0x7   :  { %v224_v26 = vadd.f32 %v1192_v7, %v153_v18  ;;  %v225_v27 = vadd.f32 %v1192_v7, %v154_v19  ;;  %v226_v31 = vadd.f32 %v1192_v7, %v155_v22  ;;  %v227_v32 = vadd.f32 %v1192_v7, %v156_v23 }
   0x8   :  { %v284_v29 = vmax.f32 %v220_v20, 0.0  ;;  %v285_v30 = vmax.f32 %v221_v21, 0.0  ;;  %v286_v34 = vmax.f32 %v222_v24, 0.0  ;;  %v287_v35 = vmax.f32 %v223_v25, 0.0  ;;  %v1100_v25 = vld [vmem:[%s1502_s0 + $0x58] sm:$0xff]  }
   0x9   :  { %v288_v36 = vmax.f32 %v224_v26, 0.0  ;;  %v289_v37 = vmax.f32 %v225_v27, 0.0  ;;  %v290_v40 = vmax.f32 %v226_v31, 0.0  ;;  %v291_v41 = vmax.f32 %v227_v32, 0.0 }
   0xa   :  { %v933_v39 = vpack.c.bf16 %v285_v30, %v284_v29  ;;  %v820_v42 = vunpack.c.l.bf16 %v1093_v28  ;;  %v938_v44 = vpack.c.bf16 %v287_v35, %v286_v34  ;;  %v821_v46 = vunpack.c.h.bf16 %v1093_v28 }
   0xb   :  { %v943_v45 = vpack.c.bf16 %v289_v37, %v288_v36  ;;  %v824_v47 = vunpack.c.l.bf16 %v1094_v33  ;;  %v948_v48 = vpack.c.bf16 %v291_v41, %v290_v40  ;;  %v825_v50 = vunpack.c.h.bf16 %v1094_v33 }
   0xc   :  { %934 = vst [vmem:[%s1505_s3] sm:$0xff] %v933_v39   ;;  %v157_v49 = vmul.f32 %v820_v42, %v1178_v1  ;;  %v828_v51 = vunpack.c.l.bf16 %v1095_v38  ;;  %1121 = vst [vmem:[%s1505_s3 + $0x8] sm:$0xff] %v938_v44   ;;  %v158_v52 = vmul.f32 %v821_v46, %v1178_v1  ;;  %v829_v54 = vunpack.c.h.bf16 %v1095_v38  ;;  %v1101_v38 = vld [vmem:[%s1502_s0 + $0x60] sm:$0xff]  }
   0xd   :  { %1122 = vst [vmem:[%s1505_s3 + $0x10] sm:$0xff] %v943_v45   ;;  %v159_v53 = vmul.f32 %v824_v47, %v1178_v1  ;;  %v832_v55 = vunpack.c.l.bf16 %v1096_v43  ;;  %1123 = vst [vmem:[%s1505_s3 + $0x18] sm:$0xff] %v948_v48   ;;  %v160_v57 = vmul.f32 %v825_v50, %v1178_v1  ;;  %v833_v59 = vunpack.c.h.bf16 %v1096_v43 }
   0xe   :  { %v228_v56 = vadd.f32 %v1192_v7, %v157_v49  ;;  %v161_v58 = vmul.f32 %v828_v51, %v1178_v1  ;;  %v229_v60 = vadd.f32 %v1192_v7, %v158_v52  ;;  %v162_v62 = vmul.f32 %v829_v54, %v1178_v1  ;;  %v1102_v51 = vld [vmem:[%s1502_s0 + $0x68] sm:$0xff]  }
   0xf   :  { %v230_v61 = vadd.f32 %v1192_v7, %v159_v53  ;;  %v163_v63 = vmul.f32 %v832_v55, %v1178_v1  ;;  %v231_v3 = vadd.f32 %v1192_v7, %v160_v57  ;;  %v164_v5 = vmul.f32 %v833_v59, %v1178_v1 }
  0x10   :  { %v292_v2 = vmax.f32 %v228_v56, 0.0  ;;  %v232_v4 = vadd.f32 %v1192_v7, %v161_v58  ;;  %v293_v6 = vmax.f32 %v229_v60, 0.0  ;;  %v233_v9 = vadd.f32 %v1192_v7, %v162_v62  ;;  %v1103_v60 = vld [vmem:[%s1502_s0 + $0x70] sm:$0xff]  }
  0x11   :  { %v294_v8 = vmax.f32 %v230_v61, 0.0  ;;  %v234_v10 = vadd.f32 %v1192_v7, %v163_v63  ;;  %v295_v12 = vmax.f32 %v231_v3, 0.0  ;;  %v235_v14 = vadd.f32 %v1192_v7, %v164_v5 }
  0x12   :  { %v296_v13 = vmax.f32 %v232_v4, 0.0  ;;  %v836_v15 = vunpack.c.l.bf16 %v1097_v0  ;;  %v953_v17 = vpack.c.bf16 %v293_v6, %v292_v2  ;;  %v297_v18 = vmax.f32 %v233_v9, 0.0  ;;  %v1104_v2 = vld [vmem:[%s1502_s0 + $0x78] sm:$0xff]  }
  0x13   :  { %v298_v19 = vmax.f32 %v234_v10, 0.0  ;;  %v837_v20 = vunpack.c.h.bf16 %v1097_v0  ;;  %v958_v21 = vpack.c.bf16 %v295_v12, %v294_v8  ;;  %v299_v22 = vmax.f32 %v235_v14, 0.0  ;;  %v1105_v12 = vld [vmem:[%s1502_s0 + $0x80] sm:$0xff]  }
  0x14   :  { %v165_v23 = vmul.f32 %v836_v15, %v1178_v1  ;;  %v840_v24 = vunpack.c.l.bf16 %v1098_v11  ;;  %1124 = vst [vmem:[%s1505_s3 + $0x20] sm:$0xff] %v953_v17   ;;  %v963_v26 = vpack.c.bf16 %v297_v18, %v296_v13  ;;  %v841_v28 = vunpack.c.h.bf16 %v1098_v11 }
  0x15   :  { %v166_v27 = vmul.f32 %v837_v20, %v1178_v1  ;;  %v844_v29 = vunpack.c.l.bf16 %v1099_v16  ;;  %1125 = vst [vmem:[%s1505_s3 + $0x28] sm:$0xff] %v958_v21   ;;  %v968_v30 = vpack.c.bf16 %v299_v22, %v298_v19  ;;  %v845_v33 = vunpack.c.h.bf16 %v1099_v16 }
  0x16   :  { %v236_v31 = vadd.f32 %v1192_v7, %v165_v23  ;;  %v167_v32 = vmul.f32 %v840_v24, %v1178_v1  ;;  %1126 = vst [vmem:[%s1505_s3 + $0x30] sm:$0xff] %v963_v26   ;;  %v168_v35 = vmul.f32 %v841_v28, %v1178_v1  ;;  %v848_v37 = vunpack.c.l.bf16 %v1100_v25 }
  0x17   :  { %v237_v34 = vadd.f32 %v1192_v7, %v166_v27  ;;  %v169_v36 = vmul.f32 %v844_v29, %v1178_v1  ;;  %1127 = vst [vmem:[%s1505_s3 + $0x38] sm:$0xff] %v968_v30   ;;  %v170_v41 = vmul.f32 %v845_v33, %v1178_v1  ;;  %v849_v42 = vunpack.c.h.bf16 %v1100_v25  ;;  %v1106_v29 = vld [vmem:[%s1502_s0 + $0x88] sm:$0xff]  }
  0x18   :  { %v300_v39 = vmax.f32 %v236_v31, 0.0  ;;  %v238_v40 = vadd.f32 %v1192_v7, %v167_v32  ;;  %v239_v44 = vadd.f32 %v1192_v7, %v168_v35  ;;  %v171_v46 = vmul.f32 %v848_v37, %v1178_v1 }
  0x19   :  { %v301_v43 = vmax.f32 %v237_v34, 0.0  ;;  %v240_v45 = vadd.f32 %v1192_v7, %v169_v36  ;;  %v241_v48 = vadd.f32 %v1192_v7, %v170_v41  ;;  %v172_v49 = vmul.f32 %v849_v42, %v1178_v1  ;;  %v1107_v34 = vld [vmem:[%s1502_s0 + $0x90] sm:$0xff]  }
  0x1a   :  { %v302_v47 = vmax.f32 %v238_v40, 0.0  ;;  %v852_v50 = vunpack.c.l.bf16 %v1101_v38  ;;  %v303_v53 = vmax.f32 %v239_v44, 0.0  ;;  %v242_v55 = vadd.f32 %v1192_v7, %v171_v46 }
  0x1b   :  { %v973_v52 = vpack.c.bf16 %v301_v43, %v300_v39  ;;  %v304_v54 = vmax.f32 %v240_v45, 0.0  ;;  %v305_v56 = vmax.f32 %v241_v48, 0.0  ;;  %v243_v57 = vadd.f32 %v1192_v7, %v172_v49  ;;  %v1108_v43 = vld [vmem:[%s1502_s0 + $0x98] sm:$0xff]  }
  0x1c   :  { %v853_v58 = vunpack.c.h.bf16 %v1101_v38  ;;  %v173_v59 = vmul.f32 %v852_v50, %v1178_v1  ;;  %v978_v61 = vpack.c.bf16 %v303_v53, %v302_v47  ;;  %v306_v62 = vmax.f32 %v242_v55, 0.0 }
  0x1d   :  { %1128 = vst [vmem:[%s1505_s3 + $0x40] sm:$0xff] %v973_v52   ;;  %v856_v63 = vunpack.c.l.bf16 %v1102_v51  ;;  %v857_v0 = vunpack.c.h.bf16 %v1102_v51  ;;  %v983_v3 = vpack.c.bf16 %v305_v56, %v304_v54  ;;  %v307_v4 = vmax.f32 %v243_v57, 0.0  ;;  %v1109_v56 = vld [vmem:[%s1502_s0 + $0xa0] sm:$0xff]  }
  0x1e   :  { %v174_v5 = vmul.f32 %v853_v58, %v1178_v1  ;;  %v244_v6 = vadd.f32 %v1192_v7, %v173_v59  ;;  %1129 = vst [vmem:[%s1505_s3 + $0x48] sm:$0xff] %v978_v61   ;;  %v860_v10 = vunpack.c.l.bf16 %v1103_v60  ;;  %v861_v11 = vunpack.c.h.bf16 %v1103_v60 }
  0x1f   :  { %v175_v8 = vmul.f32 %v856_v63, %v1178_v1  ;;  %v176_v9 = vmul.f32 %v857_v0, %v1178_v1  ;;  %1130 = vst [vmem:[%s1505_s3 + $0x50] sm:$0xff] %v983_v3   ;;  %v988_v13 = vpack.c.bf16 %v307_v4, %v306_v62  ;;  %v864_v16 = vunpack.c.l.bf16 %v1104_v2 }
  0x20   :  { %v245_v14 = vadd.f32 %v1192_v7, %v174_v5  ;;  %v308_v15 = vmax.f32 %v244_v6, 0.0  ;;  %v177_v19 = vmul.f32 %v860_v10, %v1178_v1  ;;  %v178_v20 = vmul.f32 %v861_v11, %v1178_v1 }
  0x21   :  { %v246_v17 = vadd.f32 %v1192_v7, %v175_v8  ;;  %v247_v18 = vadd.f32 %v1192_v7, %v176_v9  ;;  %1131 = vst [vmem:[%s1505_s3 + $0x58] sm:$0xff] %v988_v13   ;;  %v865_v22 = vunpack.c.h.bf16 %v1104_v2  ;;  %v179_v23 = vmul.f32 %v864_v16, %v1178_v1  ;;  %v1110_v2 = vld [vmem:[%s1502_s0 + $0xa8] sm:$0xff]   ;;  %v1111_v16 = vld [vmem:[%s1502_s0 + $0xb0] sm:$0xff]  }
  0x22   :  { %v309_v21 = vmax.f32 %v245_v14, 0.0  ;;  %v868_v24 = vunpack.c.l.bf16 %v1105_v12  ;;  %v248_v27 = vadd.f32 %v1192_v7, %v177_v19  ;;  %v249_v28 = vadd.f32 %v1192_v7, %v178_v20 }
  0x23   :  { %v310_v25 = vmax.f32 %v246_v17, 0.0  ;;  %v311_v26 = vmax.f32 %v247_v18, 0.0  ;;  %v180_v31 = vmul.f32 %v865_v22, %v1178_v1  ;;  %v250_v32 = vadd.f32 %v1192_v7, %v179_v23 }
  0x24   :  { %v993_v30 = vpack.c.bf16 %v309_v21, %v308_v15  ;;  %v869_v33 = vunpack.c.h.bf16 %v1105_v12  ;;  %v312_v36 = vmax.f32 %v248_v27, 0.0  ;;  %v313_v37 = vmax.f32 %v249_v28, 0.0  ;;  %v1112_v21 = vld [vmem:[%s1502_s0 + $0xb8] sm:$0xff]  }
  0x25   :  { %v998_v35 = vpack.c.bf16 %v311_v26, %v310_v25  ;;  %v181_v38 = vmul.f32 %v868_v24, %v1178_v1  ;;  %v251_v39 = vadd.f32 %v1192_v7, %v180_v31  ;;  %v314_v40 = vmax.f32 %v250_v32, 0.0 }
  0x26   :  { %1132 = vst [vmem:[%s1505_s3 + $0x60] sm:$0xff] %v993_v30   ;;  %v182_v41 = vmul.f32 %v869_v33, %v1178_v1  ;;  %v872_v42 = vunpack.c.l.bf16 %v1106_v29  ;;  %v1003_v44 = vpack.c.bf16 %v313_v37, %v312_v36  ;;  %v873_v46 = vunpack.c.h.bf16 %v1106_v29 }
  0x27   :  { %1133 = vst [vmem:[%s1505_s3 + $0x68] sm:$0xff] %v998_v35   ;;  %v252_v45 = vadd.f32 %v1192_v7, %v181_v38  ;;  %v876_v47 = vunpack.c.l.bf16 %v1107_v34  ;;  %v315_v48 = vmax.f32 %v251_v39, 0.0  ;;  %v877_v51 = vunpack.c.h.bf16 %v1107_v34  ;;  %v1113_v34 = vld [vmem:[%s1502_s0 + $0xc0] sm:$0xff]  }
  0x28   :  { %v253_v49 = vadd.f32 %v1192_v7, %v182_v41  ;;  %v183_v50 = vmul.f32 %v872_v42, %v1178_v1  ;;  %1134 = vst [vmem:[%s1505_s3 + $0x70] sm:$0xff] %v1003_v44   ;;  %v184_v53 = vmul.f32 %v873_v46, %v1178_v1  ;;  %v880_v55 = vunpack.c.l.bf16 %v1108_v43 }
  0x29   :  { %v316_v52 = vmax.f32 %v252_v45, 0.0  ;;  %v185_v54 = vmul.f32 %v876_v47, %v1178_v1  ;;  %v1008_v57 = vpack.c.bf16 %v315_v48, %v314_v40  ;;  %v186_v60 = vmul.f32 %v877_v51, %v1178_v1  ;;  %v1114_v47 = vld [vmem:[%s1502_s0 + $0xc8] sm:$0xff]  }
  0x2a   :  { %v317_v58 = vmax.f32 %v253_v49, 0.0  ;;  %v254_v59 = vadd.f32 %v1192_v7, %v183_v50  ;;  %v255_v61 = vadd.f32 %v1192_v7, %v184_v53  ;;  %v881_v63 = vunpack.c.h.bf16 %v1108_v43 }
  0x2b   :  { %v256_v62 = vadd.f32 %v1192_v7, %v185_v54  ;;  %v187_v0 = vmul.f32 %v880_v55, %v1178_v1  ;;  %1135 = vst [vmem:[%s1505_s3 + $0x78] sm:$0xff] %v1008_v57   ;;  %v257_v5 = vadd.f32 %v1192_v7, %v186_v60  ;;  %v884_v6 = vunpack.c.l.bf16 %v1109_v56 }
  0x2c   :  { %v1013_v3 = vpack.c.bf16 %v317_v58, %v316_v52  ;;  %v318_v4 = vmax.f32 %v254_v59, 0.0  ;;  %v319_v8 = vmax.f32 %v255_v61, 0.0  ;;  %v188_v10 = vmul.f32 %v881_v63, %v1178_v1  ;;  %v1115_v52 = vld [vmem:[%s1502_s0 + $0xd0] sm:$0xff]   ;;  %v1116_v61 = vld [vmem:[%s1502_s0 + $0xd8] sm:$0xff]  }
  0x2d   :  { %v320_v9 = vmax.f32 %v256_v62, 0.0  ;;  %v258_v11 = vadd.f32 %v1192_v7, %v187_v0  ;;  %v321_v12 = vmax.f32 %v257_v5, 0.0  ;;  %v885_v13 = vunpack.c.h.bf16 %v1109_v56 }
  0x2e   :  { %1136 = vst [vmem:[%s1505_s3 + $0x80] sm:$0xff] %v1013_v3   ;;  %v189_v14 = vmul.f32 %v884_v6, %v1178_v1  ;;  %v888_v15 = vunpack.c.l.bf16 %v1110_v2  ;;  %v1018_v17 = vpack.c.bf16 %v319_v8, %v318_v4  ;;  %v259_v18 = vadd.f32 %v1192_v7, %v188_v10 }
  0x2f   :  { %v322_v19 = vmax.f32 %v258_v11, 0.0  ;;  %v889_v20 = vunpack.c.h.bf16 %v1110_v2  ;;  %v1023_v22 = vpack.c.bf16 %v321_v12, %v320_v9  ;;  %v190_v23 = vmul.f32 %v885_v13, %v1178_v1  ;;  %v1117_v12 = vld [vmem:[%s1502_s0 + $0xe0] sm:$0xff]  }
  0x30   :  { %v260_v24 = vadd.f32 %v1192_v7, %v189_v14  ;;  %v191_v25 = vmul.f32 %v888_v15, %v1178_v1  ;;  %1137 = vst [vmem:[%s1505_s3 + $0x88] sm:$0xff] %v1018_v17   ;;  %v323_v26 = vmax.f32 %v259_v18, 0.0  ;;  %v892_v28 = vunpack.c.l.bf16 %v1111_v16 }
  0x31   :  { %v192_v27 = vmul.f32 %v889_v20, %v1178_v1  ;;  %v893_v29 = vunpack.c.h.bf16 %v1111_v16  ;;  %1138 = vst [vmem:[%s1505_s3 + $0x90] sm:$0xff] %v1023_v22   ;;  %v261_v30 = vadd.f32 %v1192_v7, %v190_v23  ;;  %v896_v33 = vunpack.c.l.bf16 %v1112_v21 }
  0x32   :  { %v324_v31 = vmax.f32 %v260_v24, 0.0  ;;  %v262_v32 = vadd.f32 %v1192_v7, %v191_v25  ;;  %v1028_v35 = vpack.c.bf16 %v323_v26, %v322_v19  ;;  %v193_v37 = vmul.f32 %v892_v28, %v1178_v1 }
  0x33   :  { %v263_v36 = vadd.f32 %v1192_v7, %v192_v27  ;;  %v194_v38 = vmul.f32 %v893_v29, %v1178_v1  ;;  %v325_v39 = vmax.f32 %v261_v30, 0.0  ;;  %v897_v41 = vunpack.c.h.bf16 %v1112_v21  ;;  %v1118_v21 = vld [vmem:[%s1502_s0 + $0xe8] sm:$0xff]  }
  0x34   :  { %v326_v40 = vmax.f32 %v262_v32, 0.0  ;;  %v195_v42 = vmul.f32 %v896_v33, %v1178_v1  ;;  %1139 = vst [vmem:[%s1505_s3 + $0x98] sm:$0xff] %v1028_v35   ;;  %v264_v44 = vadd.f32 %v1192_v7, %v193_v37  ;;  %v900_v46 = vunpack.c.l.bf16 %v1113_v34 }
  0x35   :  { %v327_v43 = vmax.f32 %v263_v36, 0.0  ;;  %v265_v45 = vadd.f32 %v1192_v7, %v194_v38  ;;  %v1033_v48 = vpack.c.bf16 %v325_v39, %v324_v31  ;;  %v196_v49 = vmul.f32 %v897_v41, %v1178_v1  ;;  %v1120_v39 = vld [vmem:[%s1502_s0 + $0xf8] sm:$0xff]  }
  0x36   :  { %v266_v50 = vadd.f32 %v1192_v7, %v195_v42  ;;  %v901_v51 = vunpack.c.h.bf16 %v1113_v34  ;;  %v328_v54 = vmax.f32 %v264_v44, 0.0  ;;  %v197_v56 = vmul.f32 %v900_v46, %v1178_v1  ;;  %v1119_v34 = vld [vmem:[%s1502_s0 + $0xf0] sm:$0xff]  }
  0x37   :  { %v1038_v53 = vpack.c.bf16 %v327_v43, %v326_v40  ;;  %v329_v55 = vmax.f32 %v265_v45, 0.0  ;;  %1140 = vst [vmem:[%s1505_s3 + $0xa0] sm:$0xff] %v1033_v48   ;;  %v267_v57 = vadd.f32 %v1192_v7, %v196_v49  ;;  %v904_v60 = vunpack.c.l.bf16 %v1114_v47 }
  0x38   :  { %v330_v58 = vmax.f32 %v266_v50, 0.0  ;;  %v198_v59 = vmul.f32 %v901_v51, %v1178_v1  ;;  %v268_v63 = vadd.f32 %v1192_v7, %v197_v56  ;;  %v905_v0 = vunpack.c.h.bf16 %v1114_v47 }
  0x39   :  { %1141 = vst [vmem:[%s1505_s3 + $0xa8] sm:$0xff] %v1038_v53   ;;  %v1043_v62 = vpack.c.bf16 %v329_v55, %v328_v54  ;;  %v908_v2 = vunpack.c.l.bf16 %v1115_v52  ;;  %v331_v3 = vmax.f32 %v267_v57, 0.0  ;;  %v199_v5 = vmul.f32 %v904_v60, %v1178_v1 }
  0x3a   :  { %v269_v4 = vadd.f32 %v1192_v7, %v198_v59  ;;  %v909_v6 = vunpack.c.h.bf16 %v1115_v52  ;;  %v332_v8 = vmax.f32 %v268_v63, 0.0  ;;  %v200_v9 = vmul.f32 %v905_v0, %v1178_v1 }
  0x3b   :  { %1142 = vst [vmem:[%s1505_s3 + $0xb0] sm:$0xff] %v1043_v62   ;;  %v201_v10 = vmul.f32 %v908_v2, %v1178_v1  ;;  %v912_v11 = vunpack.c.l.bf16 %v1116_v61  ;;  %v1048_v13 = vpack.c.bf16 %v331_v3, %v330_v58  ;;  %v270_v15 = vadd.f32 %v1192_v7, %v199_v5 }
  0x3c   :  { %v333_v14 = vmax.f32 %v269_v4, 0.0  ;;  %v202_v16 = vmul.f32 %v909_v6, %v1178_v1  ;;  %v271_v17 = vadd.f32 %v1192_v7, %v200_v9  ;;  %v913_v19 = vunpack.c.h.bf16 %v1116_v61 }
  0x3d   :  { %v272_v18 = vadd.f32 %v1192_v7, %v201_v10  ;;  %v203_v20 = vmul.f32 %v912_v11, %v1178_v1  ;;  %1143 = vst [vmem:[%s1505_s3 + $0xb8] sm:$0xff] %v1048_v13   ;;  %v334_v23 = vmax.f32 %v270_v15, 0.0  ;;  %v916_v25 = vunpack.c.l.bf16 %v1117_v12 }
  0x3e   :  { %v1053_v22 = vpack.c.bf16 %v333_v14, %v332_v8  ;;  %v273_v24 = vadd.f32 %v1192_v7, %v202_v16  ;;  %v335_v26 = vmax.f32 %v271_v17, 0.0  ;;  %v204_v28 = vmul.f32 %v913_v19, %v1178_v1 }
  0x3f   :  { %v336_v27 = vmax.f32 %v272_v18, 0.0  ;;  %v274_v29 = vadd.f32 %v1192_v7, %v203_v20  ;;  %v917_v31 = vunpack.c.h.bf16 %v1117_v12  ;;  %v205_v32 = vmul.f32 %v916_v25, %v1178_v1 }
  0x40   :  { %1144 = vst [vmem:[%s1505_s3 + $0xc0] sm:$0xff] %v1053_v22   ;;  %v337_v30 = vmax.f32 %v273_v24, 0.0  ;;  %v920_v33 = vunpack.c.l.bf16 %v1118_v21  ;;  %v1058_v35 = vpack.c.bf16 %v335_v26, %v334_v23  ;;  %v275_v36 = vadd.f32 %v1192_v7, %v204_v28 }
  0x41   :  { %v338_v37 = vmax.f32 %v274_v29, 0.0  ;;  %v921_v38 = vunpack.c.h.bf16 %v1118_v21  ;;  %v206_v41 = vmul.f32 %v917_v31, %v1178_v1  ;;  %v276_v42 = vadd.f32 %v1192_v7, %v205_v32 }
  0x42   :  { %v1063_v40 = vpack.c.bf16 %v337_v30, %v336_v27  ;;  %v207_v43 = vmul.f32 %v920_v33, %v1178_v1  ;;  %1145 = vst [vmem:[%s1505_s3 + $0xc8] sm:$0xff] %v1058_v35   ;;  %v339_v44 = vmax.f32 %v275_v36, 0.0  ;;  %v924_v46 = vunpack.c.l.bf16 %v1119_v34 }
  0x43   :  { %v208_v45 = vmul.f32 %v921_v38, %v1178_v1  ;;  %v925_v47 = vunpack.c.h.bf16 %v1119_v34  ;;  %v277_v48 = vadd.f32 %v1192_v7, %v206_v41  ;;  %v340_v49 = vmax.f32 %v276_v42, 0.0 }
  0x44   :  { %1146 = vst [vmem:[%s1505_s3 + $0xd0] sm:$0xff] %v1063_v40   ;;  %v278_v50 = vadd.f32 %v1192_v7, %v207_v43  ;;  %v928_v51 = vunpack.c.l.bf16 %v1120_v39  ;;  %v1068_v52 = vpack.c.bf16 %v339_v44, %v338_v37  ;;  %v209_v54 = vmul.f32 %v924_v46, %v1178_v1 }
  0x45   :  { %v279_v53 = vadd.f32 %v1192_v7, %v208_v45  ;;  %v210_v55 = vmul.f32 %v925_v47, %v1178_v1  ;;  %v341_v56 = vmax.f32 %v277_v48, 0.0  ;;  %v929_v58 = vunpack.c.h.bf16 %v1120_v39 }
  0x46   :  { %v342_v57 = vmax.f32 %v278_v50, 0.0  ;;  %v211_v59 = vmul.f32 %v928_v51, %v1178_v1  ;;  %1147 = vst [vmem:[%s1505_s3 + $0xd8] sm:$0xff] %v1068_v52   ;;  %v280_v61 = vadd.f32 %v1192_v7, %v209_v54 }
  0x47   :  { %v343_v60 = vmax.f32 %v279_v53, 0.0  ;;  %v281_v62 = vadd.f32 %v1192_v7, %v210_v55  ;;  %v1073_v63 = vpack.c.bf16 %v341_v56, %v340_v49  ;;  %v212_v0 = vmul.f32 %v929_v58, %v1178_v1 }
  0x48   :  { %v282_v2 = vadd.f32 %v1192_v7, %v211_v59  ;;  %v344_v4 = vmax.f32 %v280_v61, 0.0 }
  0x49   :  { %v1078_v3 = vpack.c.bf16 %v343_v60, %v342_v57  ;;  %v345_v5 = vmax.f32 %v281_v62, 0.0  ;;  %1148 = vst [vmem:[%s1505_s3 + $0xe0] sm:$0xff] %v1073_v63   ;;  %v283_v6 = vadd.f32 %v1192_v7, %v212_v0 }
  0x4a   :  { %v346_v8 = vmax.f32 %v282_v2, 0.0 }
  0x4b   :  { %1149 = vst [vmem:[%s1505_s3 + $0xe8] sm:$0xff] %v1078_v3   ;;  %v1083_v9 = vpack.c.bf16 %v345_v5, %v344_v4  ;;  %v347_v10 = vmax.f32 %v283_v6, 0.0 }
  0x4d   :  { %1150 = vst [vmem:[%s1505_s3 + $0xf0] sm:$0xff] %v1083_v9   ;;  %v1088_v1 = vpack.c.bf16 %v347_v10, %v346_v8 }
  0x4f   :  { %1151 = vst [vmem:[%s1505_s3 + $0xf8] sm:$0xff] %v1088_v1  }

// kernel: forward.39
= control target key start
LH: loop header
LB: loop body
LE: loop exit
PB: predicated region body
PF: predicated region fallthrough
CT: control target
= control target key end

     0   :  { %v2235_v0 = vmov 0   ;;  %s2972_s1 = inlined_call_operand.vmem [shape: bf16[256,128], index: 1, kind: input, shape index: {}]   ;;  %s2973_s0 = inlined_call_operand.vmem [shape: bf16[512,256], index: 0, kind: input, shape index: {}]   ;;  %s2974_s2 = inlined_call_operand.vmem [shape: bf16[512,128], index: 2, kind: output, shape index: {0}]   ;;  %s2975_s3 = inlined_call_operand.vmem [shape: f32[1,128], index: 3, kind: output, shape index: {1}]   ;;  %s2976_s4 = inlined_call_operand.vmem [shape: f32[1,128], index: 4, kind: output, shape index: {2}]  }
   0x1   :  { %659 = vmatprep.subr.bf16.mxu0 %v2235_v0  ;;  %v2123_v1 = vld [vmem:[%s2972_s1 + $0x38] sm:$0xff]   ;;  %2089 = vmatprep.subr.bf16.mxu1 %v2235_v0  ;;  %v2124_v2 = vld [vmem:[%s2972_s1 + $0x30] sm:$0xff]   ;;  %v2125_v3 = vld [vmem:[%s2972_s1 + $0x28] sm:$0xff]  }
   0x2   :  { %660 = vmatpush1.bf16.msra.mxu0 %v2123_v1  ;;  %2105 = vmatpush1.bf16.msra.mxu1 %v2123_v1  ;;  %v2126_v4 = vld [vmem:[%s2972_s1 + $0x20] sm:$0xff]   ;;  %v2127_v5 = vld [vmem:[%s2972_s1 + $0x18] sm:$0xff]   ;;  %v2128_v7 = vld [vmem:[%s2972_s1 + $0x10] sm:$0xff]  }
   0x3   :  { %661 = vmatprep.subr.bf16.mxu0 %v2235_v0  ;;  %2090 = vmatprep.subr.bf16.mxu1 %v2235_v0  ;;  %v2141_v6 = vld [vmem:[%s2973_s0 + $0x4] ss:$8 sps:$4 sm:$0xff]   ;;  %v2131_v11 = vld [vmem:[%s2972_s1 + $0x78] sm:$0xff]   ;;  %v2132_v12 = vld [vmem:[%s2972_s1 + $0x70] sm:$0xff]  }
   0x4   :  { %691 = vmatprep.mubr.bf16.mxu0 %v2141_v6  ;;  %v2129_v8 = vld [vmem:[%s2972_s1 + $0x8] sm:$0xff]   ;;  %v2130_v9 = vld [vmem:[%s2972_s1] sm:$0xff]   ;;  %v2135_v15 = vld [vmem:[%s2972_s1 + $0x58] sm:$0xff]  }
   0x5   :  { %v2165_v10 = vld [vmem:[%s2973_s0 + $0x104] ss:$8 sps:$4 sm:$0xff]   ;;  %v2136_v16 = vld [vmem:[%s2972_s1 + $0x50] sm:$0xff]   ;;  %v2139_v19 = vld [vmem:[%s2973_s0] ss:$8 sps:$4 sm:$0xff]  }
   0x6   :  { %662 = vmatpush1.bf16.msra.mxu0 %v2124_v2  ;;  %2106 = vmatpush1.bf16.msra.mxu1 %v2124_v2  ;;  %v2133_v13 = vld [vmem:[%s2972_s1 + $0x68] sm:$0xff]   ;;  %v2134_v14 = vld [vmem:[%s2972_s1 + $0x60] sm:$0xff]   ;;  %v2142_v21 = vld [vmem:[%s2973_s0 + $0x14] ss:$8 sps:$4 sm:$0xff]  }
   0x7   :  { %663 = vmatprep.subr.bf16.mxu0 %v2235_v0  ;;  %2091 = vmatprep.subr.bf16.mxu1 %v2235_v0  ;;  %v2137_v17 = vld [vmem:[%s2972_s1 + $0x48] sm:$0xff]   ;;  %v2138_v18 = vld [vmem:[%s2972_s1 + $0x40] sm:$0xff]   ;;  %v2169_v22 = vld [vmem:[%s2973_s0 + $0x114] ss:$8 sps:$4 sm:$0xff]  }
   0x8   :  { %819 = vmatprep.mubr.bf16.mxu1 %v2165_v10  ;;  %v2163_v20 = vld [vmem:[%s2973_s0 + $0x100] ss:$8 sps:$4 sm:$0xff]   ;;  %v2144_v23 = vld [vmem:[%s2973_s0 + $0x10] ss:$8 sps:$4 sm:$0xff]   ;;  %v2145_v25 = vld [vmem:[%s2973_s0 + $0x24] ss:$8 sps:$4 sm:$0xff]  }
   0x9   :  { %v2171_v24 = vld [vmem:[%s2973_s0 + $0x110] ss:$8 sps:$4 sm:$0xff]   ;;  %v2175_v26 = vld [vmem:[%s2973_s0 + $0x124] ss:$8 sps:$4 sm:$0xff]   ;;  %v2147_v27 = vld [vmem:[%s2973_s0 + $0x20] ss:$8 sps:$4 sm:$0xff]  }
   0xa   :  { %664 = vmatpush1.bf16.msra.mxu0 %v2125_v3  ;;  %2107 = vmatpush1.bf16.msra.mxu1 %v2125_v3  ;;  %v2177_v28 = vld [vmem:[%s2973_s0 + $0x120] ss:$8 sps:$4 sm:$0xff]   ;;  %v2148_v29 = vld [vmem:[%s2973_s0 + $0x34] ss:$8 sps:$4 sm:$0xff]   ;;  %v2150_v31 = vld [vmem:[%s2973_s0 + $0x30] ss:$8 sps:$4 sm:$0xff]  }
   0xb   :  { %665 = vmatprep.subr.bf16.mxu0 %v2235_v0  ;;  %2092 = vmatprep.subr.bf16.mxu1 %v2235_v0  ;;  %v2181_v30 = vld [vmem:[%s2973_s0 + $0x134] ss:$8 sps:$4 sm:$0xff]   ;;  %v2183_v32 = vld [vmem:[%s2973_s0 + $0x130] ss:$8 sps:$4 sm:$0xff]   ;;  %v2151_v33 = vld [vmem:[%s2973_s0 + $0x44] ss:$8 sps:$4 sm:$0xff]  }
   0xc   :  { %v2187_v34 = vld [vmem:[%s2973_s0 + $0x144] ss:$8 sps:$4 sm:$0xff]   ;;  %v2153_v35 = vld [vmem:[%s2973_s0 + $0x40] ss:$8 sps:$4 sm:$0xff]   ;;  %v2154_v37 = vld [vmem:[%s2973_s0 + $0x54] ss:$8 sps:$4 sm:$0xff]  }
   0xd   :  { %v2189_v36 = vld [vmem:[%s2973_s0 + $0x140] ss:$8 sps:$4 sm:$0xff]   ;;  %v2193_v38 = vld [vmem:[%s2973_s0 + $0x154] ss:$8 sps:$4 sm:$0xff]   ;;  %v2156_v39 = vld [vmem:[%s2973_s0 + $0x50] ss:$8 sps:$4 sm:$0xff]  }
   0xe   :  { %666 = vmatpush1.bf16.msra.mxu0 %v2126_v4  ;;  %2108 = vmatpush1.bf16.msra.mxu1 %v2126_v4  ;;  %v2195_v40 = vld [vmem:[%s2973_s0 + $0x150] ss:$8 sps:$4 sm:$0xff]   ;;  %v2157_v41 = vld [vmem:[%s2973_s0 + $0x64] ss:$8 sps:$4 sm:$0xff]   ;;  %v2159_v43 = vld [vmem:[%s2973_s0 + $0x60] ss:$8 sps:$4 sm:$0xff]  }
   0xf   :  { %667 = vmatprep.subr.bf16.mxu0 %v2235_v0  ;;  %2093 = vmatprep.subr.bf16.mxu1 %v2235_v0  ;;  %v2199_v42 = vld [vmem:[%s2973_s0 + $0x164] ss:$8 sps:$4 sm:$0xff]   ;;  %v2201_v44 = vld [vmem:[%s2973_s0 + $0x160] ss:$8 sps:$4 sm:$0xff]   ;;  %v2160_v45 = vld [vmem:[%s2973_s0 + $0x74] ss:$8 sps:$4 sm:$0xff]  }
  0x10   :  { %v2205_v46 = vld [vmem:[%s2973_s0 + $0x174] ss:$8 sps:$4 sm:$0xff]   ;;  %v2162_v47 = vld [vmem:[%s2973_s0 + $0x70] ss:$8 sps:$4 sm:$0xff]   ;;  %v2166_v49 = vld [vmem:[%s2973_s0 + $0x84] ss:$8 sps:$4 sm:$0xff]  }
  0x11   :  { %v2207_v48 = vld [vmem:[%s2973_s0 + $0x170] ss:$8 sps:$4 sm:$0xff]   ;;  %v2211_v50 = vld [vmem:[%s2973_s0 + $0x184] ss:$8 sps:$4 sm:$0xff]   ;;  %v2168_v51 = vld [vmem:[%s2973_s0 + $0x80] ss:$8 sps:$4 sm:$0xff]  }
  0x12   :  { %668 = vmatpush1.bf16.msra.mxu0 %v2127_v5  ;;  %2109 = vmatpush1.bf16.msra.mxu1 %v2127_v5  ;;  %v2213_v52 = vld [vmem:[%s2973_s0 + $0x180] ss:$8 sps:$4 sm:$0xff]   ;;  %v2172_v53 = vld [vmem:[%s2973_s0 + $0x94] ss:$8 sps:$4 sm:$0xff]   ;;  %v2174_v55 = vld [vmem:[%s2973_s0 + $0x90] ss:$8 sps:$4 sm:$0xff]  }
  0x13   :  { %669 = vmatprep.subr.bf16.mxu0 %v2235_v0  ;;  %2094 = vmatprep.subr.bf16.mxu1 %v2235_v0  ;;  %v2214_v54 = vld [vmem:[%s2973_s0 + $0x194] ss:$8 sps:$4 sm:$0xff]   ;;  %v2216_v56 = vld [vmem:[%s2973_s0 + $0x190] ss:$8 sps:$4 sm:$0xff]   ;;  %v2178_v57 = vld [vmem:[%s2973_s0 + $0xa4] ss:$8 sps:$4 sm:$0xff]  }
  0x14   :  { %v2217_v58 = vld [vmem:[%s2973_s0 + $0x1a4] ss:$8 sps:$4 sm:$0xff]   ;;  %v2180_v59 = vld [vmem:[%s2973_s0 + $0xa0] ss:$8 sps:$4 sm:$0xff]   ;;  %v2184_v61 = vld [vmem:[%s2973_s0 + $0xb4] ss:$8 sps:$4 sm:$0xff]  }
  0x15   :  { %v2219_v60 = vld [vmem:[%s2973_s0 + $0x1a0] ss:$8 sps:$4 sm:$0xff]   ;;  %v2220_v62 = vld [vmem:[%s2973_s0 + $0x1b4] ss:$8 sps:$4 sm:$0xff]   ;;  %v2186_v63 = vld [vmem:[%s2973_s0 + $0xb0] ss:$8 sps:$4 sm:$0xff]  }
  0x16   :  { %670 = vmatpush1.bf16.msra.mxu0 %v2128_v7  ;;  %2110 = vmatpush1.bf16.msra.mxu1 %v2128_v7  ;;  %v2190_v1 = vld [vmem:[%s2973_s0 + $0xc4] ss:$8 sps:$4 sm:$0xff]   ;;  %v2192_v3 = vld [vmem:[%s2973_s0 + $0xc0] ss:$8 sps:$4 sm:$0xff]   ;;  %v2196_v5 = vld [vmem:[%s2973_s0 + $0xd4] ss:$8 sps:$4 sm:$0xff]  }
  0x17   :  { %671 = vmatprep.subr.bf16.mxu0 %v2235_v0  ;;  %2095 = vmatprep.subr.bf16.mxu1 %v2235_v0  ;;  %v2223_v2 = vld [vmem:[%s2973_s0 + $0x1c4] ss:$8 sps:$4 sm:$0xff]   ;;  %v2225_v4 = vld [vmem:[%s2973_s0 + $0x1c0] ss:$8 sps:$4 sm:$0xff]   ;;  %v2226_v6 = vld [vmem:[%s2973_s0 + $0x1d4] ss:$8 sps:$4 sm:$0xff]  }
  0x18   :  { %v2198_v7 = vld [vmem:[%s2973_s0 + $0xd0] ss:$8 sps:$4 sm:$0xff]   ;;  %v2229_v10 = vld [vmem:[%s2973_s0 + $0x1e4] ss:$8 sps:$4 sm:$0xff]  }
  0x1a   :  { %672 = vmatpush1.bf16.msra.mxu0 %v2129_v8  ;;  %2111 = vmatpush1.bf16.msra.mxu1 %v2129_v8  ;;  %v2228_v8 = vld [vmem:[%s2973_s0 + $0x1d0] ss:$8 sps:$4 sm:$0xff]  }
  0x1b   :  { %673 = vmatprep.subr.bf16.mxu0 %v2235_v0  ;;  %2096 = vmatprep.subr.bf16.mxu1 %v2235_v0 }
  0x1e   :  { %674 = vmatpush1.bf16.msra.mxu0 %v2130_v9  ;;  %2112 = vmatpush1.bf16.msra.mxu1 %v2130_v9  ;;  %v2202_v9 = vld [vmem:[%s2973_s0 + $0xe4] ss:$8 sps:$4 sm:$0xff]  }
  0x1f   :  { %675 = vmatprep.subr.bf16.mxu0 %v2235_v0  ;;  %2097 = vmatprep.subr.bf16.mxu1 %v2235_v0 }
  0x22   :  { %676 = vmatpush2.bf16.msra.mxu0 %v2131_v11  ;;  %2113 = vmatpush2.bf16.msra.mxu1 %v2131_v11  ;;  %v2204_v11 = vld [vmem:[%s2973_s0 + $0xe0] ss:$8 sps:$4 sm:$0xff]  }
  0x23   :  { %677 = vmatprep.subr.bf16.mxu0 %v2235_v0  ;;  %2098 = vmatprep.subr.bf16.mxu1 %v2235_v0 }
  0x26   :  { %678 = vmatpush2.bf16.msra.mxu0 %v2132_v12  ;;  %2114 = vmatpush2.bf16.msra.mxu1 %v2132_v12  ;;  %v2231_v12 = vld [vmem:[%s2973_s0 + $0x1e0] ss:$8 sps:$4 sm:$0xff]  }
  0x27   :  { %679 = vmatprep.subr.bf16.mxu0 %v2235_v0  ;;  %2099 = vmatprep.subr.bf16.mxu1 %v2235_v0 }
  0x2a   :  { %680 = vmatpush2.bf16.msra.mxu0 %v2133_v13  ;;  %2115 = vmatpush2.bf16.msra.mxu1 %v2133_v13  ;;  %v2208_v13 = vld [vmem:[%s2973_s0 + $0xf4] ss:$8 sps:$4 sm:$0xff]  }
  0x2b   :  { %681 = vmatprep.subr.bf16.mxu0 %v2235_v0  ;;  %2100 = vmatprep.subr.bf16.mxu1 %v2235_v0 }
  0x2e   :  { %682 = vmatpush2.bf16.msra.mxu0 %v2134_v14  ;;  %2116 = vmatpush2.bf16.msra.mxu1 %v2134_v14  ;;  %v2232_v14 = vld [vmem:[%s2973_s0 + $0x1f4] ss:$8 sps:$4 sm:$0xff]  }
  0x2f   :  { %683 = vmatprep.subr.bf16.mxu0 %v2235_v0  ;;  %2101 = vmatprep.subr.bf16.mxu1 %v2235_v0 }
  0x32   :  { %684 = vmatpush2.bf16.msra.mxu0 %v2135_v15  ;;  %2117 = vmatpush2.bf16.msra.mxu1 %v2135_v15  ;;  %v2210_v15 = vld [vmem:[%s2973_s0 + $0xf0] ss:$8 sps:$4 sm:$0xff]  }
  0x33   :  { %685 = vmatprep.subr.bf16.mxu0 %v2235_v0  ;;  %2102 = vmatprep.subr.bf16.mxu1 %v2235_v0 }
  0x36   :  { %686 = vmatpush2.bf16.msra.mxu0 %v2136_v16  ;;  %2118 = vmatpush2.bf16.msra.mxu1 %v2136_v16  ;;  %v2234_v16 = vld [vmem:[%s2973_s0 + $0x1f0] ss:$8 sps:$4 sm:$0xff]  }
  0x37   :  { %687 = vmatprep.subr.bf16.mxu0 %v2235_v0  ;;  %2103 = vmatprep.subr.bf16.mxu1 %v2235_v0 }
  0x3a   :  { %688 = vmatpush2.bf16.msra.mxu0 %v2137_v17  ;;  %2119 = vmatpush2.bf16.msra.mxu1 %v2137_v17 }
  0x3b   :  { %689 = vmatprep.subr.bf16.mxu0 %v2235_v0  ;;  %2104 = vmatprep.subr.bf16.mxu1 %v2235_v0  ;;  %v2222_v0 = vld [vmem:[%s2973_s0 + $0x1b0] ss:$8 sps:$4 sm:$0xff]  }
  0x3e   :  { %690 = vmatpush2.bf16.msra.mxu0 %v2138_v18  ;;  %2120 = vmatpush2.bf16.msra.mxu1 %v2138_v18 }
  0x41   :  { %692 = vmatmul.mubr.bf16.vlgmr.msra.gmra.mxu0 %v2139_v19  ;;  %820 = vmatmul.mubr.bf16.vlgmr.msra.gmra.mxu1 %v2163_v20 }
  0x42   :  { %699 = vmatprep.mubr.bf16.mxu0 %v2142_v21  ;;  %827 = vmatprep.mubr.bf16.mxu1 %v2169_v22 }
  0x49   :  { %700 = vmatmul.mubr.bf16.gmra.mxu0 %v2144_v23  ;;  %828 = vmatmul.mubr.bf16.gmra.mxu1 %v2171_v24 }
  0x4a   :  { %707 = vmatprep.mubr.bf16.mxu0 %v2145_v25  ;;  %835 = vmatprep.mubr.bf16.mxu1 %v2175_v26 }
  0x51   :  { %708 = vmatmul.mubr.bf16.gmra.mxu0 %v2147_v27  ;;  %836 = vmatmul.mubr.bf16.gmra.mxu1 %v2177_v28 }
  0x52   :  { %715 = vmatprep.mubr.bf16.mxu0 %v2148_v29  ;;  %843 = vmatprep.mubr.bf16.mxu1 %v2181_v30 }
  0x59   :  { %716 = vmatmul.mubr.bf16.gmra.mxu0 %v2150_v31  ;;  %844 = vmatmul.mubr.bf16.gmra.mxu1 %v2183_v32 }
  0x5a   :  { %723 = vmatprep.mubr.bf16.mxu0 %v2151_v33  ;;  %851 = vmatprep.mubr.bf16.mxu1 %v2187_v34 }
  0x61   :  { %724 = vmatmul.mubr.bf16.gmra.mxu0 %v2153_v35  ;;  %852 = vmatmul.mubr.bf16.gmra.mxu1 %v2189_v36 }
  0x62   :  { %731 = vmatprep.mubr.bf16.mxu0 %v2154_v37  ;;  %859 = vmatprep.mubr.bf16.mxu1 %v2193_v38 }
  0x69   :  { %732 = vmatmul.mubr.bf16.gmra.mxu0 %v2156_v39  ;;  %860 = vmatmul.mubr.bf16.gmra.mxu1 %v2195_v40 }
  0x6a   :  { %739 = vmatprep.mubr.bf16.mxu0 %v2157_v41  ;;  %867 = vmatprep.mubr.bf16.mxu1 %v2199_v42 }
  0x71   :  { %740 = vmatmul.mubr.bf16.gmra.mxu0 %v2159_v43  ;;  %868 = vmatmul.mubr.bf16.gmra.mxu1 %v2201_v44 }
  0x72   :  { %747 = vmatprep.mubr.bf16.mxu0 %v2160_v45  ;;  %875 = vmatprep.mubr.bf16.mxu1 %v2205_v46 }
  0x79   :  { %748 = vmatmul.mubr.bf16.gmra.mxu0 %v2162_v47  ;;  %876 = vmatmul.mubr.bf16.gmra.mxu1 %v2207_v48 }
  0x7a   :  { %755 = vmatprep.mubr.bf16.mxu0 %v2166_v49  ;;  %883 = vmatprep.mubr.bf16.mxu1 %v2211_v50 }
  0x81   :  { %756 = vmatmul.mubr.bf16.gmra.mxu0 %v2168_v51  ;;  %884 = vmatmul.mubr.bf16.gmra.mxu1 %v2213_v52 }
  0x82   :  { %763 = vmatprep.mubr.bf16.mxu0 %v2172_v53  ;;  %891 = vmatprep.mubr.bf16.mxu1 %v2214_v54 }
  0x89   :  { %764 = vmatmul.mubr.bf16.gmra.mxu0 %v2174_v55  ;;  %892 = vmatmul.mubr.bf16.gmra.mxu1 %v2216_v56 }
  0x8a   :  { %771 = vmatprep.mubr.bf16.mxu0 %v2178_v57  ;;  %899 = vmatprep.mubr.bf16.mxu1 %v2217_v58 }
  0x91   :  { %772 = vmatmul.mubr.bf16.gmra.mxu0 %v2180_v59  ;;  %900 = vmatmul.mubr.bf16.gmra.mxu1 %v2219_v60 }
  0x92   :  { %779 = vmatprep.mubr.bf16.mxu0 %v2184_v61  ;;  %907 = vmatprep.mubr.bf16.mxu1 %v2220_v62 }
  0x99   :  { %780 = vmatmul.mubr.bf16.gmra.mxu0 %v2186_v63  ;;  %908 = vmatmul.mubr.bf16.gmra.mxu1 %v2222_v0 }
  0x9a   :  { %787 = vmatprep.mubr.bf16.mxu0 %v2190_v1  ;;  %915 = vmatprep.mubr.bf16.mxu1 %v2223_v2 }
  0xa1   :  { %788 = vmatmul.mubr.bf16.gmra.mxu0 %v2192_v3  ;;  %916 = vmatmul.mubr.bf16.gmra.mxu1 %v2225_v4 }
  0xa2   :  { %795 = vmatprep.mubr.bf16.mxu0 %v2196_v5  ;;  %923 = vmatprep.mubr.bf16.mxu1 %v2226_v6 }
  0xa9   :  { %796 = vmatmul.mubr.bf16.gmra.mxu0 %v2198_v7  ;;  %924 = vmatmul.mubr.bf16.gmra.mxu1 %v2228_v8 }
  0xaa   :  { %803 = vmatprep.mubr.bf16.mxu0 %v2202_v9  ;;  %931 = vmatprep.mubr.bf16.mxu1 %v2229_v10 }
  0xb1   :  { %804 = vmatmul.mubr.bf16.gmra.mxu0 %v2204_v11  ;;  %932 = vmatmul.mubr.bf16.gmra.mxu1 %v2231_v12 }
  0xb2   :  { %811 = vmatprep.mubr.bf16.mxu0 %v2208_v13  ;;  %939 = vmatprep.mubr.bf16.mxu1 %v2232_v14 }
  0xb9   :  { %812 = vmatmul.mubr.bf16.gmra.mxu0 %v2210_v15  ;;  %940 = vmatmul.mubr.bf16.gmra.mxu1 %v2234_v16 }
 0x101   :  { %v2534_v17 = vpop.f32.mrf.mxu0  ;;  %v2536_v18 = vpop.f32.mrf.mxu1 }
 0x103   :  { %v695_v19 = vpop.f32.mrf.mxu0  ;;  %v823_v20 = vpop.f32.mrf.mxu1 }
 0x105   :  { %v2538_v21 = vpop.f32.mrf.mxu0  ;;  %v2540_v22 = vpop.f32.mrf.mxu1 }
 0x106   :  { %v1901_v23 = vpack.c.bf16 %v2538_v21, %v2534_v17  ;;  %v1981_v24 = vpack.c.bf16 %v2540_v22, %v2536_v18 }
 0x107   :  { %v698_v25 = vpop.f32.mrf.mxu0  ;;  %v826_v26 = vpop.f32.mrf.mxu1 }
 0x108   :  { %1902 = vst [vmem:[%s2974_s2] sm:$0xff] %v1901_v23   ;;  %2073 = vst [vmem:[%s2974_s2 + $0x80] sm:$0xff] %v1981_v24  }
 0x109   :  { %v2552_v27 = vpop.f32.mrf.mxu0  ;;  %v2554_v28 = vpop.f32.mrf.mxu1 }
 0x10b   :  { %v703_v29 = vpop.f32.mrf.mxu0  ;;  %v831_v30 = vpop.f32.mrf.mxu1 }
 0x10d   :  { %v2556_v31 = vpop.f32.mrf.mxu0  ;;  %v2558_v32 = vpop.f32.mrf.mxu1 }
 0x10e   :  { %v1906_v33 = vpack.c.bf16 %v2556_v31, %v2552_v27  ;;  %v1986_v34 = vpack.c.bf16 %v2558_v32, %v2554_v28 }
 0x10f   :  { %v706_v35 = vpop.f32.mrf.mxu0  ;;  %v834_v36 = vpop.f32.mrf.mxu1 }
 0x110   :  { %2058 = vst [vmem:[%s2974_s2 + $0x8] sm:$0xff] %v1906_v33   ;;  %2074 = vst [vmem:[%s2974_s2 + $0x88] sm:$0xff] %v1986_v34  }
 0x111   :  { %v2570_v37 = vpop.f32.mrf.mxu0  ;;  %v2572_v38 = vpop.f32.mrf.mxu1 }
 0x113   :  { %v711_v39 = vpop.f32.mrf.mxu0  ;;  %v839_v40 = vpop.f32.mrf.mxu1 }
 0x115   :  { %v2574_v41 = vpop.f32.mrf.mxu0  ;;  %v2576_v42 = vpop.f32.mrf.mxu1 }
 0x116   :  { %v1911_v43 = vpack.c.bf16 %v2574_v41, %v2570_v37  ;;  %v1991_v44 = vpack.c.bf16 %v2576_v42, %v2572_v38 }
 0x117   :  { %v714_v45 = vpop.f32.mrf.mxu0  ;;  %v842_v46 = vpop.f32.mrf.mxu1 }
 0x118   :  { %2059 = vst [vmem:[%s2974_s2 + $0x10] sm:$0xff] %v1911_v43   ;;  %2075 = vst [vmem:[%s2974_s2 + $0x90] sm:$0xff] %v1991_v44   ;;  %v1544_v43 = vmul.f32 %v2538_v21, %v2538_v21  ;;  %v2236_v46 = vmov 0.0  }
 0x119   :  { %v2588_v47 = vpop.f32.mrf.mxu0  ;;  %v2590_v48 = vpop.f32.mrf.mxu1  ;;  %1081 = vst [vmem:[%s2975_s3] sm:$0x1] %v2236_v46  ;;  %1082 = vst [vmem:[%s2976_s4] sm:$0x1] %v2236_v46 }
 0x11b   :  { %v719_v49 = vpop.f32.mrf.mxu0  ;;  %v847_v50 = vpop.f32.mrf.mxu1 }
 0x11c   :  { %v1543_v49 = vmul.f32 %v2534_v17, %v2534_v17  ;;  %v1545_v50 = vmul.f32 %v2552_v27, %v2552_v27 }
 0x11d   :  { %v2592_v51 = vpop.f32.mrf.mxu0  ;;  %v2594_v52 = vpop.f32.mrf.mxu1 }
 0x11e   :  { %v1916_v53 = vpack.c.bf16 %v2592_v51, %v2588_v47  ;;  %v1996_v54 = vpack.c.bf16 %v2594_v52, %v2590_v48 }
 0x11f   :  { %v722_v55 = vpop.f32.mrf.mxu0  ;;  %v850_v56 = vpop.f32.mrf.mxu1 }
 0x120   :  { %2060 = vst [vmem:[%s2974_s2 + $0x18] sm:$0xff] %v1916_v53   ;;  %2076 = vst [vmem:[%s2974_s2 + $0x98] sm:$0xff] %v1996_v54   ;;  %v1471_v55 = vadd.f32 %v2538_v21, %v2534_v17  ;;  %v1607_v56 = vadd.f32 %v1544_v43, %v1543_v49 }
 0x121   :  { %v2606_v57 = vpop.f32.mrf.mxu0  ;;  %v2608_v58 = vpop.f32.mrf.mxu1 }
 0x122   :  { %v1551_v43 = vmul.f32 %v2606_v57, %v2606_v57 }
 0x123   :  { %v727_v59 = vpop.f32.mrf.mxu0  ;;  %v855_v60 = vpop.f32.mrf.mxu1 }
 0x124   :  { %v1546_v59 = vmul.f32 %v2556_v31, %v2556_v31 }
 0x125   :  { %v2610_v61 = vpop.f32.mrf.mxu0  ;;  %v2612_v62 = vpop.f32.mrf.mxu1 }
 0x126   :  { %v1921_v63 = vpack.c.bf16 %v2610_v61, %v2606_v57  ;;  %v2001_v0 = vpack.c.bf16 %v2612_v62, %v2608_v58 }
 0x127   :  { %v730_v1 = vpop.f32.mrf.mxu0  ;;  %v858_v2 = vpop.f32.mrf.mxu1 }
 0x128   :  { %2061 = vst [vmem:[%s2974_s2 + $0x20] sm:$0xff] %v1921_v63   ;;  %2077 = vst [vmem:[%s2974_s2 + $0xa0] sm:$0xff] %v2001_v0   ;;  %v1472_v0 = vadd.f32 %v1471_v55, %v2552_v27  ;;  %v1608_v1 = vadd.f32 %v1607_v56, %v1545_v50  ;;  %v1547_v2 = vmul.f32 %v2570_v37, %v2570_v37 }
 0x129   :  { %v2624_v3 = vpop.f32.mrf.mxu0  ;;  %v2626_v4 = vpop.f32.mrf.mxu1  ;;  %v1548_v27 = vmul.f32 %v2574_v41, %v2574_v41 }
 0x12b   :  { %v735_v5 = vpop.f32.mrf.mxu0  ;;  %v863_v6 = vpop.f32.mrf.mxu1 }
 0x12d   :  { %v2628_v7 = vpop.f32.mrf.mxu0  ;;  %v2630_v8 = vpop.f32.mrf.mxu1 }
 0x12e   :  { %v1926_v9 = vpack.c.bf16 %v2628_v7, %v2624_v3  ;;  %v2006_v10 = vpack.c.bf16 %v2630_v8, %v2626_v4 }
 0x12f   :  { %v738_v11 = vpop.f32.mrf.mxu0  ;;  %v866_v12 = vpop.f32.mrf.mxu1 }
 0x130   :  { %2062 = vst [vmem:[%s2974_s2 + $0x28] sm:$0xff] %v1926_v9   ;;  %2078 = vst [vmem:[%s2974_s2 + $0xa8] sm:$0xff] %v2006_v10   ;;  %v1473_v9 = vadd.f32 %v1472_v0, %v2556_v31  ;;  %v1609_v10 = vadd.f32 %v1608_v1, %v1546_v59 }
 0x131   :  { %v2642_v13 = vpop.f32.mrf.mxu0  ;;  %v2644_v14 = vpop.f32.mrf.mxu1 }
 0x132   :  { %v1610_v31 = vadd.f32 %v1609_v10, %v1547_v2 }
 0x133   :  { %v743_v15 = vpop.f32.mrf.mxu0  ;;  %v871_v16 = vpop.f32.mrf.mxu1 }
 0x134   :  { %v1474_v15 = vadd.f32 %v1473_v9, %v2570_v37  ;;  %v1549_v16 = vmul.f32 %v2588_v47, %v2588_v47  ;;  %v1550_v37 = vmul.f32 %v2592_v51, %v2592_v51 }
 0x135   :  { %v2646_v19 = vpop.f32.mrf.mxu0  ;;  %v2648_v20 = vpop.f32.mrf.mxu1 }
 0x136   :  { %v1931_v23 = vpack.c.bf16 %v2646_v19, %v2642_v13  ;;  %v2011_v24 = vpack.c.bf16 %v2648_v20, %v2644_v14 }
 0x137   :  { %v746_v25 = vpop.f32.mrf.mxu0  ;;  %v874_v26 = vpop.f32.mrf.mxu1 }
 0x138   :  { %2063 = vst [vmem:[%s2974_s2 + $0x30] sm:$0xff] %v1931_v23   ;;  %2079 = vst [vmem:[%s2974_s2 + $0xb0] sm:$0xff] %v2011_v24   ;;  %v1475_v25 = vadd.f32 %v1474_v15, %v2574_v41  ;;  %v1611_v26 = vadd.f32 %v1610_v31, %v1548_v27  ;;  %v1555_v27 = vmul.f32 %v2642_v13, %v2642_v13 }
 0x139   :  { %v2660_v29 = vpop.f32.mrf.mxu0  ;;  %v2662_v30 = vpop.f32.mrf.mxu1 }
 0x13b   :  { %v751_v33 = vpop.f32.mrf.mxu0  ;;  %v879_v34 = vpop.f32.mrf.mxu1 }
 0x13d   :  { %v2664_v35 = vpop.f32.mrf.mxu0  ;;  %v2666_v36 = vpop.f32.mrf.mxu1 }
 0x13e   :  { %v1936_v39 = vpack.c.bf16 %v2664_v35, %v2660_v29  ;;  %v2016_v40 = vpack.c.bf16 %v2666_v36, %v2662_v30 }
 0x13f   :  { %v754_v44 = vpop.f32.mrf.mxu0  ;;  %v882_v45 = vpop.f32.mrf.mxu1 }
 0x140   :  { %2064 = vst [vmem:[%s2974_s2 + $0x38] sm:$0xff] %v1936_v39   ;;  %2080 = vst [vmem:[%s2974_s2 + $0xb8] sm:$0xff] %v2016_v40   ;;  %v1476_v39 = vadd.f32 %v1475_v25, %v2588_v47  ;;  %v1612_v40 = vadd.f32 %v1611_v26, %v1549_v16  ;;  %v1552_v47 = vmul.f32 %v2610_v61, %v2610_v61 }
 0x141   :  { %v2690_v53 = vpop.f32.mrf.mxu0  ;;  %v2692_v54 = vpop.f32.mrf.mxu1 }
 0x142   :  { %v1477_v46 = vadd.f32 %v1476_v39, %v2592_v51  ;;  %v1613_v50 = vadd.f32 %v1612_v40, %v1550_v37 }
 0x143   :  { %v759_v60 = vpop.f32.mrf.mxu0  ;;  %v887_v63 = vpop.f32.mrf.mxu1 }
 0x144   :  { %v1478_v59 = vadd.f32 %v1477_v46, %v2606_v57  ;;  %v1614_v51 = vadd.f32 %v1613_v50, %v1551_v43  ;;  %v1553_v60 = vmul.f32 %v2624_v3, %v2624_v3  ;;  %v1554_v57 = vmul.f32 %v2628_v7, %v2628_v7 }
 0x145   :  { %v2701_v5 = vpop.f32.mrf.mxu0  ;;  %v2703_v6 = vpop.f32.mrf.mxu1 }
 0x146   :  { %v1941_v17 = vpack.c.bf16 %v2701_v5, %v2690_v53  ;;  %v2021_v21 = vpack.c.bf16 %v2703_v6, %v2692_v54  ;;  %v1479_v1 = vadd.f32 %v1478_v59, %v2610_v61  ;;  %v1615_v2 = vadd.f32 %v1614_v51, %v1552_v47 }
 0x147   :  { %v762_v11 = vpop.f32.mrf.mxu0  ;;  %v890_v12 = vpop.f32.mrf.mxu1  ;;  %v1559_v47 = vmul.f32 %v2690_v53, %v2690_v53 }
 0x148   :  { %2065 = vst [vmem:[%s2974_s2 + $0x40] sm:$0xff] %v1941_v17   ;;  %2081 = vst [vmem:[%s2974_s2 + $0xc0] sm:$0xff] %v2021_v21   ;;  %v1480_v21 = vadd.f32 %v1479_v1, %v2624_v3  ;;  %v1616_v10 = vadd.f32 %v1615_v2, %v1553_v60  ;;  %v1556_v3 = vmul.f32 %v2646_v19, %v2646_v19 }
 0x149   :  { %v2721_v23 = vpop.f32.mrf.mxu0  ;;  %v2723_v24 = vpop.f32.mrf.mxu1  ;;  %v1560_v1 = vmul.f32 %v2701_v5, %v2701_v5 }
 0x14a   :  { %v1481_v15 = vadd.f32 %v1480_v21, %v2628_v7  ;;  %v1617_v16 = vadd.f32 %v1616_v10, %v1554_v57 }
 0x14b   :  { %v767_v33 = vpop.f32.mrf.mxu0  ;;  %v895_v34 = vpop.f32.mrf.mxu1 }
 0x14c   :  { %v1482_v37 = vadd.f32 %v1481_v15, %v2642_v13  ;;  %v1618_v7 = vadd.f32 %v1617_v16, %v1555_v27  ;;  %v1557_v33 = vmul.f32 %v2660_v29, %v2660_v29  ;;  %v1558_v13 = vmul.f32 %v2664_v35, %v2664_v35 }
 0x14d   :  { %v2731_v44 = vpop.f32.mrf.mxu0  ;;  %v2733_v45 = vpop.f32.mrf.mxu1 }
 0x14e   :  { %v1946_v41 = vpack.c.bf16 %v2731_v44, %v2721_v23  ;;  %v2026_v49 = vpack.c.bf16 %v2733_v45, %v2723_v24  ;;  %v1483_v40 = vadd.f32 %v1482_v37, %v2646_v19  ;;  %v1619_v43 = vadd.f32 %v1618_v7, %v1556_v3 }
 0x14f   :  { %v770_v55 = vpop.f32.mrf.mxu0  ;;  %v898_v56 = vpop.f32.mrf.mxu1 }
 0x150   :  { %2066 = vst [vmem:[%s2974_s2 + $0x48] sm:$0xff] %v1946_v41   ;;  %2082 = vst [vmem:[%s2974_s2 + $0xc8] sm:$0xff] %v2026_v49   ;;  %v1484_v49 = vadd.f32 %v1483_v40, %v2660_v29  ;;  %v1620_v50 = vadd.f32 %v1619_v43, %v1557_v33 }
 0x151   :  { %v2751_v63 = vpop.f32.mrf.mxu0  ;;  %v2753_v0 = vpop.f32.mrf.mxu1 }
 0x152   :  { %v1485_v59 = vadd.f32 %v1484_v49, %v2664_v35  ;;  %v1621_v60 = vadd.f32 %v1620_v50, %v1558_v13  ;;  %v1563_v3 = vmul.f32 %v2751_v63, %v2751_v63 }
 0x153   :  { %v775_v9 = vpop.f32.mrf.mxu0  ;;  %v903_v17 = vpop.f32.mrf.mxu1 }
 0x154   :  { %v1486_v29 = vadd.f32 %v1485_v59, %v2690_v53  ;;  %v1622_v35 = vadd.f32 %v1621_v60, %v1559_v47  ;;  %v1561_v9 = vmul.f32 %v2721_v23, %v2721_v23  ;;  %v1562_v53 = vmul.f32 %v2731_v44, %v2731_v44 }
 0x155   :  { %v2761_v11 = vpop.f32.mrf.mxu0  ;;  %v2763_v12 = vpop.f32.mrf.mxu1 }
 0x156   :  { %v1951_v61 = vpack.c.bf16 %v2761_v11, %v2751_v63  ;;  %v2031_v31 = vpack.c.bf16 %v2763_v12, %v2753_v0  ;;  %v1487_v10 = vadd.f32 %v1486_v29, %v2701_v5  ;;  %v1623_v27 = vadd.f32 %v1622_v35, %v1560_v1 }
 0x157   :  { %v778_v25 = vpop.f32.mrf.mxu0  ;;  %v906_v26 = vpop.f32.mrf.mxu1  ;;  %v1564_v40 = vmul.f32 %v2761_v11, %v2761_v11 }
 0x158   :  { %2067 = vst [vmem:[%s2974_s2 + $0x50] sm:$0xff] %v1951_v61   ;;  %2083 = vst [vmem:[%s2974_s2 + $0xd0] sm:$0xff] %v2031_v31   ;;  %v1488_v31 = vadd.f32 %v1487_v10, %v2721_v23  ;;  %v1624_v16 = vadd.f32 %v1623_v27, %v1561_v9 }
 0x159   :  { %v781_v34 = vpop.f32.mrf.mxu0  ;;  %v2781_v39 = vpop.f32.mrf.mxu1 }
 0x15a   :  { %v1489_v37 = vadd.f32 %v1488_v31, %v2731_v44  ;;  %v1625_v33 = vadd.f32 %v1624_v16, %v1562_v53 }
 0x15b   :  { %v783_v46 = vpop.f32.mrf.mxu0  ;;  %v911_v41 = vpop.f32.mrf.mxu1 }
 0x15c   :  { %v1490_v23 = vadd.f32 %v1489_v37, %v2751_v63  ;;  %v1626_v44 = vadd.f32 %v1625_v33, %v1563_v3  ;;  %v1565_v46 = vmul.f32 %v781_v34, %v781_v34 }
 0x15d   :  { %v784_v55 = vpop.f32.mrf.mxu0  ;;  %v2789_v56 = vpop.f32.mrf.mxu1 }
 0x15e   :  { %v1956_v51 = vpack.c.bf16 %v784_v55, %v781_v34  ;;  %v2036_v19 = vpack.c.bf16 %v2789_v56, %v2781_v39  ;;  %v1491_v50 = vadd.f32 %v1490_v23, %v2761_v11  ;;  %v1627_v47 = vadd.f32 %v1626_v44, %v1564_v40 }
 0x15f   :  { %v786_v2 = vpop.f32.mrf.mxu0  ;;  %v914_v57 = vpop.f32.mrf.mxu1  ;;  %v1566_v59 = vmul.f32 %v784_v55, %v784_v55 }
 0x160   :  { %2068 = vst [vmem:[%s2974_s2 + $0x58] sm:$0xff] %v1956_v51   ;;  %2084 = vst [vmem:[%s2974_s2 + $0xd8] sm:$0xff] %v2036_v19   ;;  %v1492_v63 = vadd.f32 %v1491_v50, %v781_v34  ;;  %v1628_v60 = vadd.f32 %v1627_v47, %v1565_v46 }
 0x161   :  { %v789_v17 = vpop.f32.mrf.mxu0  ;;  %v2805_v21 = vpop.f32.mrf.mxu1 }
 0x162   :  { %v1567_v1 = vmul.f32 %v789_v17, %v789_v17  ;;  %v1493_v29 = vadd.f32 %v1492_v63, %v784_v55  ;;  %v1629_v10 = vadd.f32 %v1628_v60, %v1566_v59 }
 0x163   :  { %v791_v15 = vpop.f32.mrf.mxu0  ;;  %v919_v61 = vpop.f32.mrf.mxu1 }
 0x164   :  { %v1494_v11 = vadd.f32 %v1493_v29, %v789_v17  ;;  %v1630_v34 = vadd.f32 %v1629_v10, %v1567_v1 }
 0x165   :  { %v792_v25 = vpop.f32.mrf.mxu0  ;;  %v2813_v26 = vpop.f32.mrf.mxu1 }
 0x166   :  { %v1961_v7 = vpack.c.bf16 %v792_v25, %v789_v17  ;;  %v2041_v5 = vpack.c.bf16 %v2813_v26, %v2805_v21  ;;  %v1568_v27 = vmul.f32 %v792_v25, %v792_v25  ;;  %v1495_v16 = vadd.f32 %v1494_v11, %v792_v25 }
 0x167   :  { %v794_v43 = vpop.f32.mrf.mxu0  ;;  %v922_v13 = vpop.f32.mrf.mxu1 }
 0x168   :  { %2069 = vst [vmem:[%s2974_s2 + $0x60] sm:$0xff] %v1961_v7   ;;  %2085 = vst [vmem:[%s2974_s2 + $0xe0] sm:$0xff] %v2041_v5   ;;  %v1631_v3 = vadd.f32 %v1630_v34, %v1568_v27 }
 0x169   :  { %v797_v41 = vpop.f32.mrf.mxu0  ;;  %v2827_v49 = vpop.f32.mrf.mxu1 }
 0x16a   :  { %v1569_v61 = vmul.f32 %v797_v41, %v797_v41  ;;  %v1496_v33 = vadd.f32 %v1495_v16, %v797_v41 }
 0x16b   :  { %v799_v51 = vpop.f32.mrf.mxu0  ;;  %v927_v19 = vpop.f32.mrf.mxu1 }
 0x16c   :  { %v1632_v17 = vadd.f32 %v1631_v3, %v1569_v61  ;;  %v1575_v3 = vmul.f32 %v2536_v18, %v2536_v18 }
 0x16d   :  { %v800_v2 = vpop.f32.mrf.mxu0  ;;  %v2830_v57 = vpop.f32.mrf.mxu1 }
 0x16e   :  { %v1966_v35 = vpack.c.bf16 %v800_v2, %v797_v41  ;;  %v2046_v9 = vpack.c.bf16 %v2830_v57, %v2827_v49  ;;  %v1570_v37 = vmul.f32 %v800_v2, %v800_v2  ;;  %v1497_v23 = vadd.f32 %v1496_v33, %v800_v2 }
 0x16f   :  { %v802_v53 = vpop.f32.mrf.mxu0  ;;  %v930_v15 = vpop.f32.mrf.mxu1 }
 0x170   :  { %2070 = vst [vmem:[%s2974_s2 + $0x68] sm:$0xff] %v1966_v35   ;;  %2086 = vst [vmem:[%s2974_s2 + $0xe8] sm:$0xff] %v2046_v9   ;;  %v1633_v50 = vadd.f32 %v1632_v17, %v1570_v37 }
 0x171   :  { %v805_v55 = vpop.f32.mrf.mxu0  ;;  %v2840_v31 = vpop.f32.mrf.mxu1 }
 0x172   :  { %v1571_v40 = vmul.f32 %v805_v55, %v805_v55  ;;  %v1498_v25 = vadd.f32 %v1497_v23, %v805_v55 }
 0x173   :  { %v807_v7 = vpop.f32.mrf.mxu0  ;;  %v935_v5 = vpop.f32.mrf.mxu1 }
 0x174   :  { %v1634_v41 = vadd.f32 %v1633_v50, %v1571_v40  ;;  %v1576_v5 = vmul.f32 %v2540_v22, %v2540_v22  ;;  %v1577_v40 = vmul.f32 %v2554_v28, %v2554_v28  ;;  %v1579_v50 = vmul.f32 %v2572_v38, %v2572_v38 }
 0x175   :  { %v808_v43 = vpop.f32.mrf.mxu0  ;;  %v2842_v13 = vpop.f32.mrf.mxu1 }
 0x176   :  { %v1971_v44 = vpack.c.bf16 %v808_v43, %v805_v55  ;;  %v2051_v46 = vpack.c.bf16 %v2842_v13, %v2840_v31  ;;  %v1572_v47 = vmul.f32 %v808_v43, %v808_v43  ;;  %v1499_v60 = vadd.f32 %v1498_v25, %v808_v43 }
 0x177   :  { %v810_v59 = vpop.f32.mrf.mxu0  ;;  %v938_v51 = vpop.f32.mrf.mxu1 }
 0x178   :  { %2071 = vst [vmem:[%s2974_s2 + $0x70] sm:$0xff] %v1971_v44   ;;  %2087 = vst [vmem:[%s2974_s2 + $0xf0] sm:$0xff] %v2051_v46   ;;  %v1635_v2 = vadd.f32 %v1634_v41, %v1572_v47 }
 0x179   :  { %v813_v19 = vpop.f32.mrf.mxu0  ;;  %v2852_v63 = vpop.f32.mrf.mxu1 }
 0x17a   :  { %v1573_v1 = vmul.f32 %v813_v19, %v813_v19  ;;  %v1500_v9 = vadd.f32 %v1499_v60, %v813_v19 }
 0x17b   :  { %v815_v29 = vpop.f32.mrf.mxu0  ;;  %v943_v35 = vpop.f32.mrf.mxu1 }
 0x17c   :  { %v1636_v10 = vadd.f32 %v1635_v2, %v1573_v1 }
 0x17d   :  { %v816_v27 = vpop.f32.mrf.mxu0  ;;  %v2854_v53 = vpop.f32.mrf.mxu1 }
 0x17e   :  { %v1976_v15 = vpack.c.bf16 %v816_v27, %v813_v19  ;;  %v1501_v11 = vadd.f32 %v1500_v9, %v816_v27  ;;  %v1574_v34 = vmul.f32 %v816_v27, %v816_v27  ;;  %v2056_v61 = vpack.c.bf16 %v2854_v53, %v2852_v63 }
 0x17f   :  { %v818_v55 = vpop.f32.mrf.mxu0  ;;  %v946_v16 = vpop.f32.mrf.mxu1 }
 0x180   :  { %2072 = vst [vmem:[%s2974_s2 + $0x78] sm:$0xff] %v1976_v15   ;;  %v1502_v37 = vadd.f32 %v1501_v11, %v2536_v18  ;;  %v1637_v7 = vadd.f32 %v1636_v10, %v1574_v34  ;;  %2088 = vst [vmem:[%s2974_s2 + $0xf8] sm:$0xff] %v2056_v61   ;;  %v1578_v18 = vmul.f32 %v2558_v32, %v2558_v32 }
 0x182   :  { %v1503_v33 = vadd.f32 %v1502_v37, %v2540_v22  ;;  %v1638_v17 = vadd.f32 %v1637_v7, %v1575_v3  ;;  %v1580_v22 = vmul.f32 %v2576_v42, %v2576_v42 }
 0x184   :  { %v1504_v43 = vadd.f32 %v1503_v33, %v2554_v28  ;;  %v1639_v23 = vadd.f32 %v1638_v17, %v1576_v5  ;;  %v1581_v28 = vmul.f32 %v2590_v48, %v2590_v48 }
 0x186   :  { %v1505_v44 = vadd.f32 %v1504_v43, %v2558_v32  ;;  %v1640_v46 = vadd.f32 %v1639_v23, %v1577_v40  ;;  %v1582_v32 = vmul.f32 %v2594_v52, %v2594_v52  ;;  %v1592_v40 = vmul.f32 %v2703_v6, %v2703_v6 }
 0x188   :  { %v1506_v47 = vadd.f32 %v1505_v44, %v2572_v38  ;;  %v1641_v59 = vadd.f32 %v1640_v46, %v1578_v18  ;;  %v1583_v38 = vmul.f32 %v2608_v58, %v2608_v58  ;;  %v1593_v18 = vmul.f32 %v2723_v24, %v2723_v24 }
 0x189   :  { %v1594_v46 = vmul.f32 %v2733_v45, %v2733_v45 }
 0x18a   :  { %v1507_v51 = vadd.f32 %v1506_v47, %v2576_v42  ;;  %v1642_v25 = vadd.f32 %v1641_v59, %v1579_v50  ;;  %v1584_v42 = vmul.f32 %v2612_v62, %v2612_v62  ;;  %v1595_v47 = vmul.f32 %v2753_v0, %v2753_v0 }
 0x18c   :  { %v1508_v41 = vadd.f32 %v1507_v51, %v2590_v48  ;;  %v1643_v19 = vadd.f32 %v1642_v25, %v1580_v22  ;;  %v1585_v48 = vmul.f32 %v2626_v4, %v2626_v4  ;;  %v1596_v22 = vmul.f32 %v2763_v12, %v2763_v12 }
 0x18d   :  { %v1597_v25 = vmul.f32 %v2781_v39, %v2781_v39 }
 0x18e   :  { %v1509_v60 = vadd.f32 %v1508_v41, %v2594_v52  ;;  %v1644_v1 = vadd.f32 %v1643_v19, %v1581_v28  ;;  %v1586_v52 = vmul.f32 %v2630_v8, %v2630_v8  ;;  %v1598_v41 = vmul.f32 %v2789_v56, %v2789_v56 }
 0x190   :  { %v1645_v2 = vadd.f32 %v1644_v1, %v1582_v32  ;;  %v1510_v29 = vadd.f32 %v1509_v60, %v2608_v58  ;;  %v1587_v58 = vmul.f32 %v2644_v14, %v2644_v14  ;;  %v1599_v32 = vmul.f32 %v2805_v21, %v2805_v21 }
 0x191   :  { %v1600_v1 = vmul.f32 %v2813_v26, %v2813_v26 }
 0x192   :  { %v1511_v35 = vadd.f32 %v1510_v29, %v2612_v62  ;;  %v1646_v9 = vadd.f32 %v1645_v2, %v1583_v38  ;;  %v1588_v62 = vmul.f32 %v2648_v20, %v2648_v20  ;;  %v1601_v2 = vmul.f32 %v2827_v49, %v2827_v49 }
 0x194   :  { %v1512_v10 = vadd.f32 %v1511_v35, %v2626_v4  ;;  %v1647_v27 = vadd.f32 %v1646_v9, %v1584_v42  ;;  %v1589_v4 = vmul.f32 %v2662_v30, %v2662_v30  ;;  %v1602_v42 = vmul.f32 %v2830_v57, %v2830_v57 }
 0x195   :  { %v1603_v9 = vmul.f32 %v2840_v31, %v2840_v31 }
 0x196   :  { %v1513_v15 = vadd.f32 %v1512_v10, %v2630_v8  ;;  %v1648_v11 = vadd.f32 %v1647_v27, %v1585_v48  ;;  %v1590_v8 = vmul.f32 %v2666_v36, %v2666_v36  ;;  %v1604_v10 = vmul.f32 %v2842_v13, %v2842_v13 }
 0x198   :  { %v1514_v34 = vadd.f32 %v1513_v15, %v2644_v14  ;;  %v1649_v61 = vadd.f32 %v1648_v11, %v1586_v52  ;;  %v1591_v14 = vmul.f32 %v2692_v54, %v2692_v54  ;;  %v1605_v52 = vmul.f32 %v2852_v63, %v2852_v63 }
 0x199   :  { %v1606_v11 = vmul.f32 %v2854_v53, %v2854_v53 }
 0x19a   :  { %v1515_v55 = vadd.f32 %v1514_v34, %v2648_v20  ;;  %v1650_v16 = vadd.f32 %v1649_v61, %v1587_v58 }
 0x19c   :  { %v1516_v3 = vadd.f32 %v1515_v55, %v2662_v30  ;;  %v1651_v37 = vadd.f32 %v1650_v16, %v1588_v62 }
 0x19e   :  { %v1517_v7 = vadd.f32 %v1516_v3, %v2666_v36  ;;  %v1652_v5 = vadd.f32 %v1651_v37, %v1589_v4 }
 0x1a0   :  { %v1518_v33 = vadd.f32 %v1517_v7, %v2692_v54  ;;  %v1653_v17 = vadd.f32 %v1652_v5, %v1590_v8 }
 0x1a2   :  { %v1519_v20 = vadd.f32 %v1518_v33, %v2703_v6  ;;  %v1654_v43 = vadd.f32 %v1653_v17, %v1591_v14 }
 0x1a4   :  { %v1655_v30 = vadd.f32 %v1654_v43, %v1592_v40  ;;  %v1520_v23 = vadd.f32 %v1519_v20, %v2723_v24 }
 0x1a6   :  { %v1656_v36 = vadd.f32 %v1655_v30, %v1593_v18  ;;  %v1521_v44 = vadd.f32 %v1520_v23, %v2733_v45 }
 0x1a8   :  { %v1657_v54 = vadd.f32 %v1656_v36, %v1594_v46  ;;  %v1522_v50 = vadd.f32 %v1521_v44, %v2753_v0 }
 0x1aa   :  { %v1658_v6 = vadd.f32 %v1657_v54, %v1595_v47  ;;  %v1523_v59 = vadd.f32 %v1522_v50, %v2763_v12 }
 0x1ac   :  { %v1659_v51 = vadd.f32 %v1658_v6, %v1596_v22  ;;  %v1524_v24 = vadd.f32 %v1523_v59, %v2781_v39 }
 0x1ae   :  { %v1660_v28 = vadd.f32 %v1659_v51, %v1597_v25  ;;  %v1525_v45 = vadd.f32 %v1524_v24, %v2789_v56 }
 0x1b0   :  { %v1661_v19 = vadd.f32 %v1660_v28, %v1598_v41  ;;  %v1526_v0 = vadd.f32 %v1525_v45, %v2805_v21 }
 0x1b2   :  { %v1662_v60 = vadd.f32 %v1661_v19, %v1599_v32  ;;  %v1527_v12 = vadd.f32 %v1526_v0, %v2813_v26 }
 0x1b4   :  { %v1663_v38 = vadd.f32 %v1662_v60, %v1600_v1  ;;  %v1528_v39 = vadd.f32 %v1527_v12, %v2827_v49 }
 0x1b6   :  { %v1664_v29 = vadd.f32 %v1663_v38, %v1601_v2  ;;  %v1529_v56 = vadd.f32 %v1528_v39, %v2830_v57 }
 0x1b8   :  { %v1665_v35 = vadd.f32 %v1664_v29, %v1602_v42  ;;  %v1530_v21 = vadd.f32 %v1529_v56, %v2840_v31 }
 0x1ba   :  { %v1666_v48 = vadd.f32 %v1665_v35, %v1603_v9  ;;  %v1531_v26 = vadd.f32 %v1530_v21, %v2842_v13 }
 0x1bc   :  { %v1667_v27 = vadd.f32 %v1666_v48, %v1604_v10  ;;  %v1532_v49 = vadd.f32 %v1531_v26, %v2852_v63  ;;  %v1470_v63 = vld [vmem:[%s2975_s3] sm:$0x1] }
 0x1be   :  { %v1668_v15 = vadd.f32 %v1667_v27, %v1605_v52  ;;  %v1533_v57 = vadd.f32 %v1532_v49, %v2854_v53  ;;  %v1542_v53 = vld [vmem:[%s2976_s4] sm:$0x1] }
 0x1c0   :  { %v1534_v58 = vrot.slane %v1533_v57, 4  ;;  %v1669_v31 = vadd.f32 %v1668_v15, %v1606_v11 }
 0x1c2   :  { %v1535_v34 = vadd.f32 %v1534_v58, %v1533_v57  ;;  %v1670_v61 = vrot.slane %v1669_v31, 4 }
 0x1c4   :  { %v1536_v62 = vrot.slane %v1535_v34, 2  ;;  %v1671_v55 = vadd.f32 %v1670_v61, %v1669_v31 }
 0x1c6   :  { %v1537_v16 = vadd.f32 %v1536_v62, %v1535_v34  ;;  %v1672_v13 = vrot.slane %v1671_v55, 2 }
 0x1c8   :  { %v1538_v4 = vrot.slane %v1537_v16, 1  ;;  %v1673_v3 = vadd.f32 %v1672_v13, %v1671_v55 }
 0x1ca   :  { %v1539_v37 = vadd.f32 %v1538_v4, %v1537_v16  ;;  %v1674_v8 = vrot.slane %v1673_v3, 1 }
 0x1cc   :  { %v1540_v7 = vadd.f32 %v1539_v37, %v1470_v63  ;;  %v1675_v5 = vadd.f32 %v1674_v8, %v1673_v3 }
 0x1ce   :  { %1541 = vst [vmem:[%s2975_s3] sm:$0x1] %v1540_v7  ;;  %v1676_v14 = vadd.f32 %v1675_v5, %v1542_v53 }
 0x1d0   :  { %1677 = vst [vmem:[%s2976_s4] sm:$0x1] %v1676_v14 }

// kernel: forward.41
= control target key start
LH: loop header
LB: loop body
LE: loop exit
PB: predicated region body
PF: predicated region fallthrough
CT: control target
= control target key end

     0   :  { %s885_s0 = inlined_call_operand.vmem [shape: bf16[128,128], index: 0, kind: input, shape index: {}]   ;;  %s886_s1 = inlined_call_operand.vmem [shape: bf16[128,128], index: 1, kind: input, shape index: {}]   ;;  %s887_s2 = inlined_call_operand.vmem [shape: bf16[128,128], index: 2, kind: input, shape index: {}]   ;;  %s888_s3 = inlined_call_operand.vmem [shape: bf16[128,128], index: 3, kind: input, shape index: {}]   ;;  %s889_s4 = inlined_call_operand.vmem [shape: bf16[128,128], index: 4, kind: input, shape index: {}]   ;;  %s890_s5 = inlined_call_operand.vmem [shape: bf16[128,128], index: 5, kind: input, shape index: {}]   ;;  %s891_s6 = inlined_call_operand.vmem [shape: bf16[128,128], index: 6, kind: input, shape index: {}]   ;;  %s892_s7 = inlined_call_operand.vmem [shape: bf16[128,128], index: 7, kind: input, shape index: {}]   ;;  %s893_s8 = inlined_call_operand.vmem [shape: bf16[128,128], index: 8, kind: input, shape index: {}]   ;;  %s894_s9 = inlined_call_operand.vmem [shape: bf16[128,128], index: 9, kind: output, shape index: {}]  }
   0x1   :  { %v32_v0 = vld [vmem:[%s885_s0] sm:$0xf]  ;;  %v33_v1 = vld [vmem:[%s885_s0 + $0x4] sm:$0xf]  ;;  %v34_v18 = vld [vmem:[%s885_s0 + $0x8] sm:$0xf] }
   0x2   :  { %v48_v2 = vld [vmem:[%s886_s1] sm:$0xf]  ;;  %v49_v3 = vld [vmem:[%s886_s1 + $0x4] sm:$0xf]  ;;  %v35_v19 = vld [vmem:[%s885_s0 + $0xc] sm:$0xf] }
   0x3   :  { %v64_v4 = vmax.bf16 %v48_v2, %v32_v0  ;;  %v80_v5 = vld [vmem:[%s887_s2] sm:$0xf]  ;;  %v81_v6 = vld [vmem:[%s887_s2 + $0x4] sm:$0xf]  ;;  %v65_v7 = vmax.bf16 %v49_v3, %v33_v1  ;;  %v50_v20 = vld [vmem:[%s886_s1 + $0x8] sm:$0xf] }
   0x4   :  { %v112_v8 = vld [vmem:[%s888_s3] sm:$0xf]  ;;  %v113_v10 = vld [vmem:[%s888_s3 + $0x4] sm:$0xf]  ;;  %v51_v22 = vld [vmem:[%s886_s1 + $0xc] sm:$0xf]  ;;  %v66_v23 = vmax.bf16 %v50_v20, %v34_v18 }
   0x5   :  { %v96_v9 = vmax.bf16 %v80_v5, %v64_v4  ;;  %v97_v11 = vmax.bf16 %v81_v6, %v65_v7  ;;  %v144_v12 = vld [vmem:[%s889_s4] sm:$0xf]  ;;  %v145_v14 = vld [vmem:[%s889_s4 + $0x4] sm:$0xf]  ;;  %v82_v24 = vld [vmem:[%s887_s2 + $0x8] sm:$0xf]  ;;  %v67_v28 = vmax.bf16 %v51_v22, %v35_v19 }
   0x6   :  { %v176_v15 = vld [vmem:[%s890_s5] sm:$0xf]  ;;  %v177_v16 = vld [vmem:[%s890_s5 + $0x4] sm:$0xf]  ;;  %v83_v25 = vld [vmem:[%s887_s2 + $0xc] sm:$0xf]  ;;  %v98_v33 = vmax.bf16 %v82_v24, %v66_v23 }
   0x7   :  { %v128_v13 = vmax.bf16 %v112_v8, %v96_v9  ;;  %v129_v17 = vmax.bf16 %v113_v10, %v97_v11  ;;  %v208_v27 = vld [vmem:[%s891_s6] sm:$0xf]  ;;  %v114_v29 = vld [vmem:[%s888_s3 + $0x8] sm:$0xf]  ;;  %v209_v31 = vld [vmem:[%s891_s6 + $0x4] sm:$0xf]  ;;  %v99_v38 = vmax.bf16 %v83_v25, %v67_v28 }
   0x8   :  { %v240_v32 = vld [vmem:[%s892_s7] sm:$0xf]  ;;  %v115_v34 = vld [vmem:[%s888_s3 + $0xc] sm:$0xf]  ;;  %v241_v36 = vld [vmem:[%s892_s7 + $0x4] sm:$0xf]  ;;  %v130_v42 = vmax.bf16 %v114_v29, %v98_v33 }
   0x9   :  { %v160_v21 = vmax.bf16 %v144_v12, %v128_v13  ;;  %v161_v26 = vmax.bf16 %v145_v14, %v129_v17  ;;  %v272_v37 = vld [vmem:[%s893_s8] sm:$0xf]  ;;  %v146_v39 = vld [vmem:[%s889_s4 + $0x8] sm:$0xf]  ;;  %v273_v41 = vld [vmem:[%s893_s8 + $0x4] sm:$0xf]  ;;  %v131_v47 = vmax.bf16 %v115_v34, %v99_v38 }
   0xa   :  { %v147_v43 = vld [vmem:[%s889_s4 + $0xc] sm:$0xf]  ;;  %v178_v44 = vld [vmem:[%s890_s5 + $0x8] sm:$0xf]  ;;  %v36_v48 = vld [vmem:[%s885_s0 + $0x10] sm:$0xf]  ;;  %v162_v52 = vmax.bf16 %v146_v39, %v130_v42 }
   0xb   :  { %v192_v30 = vmax.bf16 %v176_v15, %v160_v21  ;;  %v193_v35 = vmax.bf16 %v177_v16, %v161_v26  ;;  %v179_v45 = vld [vmem:[%s890_s5 + $0xc] sm:$0xf]  ;;  %v37_v49 = vld [vmem:[%s885_s0 + $0x14] sm:$0xf]  ;;  %v52_v50 = vld [vmem:[%s886_s1 + $0x10] sm:$0xf]  ;;  %v163_v58 = vmax.bf16 %v147_v43, %v131_v47 }
   0xc   :  { %v53_v53 = vld [vmem:[%s886_s1 + $0x14] sm:$0xf]  ;;  %v68_v54 = vmax.bf16 %v52_v50, %v36_v48  ;;  %v84_v55 = vld [vmem:[%s887_s2 + $0x10] sm:$0xf]  ;;  %v210_v59 = vld [vmem:[%s891_s6 + $0x8] sm:$0xf]  ;;  %v194_v63 = vmax.bf16 %v178_v44, %v162_v52 }
   0xd   :  { %v224_v40 = vmax.bf16 %v208_v27, %v192_v30  ;;  %v225_v46 = vmax.bf16 %v209_v31, %v193_v35  ;;  %v85_v56 = vld [vmem:[%s887_s2 + $0x14] sm:$0xf]  ;;  %v69_v60 = vmax.bf16 %v53_v53, %v37_v49  ;;  %v116_v61 = vld [vmem:[%s888_s3 + $0x10] sm:$0xf]  ;;  %v211_v0 = vld [vmem:[%s891_s6 + $0xc] sm:$0xf]  ;;  %v195_v5 = vmax.bf16 %v179_v45, %v163_v58 }
   0xe   :  { %v242_v1 = vld [vmem:[%s892_s7 + $0x8] sm:$0xf]  ;;  %v100_v2 = vmax.bf16 %v84_v55, %v68_v54  ;;  %v117_v3 = vld [vmem:[%s888_s3 + $0x14] sm:$0xf]  ;;  %v243_v6 = vld [vmem:[%s892_s7 + $0xc] sm:$0xf]  ;;  %v226_v10 = vmax.bf16 %v210_v59, %v194_v63 }
   0xf   :  { %v256_v51 = vmax.bf16 %v240_v32, %v224_v40  ;;  %v257_v57 = vmax.bf16 %v241_v36, %v225_v46  ;;  %v274_v7 = vld [vmem:[%s893_s8 + $0x8] sm:$0xf]  ;;  %v101_v8 = vmax.bf16 %v85_v56, %v69_v60  ;;  %v148_v9 = vld [vmem:[%s889_s4 + $0x10] sm:$0xf]  ;;  %v275_v11 = vld [vmem:[%s893_s8 + $0xc] sm:$0xf]  ;;  %v227_v17 = vmax.bf16 %v211_v0, %v195_v5 }
  0x10   :  { %v132_v12 = vmax.bf16 %v116_v61, %v100_v2  ;;  %v149_v13 = vld [vmem:[%s889_s4 + $0x14] sm:$0xf]  ;;  %v180_v14 = vld [vmem:[%s890_s5 + $0x10] sm:$0xf]  ;;  %v38_v19 = vld [vmem:[%s885_s0 + $0x18] sm:$0xf]  ;;  %v258_v22 = vmax.bf16 %v242_v1, %v226_v10 }
  0x11   :  { %v288_v62 = vmax.bf16 %v272_v37, %v256_v51  ;;  %v289_v4 = vmax.bf16 %v273_v41, %v257_v57  ;;  %v181_v15 = vld [vmem:[%s890_s5 + $0x14] sm:$0xf]  ;;  %v133_v18 = vmax.bf16 %v117_v3, %v101_v8  ;;  %v39_v20 = vld [vmem:[%s885_s0 + $0x1c] sm:$0xf]  ;;  %v54_v21 = vld [vmem:[%s886_s1 + $0x18] sm:$0xf]  ;;  %v259_v28 = vmax.bf16 %v243_v6, %v227_v17 }
  0x12   :  { %v164_v23 = vmax.bf16 %v148_v9, %v132_v12  ;;  %v55_v24 = vld [vmem:[%s886_s1 + $0x1c] sm:$0xf]  ;;  %v70_v25 = vmax.bf16 %v54_v21, %v38_v19  ;;  %v86_v26 = vld [vmem:[%s887_s2 + $0x18] sm:$0xf]  ;;  %v212_v30 = vld [vmem:[%s891_s6 + $0x10] sm:$0xf]  ;;  %v290_v33 = vmax.bf16 %v274_v7, %v258_v22 }
  0x13   :  { %v364_v16 = vcombine.low %v288_v62, %v289_v4  ;;  %v87_v27 = vld [vmem:[%s887_s2 + $0x1c] sm:$0xf]  ;;  %v165_v29 = vmax.bf16 %v149_v13, %v133_v18  ;;  %v71_v31 = vmax.bf16 %v55_v24, %v39_v20  ;;  %v118_v32 = vld [vmem:[%s888_s3 + $0x18] sm:$0xf]  ;;  %v213_v35 = vld [vmem:[%s891_s6 + $0x14] sm:$0xf]  ;;  %v291_v39 = vmax.bf16 %v275_v11, %v259_v28 }
  0x14   :  { %v196_v34 = vmax.bf16 %v180_v14, %v164_v23  ;;  %v244_v36 = vld [vmem:[%s892_s7 + $0x10] sm:$0xf]  ;;  %v102_v37 = vmax.bf16 %v86_v26, %v70_v25  ;;  %v119_v38 = vld [vmem:[%s888_s3 + $0x1c] sm:$0xf]  ;;  %v245_v41 = vld [vmem:[%s892_s7 + $0x14] sm:$0xf] }
  0x15   :  { %328 = vst [vmem:[%s894_s9] sm:$0xff] %v364_v16   ;;  %v197_v40 = vmax.bf16 %v181_v15, %v165_v29  ;;  %v276_v42 = vld [vmem:[%s893_s8 + $0x10] sm:$0xf]  ;;  %v103_v43 = vmax.bf16 %v87_v27, %v71_v31  ;;  %v150_v44 = vld [vmem:[%s889_s4 + $0x18] sm:$0xf]  ;;  %v277_v46 = vld [vmem:[%s893_s8 + $0x14] sm:$0xf]  ;;  %v365_v51 = vcombine.low %v290_v33, %v291_v39 }
  0x16   :  { %v228_v45 = vmax.bf16 %v212_v30, %v196_v34  ;;  %v134_v47 = vmax.bf16 %v118_v32, %v102_v37  ;;  %v151_v48 = vld [vmem:[%s889_s4 + $0x1c] sm:$0xf]  ;;  %v182_v49 = vld [vmem:[%s890_s5 + $0x18] sm:$0xf]  ;;  %v40_v54 = vld [vmem:[%s885_s0 + $0x20] sm:$0xf] }
  0x17   :  { %v183_v50 = vld [vmem:[%s890_s5 + $0x1c] sm:$0xf]  ;;  %v229_v52 = vmax.bf16 %v213_v35, %v197_v40  ;;  %v135_v53 = vmax.bf16 %v119_v38, %v103_v43  ;;  %v41_v55 = vld [vmem:[%s885_s0 + $0x24] sm:$0xf]  ;;  %v56_v56 = vld [vmem:[%s886_s1 + $0x20] sm:$0xf] }
  0x18   :  { %v260_v57 = vmax.bf16 %v244_v36, %v228_v45  ;;  %v166_v58 = vmax.bf16 %v150_v44, %v134_v47  ;;  %v57_v59 = vld [vmem:[%s886_s1 + $0x24] sm:$0xf]  ;;  %v72_v60 = vmax.bf16 %v56_v56, %v40_v54  ;;  %v88_v61 = vld [vmem:[%s887_s2 + $0x20] sm:$0xf]  ;;  %366 = vst [vmem:[%s894_s9 + $0x8] sm:$0xff] %v365_v51  }
  0x19   :  { %v89_v62 = vld [vmem:[%s887_s2 + $0x24] sm:$0xf]  ;;  %v261_v63 = vmax.bf16 %v245_v41, %v229_v52  ;;  %v167_v0 = vmax.bf16 %v151_v48, %v135_v53  ;;  %v214_v1 = vld [vmem:[%s891_s6 + $0x18] sm:$0xf]  ;;  %v73_v2 = vmax.bf16 %v57_v59, %v41_v55  ;;  %v120_v3 = vld [vmem:[%s888_s3 + $0x20] sm:$0xf] }
  0x1a   :  { %v292_v4 = vmax.bf16 %v276_v42, %v260_v57  ;;  %v198_v5 = vmax.bf16 %v182_v49, %v166_v58  ;;  %v215_v6 = vld [vmem:[%s891_s6 + $0x1c] sm:$0xf]  ;;  %v246_v7 = vld [vmem:[%s892_s7 + $0x18] sm:$0xf]  ;;  %v104_v8 = vmax.bf16 %v88_v61, %v72_v60  ;;  %v121_v9 = vld [vmem:[%s888_s3 + $0x24] sm:$0xf] }
  0x1b   :  { %v293_v10 = vmax.bf16 %v277_v46, %v261_v63  ;;  %v199_v11 = vmax.bf16 %v183_v50, %v167_v0  ;;  %v247_v12 = vld [vmem:[%s892_s7 + $0x1c] sm:$0xf]  ;;  %v278_v13 = vld [vmem:[%s893_s8 + $0x18] sm:$0xf]  ;;  %v105_v14 = vmax.bf16 %v89_v62, %v73_v2  ;;  %v152_v15 = vld [vmem:[%s889_s4 + $0x20] sm:$0xf] }
  0x1c   :  { %v230_v16 = vmax.bf16 %v214_v1, %v198_v5  ;;  %v279_v17 = vld [vmem:[%s893_s8 + $0x1c] sm:$0xf]  ;;  %v136_v18 = vmax.bf16 %v120_v3, %v104_v8  ;;  %v153_v19 = vld [vmem:[%s889_s4 + $0x24] sm:$0xf]  ;;  %v184_v20 = vld [vmem:[%s890_s5 + $0x20] sm:$0xf] }
  0x1d   :  { %v185_v21 = vld [vmem:[%s890_s5 + $0x24] sm:$0xf]  ;;  %v367_v22 = vcombine.low %v292_v4, %v293_v10  ;;  %v231_v23 = vmax.bf16 %v215_v6, %v199_v11  ;;  %v137_v24 = vmax.bf16 %v121_v9, %v105_v14  ;;  %v42_v25 = vld [vmem:[%s885_s0 + $0x28] sm:$0xf]  ;;  %v43_v26 = vld [vmem:[%s885_s0 + $0x2c] sm:$0xf] }
  0x1e   :  { %v58_v27 = vld [vmem:[%s886_s1 + $0x28] sm:$0xf]  ;;  %v262_v28 = vmax.bf16 %v246_v7, %v230_v16  ;;  %v168_v29 = vmax.bf16 %v152_v15, %v136_v18  ;;  %v59_v30 = vld [vmem:[%s886_s1 + $0x2c] sm:$0xf]  ;;  %v216_v36 = vld [vmem:[%s891_s6 + $0x20] sm:$0xf] }
  0x1f   :  { %v74_v31 = vmax.bf16 %v58_v27, %v42_v25  ;;  %v90_v32 = vld [vmem:[%s887_s2 + $0x28] sm:$0xf]  ;;  %v91_v33 = vld [vmem:[%s887_s2 + $0x2c] sm:$0xf]  ;;  %368 = vst [vmem:[%s894_s9 + $0x10] sm:$0xff] %v367_v22   ;;  %v263_v34 = vmax.bf16 %v247_v12, %v231_v23  ;;  %v169_v35 = vmax.bf16 %v153_v19, %v137_v24  ;;  %v75_v37 = vmax.bf16 %v59_v30, %v43_v26 }
  0x20   :  { %v122_v38 = vld [vmem:[%s888_s3 + $0x28] sm:$0xf]  ;;  %v294_v39 = vmax.bf16 %v278_v13, %v262_v28  ;;  %v200_v40 = vmax.bf16 %v184_v20, %v168_v29  ;;  %v217_v41 = vld [vmem:[%s891_s6 + $0x24] sm:$0xf]  ;;  %v248_v42 = vld [vmem:[%s892_s7 + $0x20] sm:$0xf] }
  0x21   :  { %v106_v43 = vmax.bf16 %v90_v32, %v74_v31  ;;  %v123_v44 = vld [vmem:[%s888_s3 + $0x2c] sm:$0xf]  ;;  %v295_v45 = vmax.bf16 %v279_v17, %v263_v34  ;;  %v201_v46 = vmax.bf16 %v185_v21, %v169_v35  ;;  %v249_v47 = vld [vmem:[%s892_s7 + $0x24] sm:$0xf]  ;;  %v280_v48 = vld [vmem:[%s893_s8 + $0x20] sm:$0xf]  ;;  %v107_v49 = vmax.bf16 %v91_v33, %v75_v37 }
  0x22   :  { %v154_v50 = vld [vmem:[%s889_s4 + $0x28] sm:$0xf]  ;;  %v232_v51 = vmax.bf16 %v216_v36, %v200_v40  ;;  %v281_v52 = vld [vmem:[%s893_s8 + $0x24] sm:$0xf]  ;;  %v155_v54 = vld [vmem:[%s889_s4 + $0x2c] sm:$0xf] }
  0x23   :  { %v138_v53 = vmax.bf16 %v122_v38, %v106_v43  ;;  %v186_v55 = vld [vmem:[%s890_s5 + $0x28] sm:$0xf]  ;;  %v187_v56 = vld [vmem:[%s890_s5 + $0x2c] sm:$0xf]  ;;  %v369_v57 = vcombine.low %v294_v39, %v295_v45  ;;  %v233_v58 = vmax.bf16 %v217_v41, %v201_v46  ;;  %v139_v59 = vmax.bf16 %v123_v44, %v107_v49  ;;  %v44_v60 = vld [vmem:[%s885_s0 + $0x30] sm:$0xf] }
  0x24   :  { %v45_v61 = vld [vmem:[%s885_s0 + $0x34] sm:$0xf]  ;;  %v60_v62 = vld [vmem:[%s886_s1 + $0x30] sm:$0xf]  ;;  %v264_v63 = vmax.bf16 %v248_v42, %v232_v51  ;;  %v218_v7 = vld [vmem:[%s891_s6 + $0x28] sm:$0xf] }
  0x25   :  { %v170_v0 = vmax.bf16 %v154_v50, %v138_v53  ;;  %v61_v1 = vld [vmem:[%s886_s1 + $0x34] sm:$0xf]  ;;  %v76_v2 = vmax.bf16 %v60_v62, %v44_v60  ;;  %v92_v3 = vld [vmem:[%s887_s2 + $0x30] sm:$0xf]  ;;  %370 = vst [vmem:[%s894_s9 + $0x18] sm:$0xff] %v369_v57   ;;  %v265_v5 = vmax.bf16 %v249_v47, %v233_v58  ;;  %v171_v6 = vmax.bf16 %v155_v54, %v139_v59 }
  0x26   :  { %v93_v4 = vld [vmem:[%s887_s2 + $0x34] sm:$0xf]  ;;  %v77_v8 = vmax.bf16 %v61_v1, %v45_v61  ;;  %v124_v9 = vld [vmem:[%s888_s3 + $0x30] sm:$0xf]  ;;  %v296_v10 = vmax.bf16 %v280_v48, %v264_v63  ;;  %v219_v12 = vld [vmem:[%s891_s6 + $0x2c] sm:$0xf] }
  0x27   :  { %v202_v11 = vmax.bf16 %v186_v55, %v170_v0  ;;  %v250_v13 = vld [vmem:[%s892_s7 + $0x28] sm:$0xf]  ;;  %v108_v14 = vmax.bf16 %v92_v3, %v76_v2  ;;  %v125_v15 = vld [vmem:[%s888_s3 + $0x34] sm:$0xf]  ;;  %v297_v16 = vmax.bf16 %v281_v52, %v265_v5  ;;  %v203_v17 = vmax.bf16 %v187_v56, %v171_v6  ;;  %v251_v18 = vld [vmem:[%s892_s7 + $0x2c] sm:$0xf] }
  0x28   :  { %v282_v19 = vld [vmem:[%s893_s8 + $0x28] sm:$0xf]  ;;  %v109_v20 = vmax.bf16 %v93_v4, %v77_v8  ;;  %v156_v21 = vld [vmem:[%s889_s4 + $0x30] sm:$0xf]  ;;  %v283_v23 = vld [vmem:[%s893_s8 + $0x2c] sm:$0xf] }
  0x29   :  { %v234_v22 = vmax.bf16 %v218_v7, %v202_v11  ;;  %v140_v24 = vmax.bf16 %v124_v9, %v108_v14  ;;  %v157_v25 = vld [vmem:[%s889_s4 + $0x34] sm:$0xf]  ;;  %v188_v26 = vld [vmem:[%s890_s5 + $0x30] sm:$0xf]  ;;  %v371_v28 = vcombine.low %v296_v10, %v297_v16  ;;  %v235_v29 = vmax.bf16 %v219_v12, %v203_v17  ;;  %v46_v31 = vld [vmem:[%s885_s0 + $0x38] sm:$0xf] }
  0x2a   :  { %v189_v27 = vld [vmem:[%s890_s5 + $0x34] sm:$0xf]  ;;  %v141_v30 = vmax.bf16 %v125_v15, %v109_v20  ;;  %v47_v32 = vld [vmem:[%s885_s0 + $0x3c] sm:$0xf]  ;;  %v62_v33 = vld [vmem:[%s886_s1 + $0x38] sm:$0xf] }
  0x2b   :  { %v266_v34 = vmax.bf16 %v250_v13, %v234_v22  ;;  %v172_v35 = vmax.bf16 %v156_v21, %v140_v24  ;;  %v63_v36 = vld [vmem:[%s886_s1 + $0x3c] sm:$0xf]  ;;  %v78_v37 = vmax.bf16 %v62_v33, %v46_v31  ;;  %v94_v38 = vld [vmem:[%s887_s2 + $0x38] sm:$0xf]  ;;  %372 = vst [vmem:[%s894_s9 + $0x20] sm:$0xff] %v371_v28   ;;  %v267_v40 = vmax.bf16 %v251_v18, %v235_v29 }
  0x2c   :  { %v95_v39 = vld [vmem:[%s887_s2 + $0x3c] sm:$0xf]  ;;  %v173_v41 = vmax.bf16 %v157_v25, %v141_v30  ;;  %v220_v42 = vld [vmem:[%s891_s6 + $0x30] sm:$0xf]  ;;  %v79_v43 = vmax.bf16 %v63_v36, %v47_v32  ;;  %v126_v44 = vld [vmem:[%s888_s3 + $0x38] sm:$0xf] }
  0x2d   :  { %v298_v45 = vmax.bf16 %v282_v19, %v266_v34  ;;  %v204_v46 = vmax.bf16 %v188_v26, %v172_v35  ;;  %v221_v47 = vld [vmem:[%s891_s6 + $0x34] sm:$0xf]  ;;  %v110_v48 = vmax.bf16 %v94_v38, %v78_v37  ;;  %v127_v49 = vld [vmem:[%s888_s3 + $0x3c] sm:$0xf]  ;;  %v299_v50 = vmax.bf16 %v283_v23, %v267_v40  ;;  %v252_v52 = vld [vmem:[%s892_s7 + $0x30] sm:$0xf] }
  0x2e   :  { %v205_v51 = vmax.bf16 %v189_v27, %v173_v41  ;;  %v111_v53 = vmax.bf16 %v95_v39, %v79_v43  ;;  %v158_v54 = vld [vmem:[%s889_s4 + $0x38] sm:$0xf]  ;;  %v253_v56 = vld [vmem:[%s892_s7 + $0x34] sm:$0xf]  ;;  %v159_v58 = vld [vmem:[%s889_s4 + $0x3c] sm:$0xf] }
  0x2f   :  { %v236_v55 = vmax.bf16 %v220_v42, %v204_v46  ;;  %v142_v57 = vmax.bf16 %v126_v44, %v110_v48  ;;  %v373_v59 = vcombine.low %v298_v45, %v299_v50  ;;  %v284_v61 = vld [vmem:[%s893_s8 + $0x30] sm:$0xf]  ;;  %v190_v63 = vld [vmem:[%s890_s5 + $0x38] sm:$0xf]  ;;  %v285_v1 = vld [vmem:[%s893_s8 + $0x34] sm:$0xf] }
  0x30   :  { %v237_v60 = vmax.bf16 %v221_v47, %v205_v51  ;;  %v143_v62 = vmax.bf16 %v127_v49, %v111_v53  ;;  %v191_v3 = vld [vmem:[%s890_s5 + $0x3c] sm:$0xf]  ;;  %v222_v6 = vld [vmem:[%s891_s6 + $0x38] sm:$0xf] }
  0x31   :  { %v268_v0 = vmax.bf16 %v252_v52, %v236_v55  ;;  %v174_v2 = vmax.bf16 %v158_v54, %v142_v57  ;;  %374 = vst [vmem:[%s894_s9 + $0x28] sm:$0xff] %v373_v59   ;;  %v223_v9 = vld [vmem:[%s891_s6 + $0x3c] sm:$0xf]  ;;  %v254_v12 = vld [vmem:[%s892_s7 + $0x38] sm:$0xf] }
  0x32   :  { %v269_v4 = vmax.bf16 %v253_v56, %v237_v60  ;;  %v175_v5 = vmax.bf16 %v159_v58, %v143_v62  ;;  %v255_v14 = vld [vmem:[%s892_s7 + $0x3c] sm:$0xf]  ;;  %v286_v17 = vld [vmem:[%s893_s8 + $0x38] sm:$0xf] }
  0x33   :  { %v300_v7 = vmax.bf16 %v284_v61, %v268_v0  ;;  %v206_v8 = vmax.bf16 %v190_v63, %v174_v2  ;;  %v287_v19 = vld [vmem:[%s893_s8 + $0x3c] sm:$0xf] }
  0x34   :  { %v301_v10 = vmax.bf16 %v285_v1, %v269_v4  ;;  %v207_v11 = vmax.bf16 %v191_v3, %v175_v5 }
  0x35   :  { %v238_v13 = vmax.bf16 %v222_v6, %v206_v8 }
  0x36   :  { %v375_v15 = vcombine.low %v300_v7, %v301_v10  ;;  %v239_v16 = vmax.bf16 %v223_v9, %v207_v11 }
  0x37   :  { %v270_v18 = vmax.bf16 %v254_v12, %v238_v13 }
  0x38   :  { %376 = vst [vmem:[%s894_s9 + $0x30] sm:$0xff] %v375_v15   ;;  %v271_v20 = vmax.bf16 %v255_v14, %v239_v16 }
  0x39   :  { %v302_v21 = vmax.bf16 %v286_v17, %v270_v18 }
  0x3a   :  { %v303_v22 = vmax.bf16 %v287_v19, %v271_v20 }
  0x3c   :  { %v377_v23 = vcombine.low %v302_v21, %v303_v22 }
  0x3e   :  { %378 = vst [vmem:[%s894_s9 + $0x38] sm:$0xff] %v377_v23  }

// kernel: forward.45
= control target key start
LH: loop header
LB: loop body
LE: loop exit
PB: predicated region body
PF: predicated region fallthrough
CT: control target
= control target key end

     0   :  { %s541_s0 = inlined_call_operand.vmem [shape: bf16[128,128], index: 0, kind: input, shape index: {}]   ;;  %s542_s1 = inlined_call_operand.vmem [shape: f32[1,128], index: 1, kind: input, shape index: {}]   ;;  %s543_s2 = inlined_call_operand.vmem [shape: f32[1,128], index: 2, kind: input, shape index: {}]   ;;  %s544_s3 = inlined_call_operand.vmem [shape: bf16[128,128], index: 3, kind: input, shape index: {}]   ;;  %s545_s4 = inlined_call_operand.vmem [shape: bf16[128,128], index: 4, kind: output, shape index: {}]  }
   0x1   :  { %v278_v0 = vld [vmem:[%s541_s0] sm:$0xff]   ;;  %v381_v5 = vld [vmem:[%s541_s0 + $0x8] sm:$0xff]   ;;  %v382_v12 = vld [vmem:[%s541_s0 + $0x10] sm:$0xff]  }
   0x2   :  { %v433_v1 = vld [vmem:[%s542_s1] ss:$0 sm:$0xff]  ;;  %v279_v2 = vunpack.c.l.bf16 %v278_v0  ;;  %v280_v3 = vunpack.c.h.bf16 %v278_v0  ;;  %v388_v6 = vld [vmem:[%s544_s3 + $0x8] sm:$0xff]   ;;  %v283_v10 = vunpack.c.l.bf16 %v381_v5  ;;  %v284_v11 = vunpack.c.h.bf16 %v381_v5  ;;  %v389_v13 = vld [vmem:[%s544_s3 + $0x10] sm:$0xff]  }
   0x3   :  { %v310_v4 = vld [vmem:[%s544_s3] sm:$0xff]   ;;  %v315_v16 = vunpack.c.l.bf16 %v388_v6  ;;  %v316_v17 = vunpack.c.h.bf16 %v388_v6  ;;  %v287_v20 = vunpack.c.l.bf16 %v382_v12  ;;  %v288_v21 = vunpack.c.h.bf16 %v382_v12  ;;  %v383_v22 = vld [vmem:[%s541_s0 + $0x18] sm:$0xff]   ;;  %v385_v54 = vld [vmem:[%s541_s0 + $0x28] sm:$0xff]  }
   0x4   :  { %v447_v7 = vld [vmem:[%s543_s2] ss:$0 sm:$0xff]  ;;  %v311_v8 = vunpack.c.l.bf16 %v310_v4  ;;  %v312_v9 = vunpack.c.h.bf16 %v310_v4  ;;  %v56_v14 = vmul.f32 %v279_v2, %v433_v1  ;;  %v57_v15 = vmul.f32 %v280_v3, %v433_v1  ;;  %v390_v39 = vld [vmem:[%s544_s3 + $0x18] sm:$0xff]   ;;  %v392_v63 = vld [vmem:[%s544_s3 + $0x28] sm:$0xff]  }
   0x5   :  { %v58_v18 = vmul.f32 %v283_v10, %v433_v1  ;;  %v59_v19 = vmul.f32 %v284_v11, %v433_v1  ;;  %v319_v25 = vunpack.c.l.bf16 %v389_v13  ;;  %v320_v26 = vunpack.c.h.bf16 %v389_v13  ;;  %v384_v48 = vld [vmem:[%s541_s0 + $0x20] sm:$0xff]   ;;  %v386_v5 = vld [vmem:[%s541_s0 + $0x30] sm:$0xff]  }
   0x6   :  { %v79_v23 = vadd.f32 %v447_v7, %v56_v14  ;;  %v80_v24 = vadd.f32 %v447_v7, %v57_v15  ;;  %v60_v29 = vmul.f32 %v287_v20, %v433_v1  ;;  %v61_v30 = vmul.f32 %v288_v21, %v433_v1  ;;  %v391_v49 = vld [vmem:[%s544_s3 + $0x20] sm:$0xff]   ;;  %v393_v11 = vld [vmem:[%s544_s3 + $0x30] sm:$0xff]   ;;  %v387_v20 = vld [vmem:[%s541_s0 + $0x38] sm:$0xff]  }
   0x7   :  { %v81_v27 = vadd.f32 %v447_v7, %v58_v18  ;;  %v82_v28 = vadd.f32 %v447_v7, %v59_v19  ;;  %v291_v33 = vunpack.c.l.bf16 %v383_v22  ;;  %v292_v34 = vunpack.c.h.bf16 %v383_v22 }
   0x8   :  { %v127_v31 = vadd.f32 %v311_v8, %v79_v23  ;;  %v128_v32 = vadd.f32 %v312_v9, %v80_v24  ;;  %v83_v37 = vadd.f32 %v447_v7, %v60_v29  ;;  %v84_v38 = vadd.f32 %v447_v7, %v61_v30 }
   0x9   :  { %v129_v35 = vadd.f32 %v315_v16, %v81_v27  ;;  %v130_v36 = vadd.f32 %v316_v17, %v82_v28  ;;  %v62_v42 = vmul.f32 %v291_v33, %v433_v1  ;;  %v63_v43 = vmul.f32 %v292_v34, %v433_v1  ;;  %v394_v33 = vld [vmem:[%s544_s3 + $0x38] sm:$0xff]  }
   0xa   :  { %v143_v40 = vmax.f32 %v127_v31, 0.0  ;;  %v144_v41 = vmax.f32 %v128_v32, 0.0  ;;  %v131_v46 = vadd.f32 %v319_v25, %v83_v37  ;;  %v132_v47 = vadd.f32 %v320_v26, %v84_v38 }
   0xb   :  { %v145_v44 = vmax.f32 %v129_v35, 0.0  ;;  %v146_v45 = vmax.f32 %v130_v36, 0.0  ;;  %v85_v51 = vadd.f32 %v447_v7, %v62_v42  ;;  %v86_v52 = vadd.f32 %v447_v7, %v63_v43 }
   0xc   :  { %v344_v50 = vpack.c.bf16 %v144_v41, %v143_v40  ;;  %v323_v53 = vunpack.c.l.bf16 %v390_v39  ;;  %v147_v56 = vmax.f32 %v131_v46, 0.0  ;;  %v148_v57 = vmax.f32 %v132_v47, 0.0 }
   0xd   :  { %v349_v55 = vpack.c.bf16 %v146_v45, %v145_v44  ;;  %v324_v58 = vunpack.c.h.bf16 %v390_v39  ;;  %v295_v60 = vunpack.c.l.bf16 %v384_v48  ;;  %v296_v61 = vunpack.c.h.bf16 %v384_v48 }
   0xe   :  { %345 = vst [vmem:[%s545_s4] sm:$0xff] %v344_v50   ;;  %v133_v59 = vadd.f32 %v323_v53, %v85_v51  ;;  %v327_v62 = vunpack.c.l.bf16 %v391_v49  ;;  %v354_v0 = vpack.c.bf16 %v148_v57, %v147_v56  ;;  %v328_v3 = vunpack.c.h.bf16 %v391_v49 }
   0xf   :  { %395 = vst [vmem:[%s545_s4 + $0x8] sm:$0xff] %v349_v55   ;;  %v134_v2 = vadd.f32 %v324_v58, %v86_v52  ;;  %v299_v4 = vunpack.c.l.bf16 %v385_v54  ;;  %v64_v8 = vmul.f32 %v295_v60, %v433_v1  ;;  %v65_v9 = vmul.f32 %v296_v61, %v433_v1 }
  0x10   :  { %v149_v6 = vmax.f32 %v133_v59, 0.0  ;;  %v300_v10 = vunpack.c.h.bf16 %v385_v54  ;;  %396 = vst [vmem:[%s545_s4 + $0x10] sm:$0xff] %v354_v0   ;;  %v331_v14 = vunpack.c.l.bf16 %v392_v63  ;;  %v332_v15 = vunpack.c.h.bf16 %v392_v63 }
  0x11   :  { %v150_v12 = vmax.f32 %v134_v2, 0.0  ;;  %v66_v13 = vmul.f32 %v299_v4, %v433_v1  ;;  %v87_v16 = vadd.f32 %v447_v7, %v64_v8  ;;  %v88_v17 = vadd.f32 %v447_v7, %v65_v9 }
  0x12   :  { %v67_v18 = vmul.f32 %v300_v10, %v433_v1  ;;  %v303_v19 = vunpack.c.l.bf16 %v386_v5  ;;  %v304_v23 = vunpack.c.h.bf16 %v386_v5  ;;  %v335_v24 = vunpack.c.l.bf16 %v393_v11 }
  0x13   :  { %v359_v21 = vpack.c.bf16 %v150_v12, %v149_v6  ;;  %v89_v22 = vadd.f32 %v447_v7, %v66_v13  ;;  %v135_v25 = vadd.f32 %v327_v62, %v87_v16  ;;  %v136_v26 = vadd.f32 %v328_v3, %v88_v17 }
  0x14   :  { %v90_v27 = vadd.f32 %v447_v7, %v67_v18  ;;  %v68_v28 = vmul.f32 %v303_v19, %v433_v1  ;;  %v69_v30 = vmul.f32 %v304_v23, %v433_v1  ;;  %v336_v31 = vunpack.c.h.bf16 %v393_v11 }
  0x15   :  { %397 = vst [vmem:[%s545_s4 + $0x18] sm:$0xff] %v359_v21   ;;  %v137_v29 = vadd.f32 %v331_v14, %v89_v22  ;;  %v307_v32 = vunpack.c.l.bf16 %v387_v20  ;;  %v151_v34 = vmax.f32 %v135_v25, 0.0  ;;  %v152_v35 = vmax.f32 %v136_v26, 0.0 }
  0x16   :  { %v138_v36 = vadd.f32 %v332_v15, %v90_v27  ;;  %v91_v37 = vadd.f32 %v447_v7, %v68_v28  ;;  %v92_v39 = vadd.f32 %v447_v7, %v69_v30  ;;  %v308_v40 = vunpack.c.h.bf16 %v387_v20 }
  0x17   :  { %v153_v38 = vmax.f32 %v137_v29, 0.0  ;;  %v70_v41 = vmul.f32 %v307_v32, %v433_v1  ;;  %v364_v42 = vpack.c.bf16 %v152_v35, %v151_v34  ;;  %v339_v45 = vunpack.c.l.bf16 %v394_v33 }
  0x18   :  { %v154_v43 = vmax.f32 %v138_v36, 0.0  ;;  %v139_v44 = vadd.f32 %v335_v24, %v91_v37  ;;  %v140_v46 = vadd.f32 %v336_v31, %v92_v39  ;;  %v71_v47 = vmul.f32 %v308_v40, %v433_v1 }
  0x19   :  { %v93_v48 = vadd.f32 %v447_v7, %v70_v41  ;;  %v340_v49 = vunpack.c.h.bf16 %v394_v33  ;;  %398 = vst [vmem:[%s545_s4 + $0x20] sm:$0xff] %v364_v42  }
  0x1a   :  { %v369_v50 = vpack.c.bf16 %v154_v43, %v153_v38  ;;  %v155_v51 = vmax.f32 %v139_v44, 0.0  ;;  %v156_v52 = vmax.f32 %v140_v46, 0.0  ;;  %v94_v53 = vadd.f32 %v447_v7, %v71_v47 }
  0x1b   :  { %v141_v54 = vadd.f32 %v339_v45, %v93_v48 }
  0x1c   :  { %399 = vst [vmem:[%s545_s4 + $0x28] sm:$0xff] %v369_v50   ;;  %v374_v55 = vpack.c.bf16 %v156_v52, %v155_v51  ;;  %v142_v56 = vadd.f32 %v340_v49, %v94_v53 }
  0x1d   :  { %v157_v1 = vmax.f32 %v141_v54, 0.0 }
  0x1e   :  { %400 = vst [vmem:[%s545_s4 + $0x30] sm:$0xff] %v374_v55   ;;  %v158_v57 = vmax.f32 %v142_v56, 0.0 }
  0x20   :  { %v379_v58 = vpack.c.bf16 %v158_v57, %v157_v1 }
  0x22   :  { %401 = vst [vmem:[%s545_s4 + $0x38] sm:$0xff] %v379_v58  }

// kernel: forward.43
= control target key start
LH: loop header
LB: loop body
LE: loop exit
PB: predicated region body
PF: predicated region fallthrough
CT: control target
= control target key end

     0   :  { %s422_s0 = inlined_call_operand.vmem [shape: bf16[128,128], index: 0, kind: input, shape index: {}]   ;;  %s423_s1 = inlined_call_operand.vmem [shape: f32[1,128], index: 1, kind: input, shape index: {}]   ;;  %s424_s2 = inlined_call_operand.vmem [shape: f32[1,128], index: 2, kind: input, shape index: {}]   ;;  %s425_s3 = inlined_call_operand.vmem [shape: bf16[128,128], index: 3, kind: output, shape index: {}]  }
   0x1   :  { %v227_v0 = vld [vmem:[%s422_s0] sm:$0xff]   ;;  %v298_v4 = vld [vmem:[%s422_s0 + $0x8] sm:$0xff]   ;;  %v299_v5 = vld [vmem:[%s422_s0 + $0x10] sm:$0xff]  }
   0x2   :  { %v338_v1 = vld [vmem:[%s423_s1] ss:$0 sm:$0xff]  ;;  %v228_v2 = vunpack.c.l.bf16 %v227_v0  ;;  %v229_v3 = vunpack.c.h.bf16 %v227_v0  ;;  %v300_v6 = vld [vmem:[%s422_s0 + $0x18] sm:$0xff]   ;;  %v232_v8 = vunpack.c.l.bf16 %v298_v4  ;;  %v233_v9 = vunpack.c.h.bf16 %v298_v4  ;;  %v302_v33 = vld [vmem:[%s422_s0 + $0x28] sm:$0xff]  }
   0x3   :  { %v352_v7 = vld [vmem:[%s424_s2] ss:$0 sm:$0xff]  ;;  %v236_v10 = vunpack.c.l.bf16 %v299_v5  ;;  %v237_v11 = vunpack.c.h.bf16 %v299_v5  ;;  %v240_v14 = vunpack.c.l.bf16 %v300_v6  ;;  %v241_v15 = vunpack.c.h.bf16 %v300_v6  ;;  %v303_v38 = vld [vmem:[%s422_s0 + $0x30] sm:$0xff]   ;;  %v304_v43 = vld [vmem:[%s422_s0 + $0x38] sm:$0xff]  }
   0x4   :  { %v53_v12 = vmul.f32 %v228_v2, %v338_v1  ;;  %v54_v13 = vmul.f32 %v229_v3, %v338_v1  ;;  %v55_v16 = vmul.f32 %v232_v8, %v338_v1  ;;  %v56_v17 = vmul.f32 %v233_v9, %v338_v1  ;;  %v301_v28 = vld [vmem:[%s422_s0 + $0x20] sm:$0xff]  }
   0x5   :  { %v57_v18 = vmul.f32 %v236_v10, %v338_v1  ;;  %v58_v19 = vmul.f32 %v237_v11, %v338_v1  ;;  %v59_v22 = vmul.f32 %v240_v14, %v338_v1  ;;  %v60_v23 = vmul.f32 %v241_v15, %v338_v1 }
   0x6   :  { %v76_v20 = vadd.f32 %v352_v7, %v53_v12  ;;  %v77_v21 = vadd.f32 %v352_v7, %v54_v13  ;;  %v78_v24 = vadd.f32 %v352_v7, %v55_v16  ;;  %v79_v25 = vadd.f32 %v352_v7, %v56_v17 }
   0x7   :  { %v80_v26 = vadd.f32 %v352_v7, %v57_v18  ;;  %v81_v27 = vadd.f32 %v352_v7, %v58_v19  ;;  %v82_v31 = vadd.f32 %v352_v7, %v59_v22  ;;  %v83_v32 = vadd.f32 %v352_v7, %v60_v23 }
   0x8   :  { %v92_v29 = vmax.f32 %v76_v20, 0.0  ;;  %v93_v30 = vmax.f32 %v77_v21, 0.0  ;;  %v94_v34 = vmax.f32 %v78_v24, 0.0  ;;  %v95_v35 = vmax.f32 %v79_v25, 0.0 }
   0x9   :  { %v96_v36 = vmax.f32 %v80_v26, 0.0  ;;  %v97_v37 = vmax.f32 %v81_v27, 0.0  ;;  %v98_v40 = vmax.f32 %v82_v31, 0.0  ;;  %v99_v41 = vmax.f32 %v83_v32, 0.0 }
   0xa   :  { %v261_v39 = vpack.c.bf16 %v93_v30, %v92_v29  ;;  %v244_v42 = vunpack.c.l.bf16 %v301_v28  ;;  %v266_v44 = vpack.c.bf16 %v95_v35, %v94_v34  ;;  %v245_v46 = vunpack.c.h.bf16 %v301_v28 }
   0xb   :  { %v271_v45 = vpack.c.bf16 %v97_v37, %v96_v36  ;;  %v248_v47 = vunpack.c.l.bf16 %v302_v33  ;;  %v276_v48 = vpack.c.bf16 %v99_v41, %v98_v40  ;;  %v249_v50 = vunpack.c.h.bf16 %v302_v33 }
   0xc   :  { %262 = vst [vmem:[%s425_s3] sm:$0xff] %v261_v39   ;;  %v61_v49 = vmul.f32 %v244_v42, %v338_v1  ;;  %v252_v51 = vunpack.c.l.bf16 %v303_v38  ;;  %305 = vst [vmem:[%s425_s3 + $0x8] sm:$0xff] %v266_v44   ;;  %v62_v52 = vmul.f32 %v245_v46, %v338_v1  ;;  %v253_v54 = vunpack.c.h.bf16 %v303_v38 }
   0xd   :  { %306 = vst [vmem:[%s425_s3 + $0x10] sm:$0xff] %v271_v45   ;;  %v63_v53 = vmul.f32 %v248_v47, %v338_v1  ;;  %v256_v55 = vunpack.c.l.bf16 %v304_v43  ;;  %307 = vst [vmem:[%s425_s3 + $0x18] sm:$0xff] %v276_v48   ;;  %v64_v57 = vmul.f32 %v249_v50, %v338_v1  ;;  %v257_v59 = vunpack.c.h.bf16 %v304_v43 }
   0xe   :  { %v84_v56 = vadd.f32 %v352_v7, %v61_v49  ;;  %v65_v58 = vmul.f32 %v252_v51, %v338_v1  ;;  %v85_v60 = vadd.f32 %v352_v7, %v62_v52  ;;  %v66_v62 = vmul.f32 %v253_v54, %v338_v1 }
   0xf   :  { %v86_v61 = vadd.f32 %v352_v7, %v63_v53  ;;  %v67_v63 = vmul.f32 %v256_v55, %v338_v1  ;;  %v87_v2 = vadd.f32 %v352_v7, %v64_v57  ;;  %v68_v4 = vmul.f32 %v257_v59, %v338_v1 }
  0x10   :  { %v100_v0 = vmax.f32 %v84_v56, 0.0  ;;  %v88_v3 = vadd.f32 %v352_v7, %v65_v58  ;;  %v101_v5 = vmax.f32 %v85_v60, 0.0  ;;  %v89_v8 = vadd.f32 %v352_v7, %v66_v62 }
  0x11   :  { %v102_v6 = vmax.f32 %v86_v61, 0.0  ;;  %v90_v9 = vadd.f32 %v352_v7, %v67_v63  ;;  %v103_v10 = vmax.f32 %v87_v2, 0.0  ;;  %v91_v12 = vadd.f32 %v352_v7, %v68_v4 }
  0x12   :  { %v104_v11 = vmax.f32 %v88_v3, 0.0  ;;  %v281_v13 = vpack.c.bf16 %v101_v5, %v100_v0  ;;  %v105_v14 = vmax.f32 %v89_v8, 0.0 }
  0x13   :  { %v106_v15 = vmax.f32 %v90_v9, 0.0  ;;  %v286_v16 = vpack.c.bf16 %v103_v10, %v102_v6  ;;  %v107_v17 = vmax.f32 %v91_v12, 0.0 }
  0x14   :  { %308 = vst [vmem:[%s425_s3 + $0x20] sm:$0xff] %v281_v13   ;;  %v291_v1 = vpack.c.bf16 %v105_v14, %v104_v11 }
  0x15   :  { %309 = vst [vmem:[%s425_s3 + $0x28] sm:$0xff] %v286_v16   ;;  %v296_v18 = vpack.c.bf16 %v107_v17, %v106_v15 }
  0x16   :  { %310 = vst [vmem:[%s425_s3 + $0x30] sm:$0xff] %v291_v1  }
  0x17   :  { %311 = vst [vmem:[%s425_s3 + $0x38] sm:$0xff] %v296_v18  }

// kernel: forward.42
= control target key start
LH: loop header
LB: loop body
LE: loop exit
PB: predicated region body
PF: predicated region fallthrough
CT: control target
= control target key end

     0   :  { %s1665_s15 = smov 0   ;;  %s1667_s16 = smov 0   ;;  %s1897_s0 = inlined_call_operand.vmem [shape: bf16[128,1152], index: 0, kind: input, shape index: {}]   ;;  %s1898_s1 = inlined_call_operand.vmem [shape: bf16[1152,128], index: 1, kind: input, shape index: {}]   ;;  %s1899_s2 = inlined_call_operand.vmem [shape: bf16[128,128], index: 2, kind: output, shape index: {0}]   ;;  %s1900_s3 = inlined_call_operand.vmem [shape: f32[1,128], index: 3, kind: output, shape index: {1}]   ;;  %s1901_s4 = inlined_call_operand.vmem [shape: f32[1,128], index: 4, kind: output, shape index: {2}]  }
   0x1   :  { %s1669_s17 = smov 0   ;;  %s1671_s18 = smov 0  }
   0x2   :  { %s1673_s19 = smov 0  }
   0x3 LB: > { %s24_s20 = sadd.s32 1, %s1632_s18  ;;  %p43_p1 = scmp.ne.s32.totalorder %s1624_s16, %s1620_s15  ;;  %s1636_s19 = sphi %s1673_s19, %s15_s19   ;;  %s1632_s18 = sphi %s1671_s18, %s1905_s18   ;;  %s1628_s17 = sphi %s1669_s17, %s1904_s17   ;;  %s1624_s16 = sphi %s1667_s16, %s1903_s16   ;;  %s1620_s15 = sphi %s1665_s15, %s1902_s15  }
   0x4   : > { %p25_p0 = scmp.ge.s32.totalorder %s24_s20, 3  ;;  %p44_p2 = scmp.eq.s32.totalorder %s1636_s19, 0 }
   0x5   : > { %s36_s22 = sadd.s32 1, %s1624_s16  ;;  %p1214_p5 = scmp.ge.s32.totalorder %s1636_s19, 3 }
   0x6   : > { %s1907_s20 = smov (%p25_p0, %s24_s20), 0  ;;  %p45_p3 = por %p44_p2, %p43_p1 }
   0x7   : > { %s32_s21 = ssub.s32 %s1632_s18, %s1907_s20  ;;  %163 = sbr.rel (%p1214_p5) target bundleno = 35 (0x23), region = 16 }
   0x8   : > { %p34_p4 = scmp.eq.s32.totalorder %s32_s21, 0 }
   0xa   : > { %s1700_s23 = scalar_select %p34_p4, %s1624_s16, %s36_s22  }
   0xc   : > { %166 = sbr.rel (!%p45_p3) target bundleno = 35 (0x23), region = 20  ;;  %s168_s24 = sand.u32 (%p45_p3), 1, %s1624_s16  }
   0xd   : > { %s1321_s25 = smul.u32 (%p45_p3), 12, %s1632_s18 }
   0xe   : > { %s1498_s26 = smul.u32 (%p45_p3), 192, %s168_s24 }
   0xf   : > { %s1708_s29 = scalar_lea.vmem (%p45_p3), %s1897_s0, %s1321_s25 }
  0x10   : > { %v191_v0 = vld [vmem:[%s1708_s29] sm:$0xff] (%p45_p3)  ;;  %v195_v2 = vld [vmem:[%s1708_s29 + $0x48] sm:$0xff] (%p45_p3)  ;;  %s1713_s30 = scalar_lea.vmem (%p45_p3), [#allocation3], %s1498_s26  ;;  %v199_v4 = vld [vmem:[%s1708_s29 + $0x90] sm:$0xff] (%p45_p3) }
  0x11   : > { %v193_v1 = vld [vmem:[%s1708_s29 + $0x24] sm:$0xff]  ;;  %192 = vst [vmem:[%s1713_s30] sm:$0xff] %v191_v0  ;;  %196 = vst [vmem:[%s1713_s30 + $0x18] sm:$0xff] %v195_v2  ;;  %v197_v3 = vld [vmem:[%s1708_s29 + $0x6c] sm:$0xff] }
  0x12   : > { %194 = vst [vmem:[%s1713_s30 + $0xc] sm:$0xff] %v193_v1  ;;  %v201_v5 = vld [vmem:[%s1708_s29 + $0xb4] sm:$0xff]  ;;  %198 = vst [vmem:[%s1713_s30 + $0x24] sm:$0xff] %v197_v3  ;;  %v205_v7 = vld [vmem:[%s1708_s29 + $0xfc] sm:$0xff] }
  0x13   : > { %200 = vst [vmem:[%s1713_s30 + $0x30] sm:$0xff] %v199_v4  ;;  %202 = vst [vmem:[%s1713_s30 + $0x3c] sm:$0xff] %v201_v5  ;;  %v203_v6 = vld [vmem:[%s1708_s29 + $0xd8] sm:$0xff]  ;;  %v207_v8 = vld [vmem:[%s1708_s29 + $0x120] sm:$0xff] }
  0x14   : > { %204 = vst [vmem:[%s1713_s30 + $0x48] sm:$0xff] %v203_v6  ;;  %206 = vst [vmem:[%s1713_s30 + $0x54] sm:$0xff] %v205_v7  ;;  %v209_v9 = vld [vmem:[%s1708_s29 + $0x144] sm:$0xff]  ;;  %v213_v11 = vld [vmem:[%s1708_s29 + $0x18c] sm:$0xff] }
  0x15   : > { %208 = vst [vmem:[%s1713_s30 + $0x60] sm:$0xff] %v207_v8  ;;  %v211_v10 = vld [vmem:[%s1708_s29 + $0x168] sm:$0xff]  ;;  %210 = vst [vmem:[%s1713_s30 + $0x6c] sm:$0xff] %v209_v9  ;;  %v215_v12 = vld [vmem:[%s1708_s29 + $0x1b0] sm:$0xff] }
  0x16   : > { %212 = vst [vmem:[%s1713_s30 + $0x78] sm:$0xff] %v211_v10  ;;  %214 = vst [vmem:[%s1713_s30 + $0x84] sm:$0xff] %v213_v11  ;;  %v217_v13 = vld [vmem:[%s1708_s29 + $0x1d4] sm:$0xff]  ;;  %v221_v15 = vld [vmem:[%s1708_s29 + $0x21c] sm:$0xff] }
  0x17   : > { %v219_v14 = vld [vmem:[%s1708_s29 + $0x1f8] sm:$0xff]  ;;  %216 = vst [vmem:[%s1713_s30 + $0x90] sm:$0xff] %v215_v12  ;;  %218 = vst [vmem:[%s1713_s30 + $0x9c] sm:$0xff] %v217_v13  ;;  %v1216_v16 = vld [vmem:[%s1708_s29 + $0x8] sm:$0xf] }
  0x18   : > { %220 = vst [vmem:[%s1713_s30 + $0xa8] sm:$0xff] %v219_v14  ;;  %v1218_v17 = vld [vmem:[%s1708_s29 + $0x2c] sm:$0xf]  ;;  %222 = vst [vmem:[%s1713_s30 + $0xb4] sm:$0xff] %v221_v15  ;;  %v1220_v18 = vld [vmem:[%s1708_s29 + $0x50] sm:$0xf] }
  0x19   : > { %1217 = vst [vmem:[%s1713_s30 + $0x8] sm:$0xf] %v1216_v16  ;;  %1219 = vst [vmem:[%s1713_s30 + $0x14] sm:$0xf] %v1218_v17  ;;  %v1222_v19 = vld [vmem:[%s1708_s29 + $0x74] sm:$0xf] }
  0x1a   : > { %v1224_v20 = vld [vmem:[%s1708_s29 + $0x98] sm:$0xf]  ;;  %1221 = vst [vmem:[%s1713_s30 + $0x20] sm:$0xf] %v1220_v18  ;;  %1223 = vst [vmem:[%s1713_s30 + $0x2c] sm:$0xf] %v1222_v19 }
  0x1b   : > { %1225 = vst [vmem:[%s1713_s30 + $0x38] sm:$0xf] %v1224_v20  ;;  %v1226_v21 = vld [vmem:[%s1708_s29 + $0xbc] sm:$0xf]  ;;  %v1228_v22 = vld [vmem:[%s1708_s29 + $0xe0] sm:$0xf] }
  0x1c   : > { %v1230_v23 = vld [vmem:[%s1708_s29 + $0x104] sm:$0xf]  ;;  %1227 = vst [vmem:[%s1713_s30 + $0x44] sm:$0xf] %v1226_v21  ;;  %1229 = vst [vmem:[%s1713_s30 + $0x50] sm:$0xf] %v1228_v22 }
  0x1d   : > { %1231 = vst [vmem:[%s1713_s30 + $0x5c] sm:$0xf] %v1230_v23  ;;  %v1232_v24 = vld [vmem:[%s1708_s29 + $0x128] sm:$0xf]  ;;  %v1234_v25 = vld [vmem:[%s1708_s29 + $0x14c] sm:$0xf] }
  0x1e   : > { %v1236_v26 = vld [vmem:[%s1708_s29 + $0x170] sm:$0xf]  ;;  %1233 = vst [vmem:[%s1713_s30 + $0x68] sm:$0xf] %v1232_v24  ;;  %1235 = vst [vmem:[%s1713_s30 + $0x74] sm:$0xf] %v1234_v25 }
  0x1f   : > { %1237 = vst [vmem:[%s1713_s30 + $0x80] sm:$0xf] %v1236_v26  ;;  %v1238_v27 = vld [vmem:[%s1708_s29 + $0x194] sm:$0xf]  ;;  %v1240_v28 = vld [vmem:[%s1708_s29 + $0x1b8] sm:$0xf] }
  0x20   : > { %v1242_v29 = vld [vmem:[%s1708_s29 + $0x1dc] sm:$0xf]  ;;  %1239 = vst [vmem:[%s1713_s30 + $0x8c] sm:$0xf] %v1238_v27  ;;  %1241 = vst [vmem:[%s1713_s30 + $0x98] sm:$0xf] %v1240_v28 }
  0x21   : > { %1243 = vst [vmem:[%s1713_s30 + $0xa4] sm:$0xf] %v1242_v29  ;;  %v1244_v30 = vld [vmem:[%s1708_s29 + $0x200] sm:$0xf]  ;;  %v1246_v31 = vld [vmem:[%s1708_s29 + $0x224] sm:$0xf] }
  0x22   : > { %1245 = vst [vmem:[%s1713_s30 + $0xb0] sm:$0xf] %v1244_v30  ;;  %1247 = vst [vmem:[%s1713_s30 + $0xbc] sm:$0xf] %v1246_v31 }
  0x23 PF: > { %p1248_p6 = scmp.ge.s32.totalorder %s1636_s19, 1  ;;  %p276_p7 = scmp.lt.s32.totalorder %s1636_s19, 4 }
  0x25   : > { %p277_p8 = pnand %p1248_p6, %p276_p7 }
  0x26   : > { %s283_s5 = sand.u32 (!%p277_p8), 1, %s1620_s15   ;;  %s315_s6 = smul.u32 (!%p277_p8), 48, %s1628_s17 }
  0x27   : > { %280 = sbr.rel (%p277_p8) target bundleno = 408 (0x198), region = 50  ;;  %p1250_p10 = scmp.ne.s32.totalorder (!%p277_p8), %s1628_s17, 0 }
  0x28   : > { %s1499_s7 = smul.u32 (!%p277_p8), 192, %s283_s5  ;;  %p316_p9 = scmp.lt.s32.totalorder (!%p277_p8), %s315_s6, 143 }
  0x2a   : > { %s1785_s12 = scalar_lea.vmem (!%p277_p8), [#allocation3], %s1499_s7 }
  0x2c   : > { %s1909_s6 = smov (!%p316_p9, %s315_s6), 143  ;;  %331 = sbr.rel (%p1250_p10) target bundleno = 58 (0x3a), region = 58 }
  0x2d   : > { %s1249_s8 = sshll.u32 %s1909_s6, 2 }
  0x2e   : > { %s1783_s11 = scalar_lea.vmem %s1898_s1, %s1249_s8 }
  0x31   : > { %v1638_v32 = vmov 0.0  }
  0x32   : > { %332 = vst [vmem:[#allocation2 + $0x30] sm:$0xff] %v1638_v32  ;;  %333 = vst [vmem:[#allocation2] sm:$0xff] %v1638_v32 }
  0x33   : > { %334 = vst [vmem:[#allocation2 + $0x58] sm:$0xff] %v1638_v32  ;;  %335 = vst [vmem:[#allocation2 + $0x18] sm:$0xff] %v1638_v32 }
  0x34   : > { %336 = vst [vmem:[#allocation2 + $0x50] sm:$0xff] %v1638_v32  ;;  %337 = vst [vmem:[#allocation2 + $0x68] sm:$0xff] %v1638_v32 }
  0x35   : > { %338 = vst [vmem:[#allocation2 + $0x8] sm:$0xff] %v1638_v32  ;;  %339 = vst [vmem:[#allocation2 + $0x48] sm:$0xff] %v1638_v32 }
  0x36   : > { %340 = vst [vmem:[#allocation2 + $0x40] sm:$0xff] %v1638_v32  ;;  %341 = vst [vmem:[#allocation2 + $0x20] sm:$0xff] %v1638_v32 }
  0x37   : > { %342 = vst [vmem:[#allocation2 + $0x10] sm:$0xff] %v1638_v32  ;;  %343 = vst [vmem:[#allocation2 + $0x38] sm:$0xff] %v1638_v32 }
  0x38   : > { %344 = vst [vmem:[#allocation2 + $0x60] sm:$0xff] %v1638_v32  ;;  %345 = vst [vmem:[#allocation2 + $0x70] sm:$0xff] %v1638_v32 }
  0x39   : > { %346 = vst [vmem:[#allocation2 + $0x78] sm:$0xff] %v1638_v32  ;;  %347 = vst [vmem:[#allocation2 + $0x28] sm:$0xff] %v1638_v32 }
  0x3a PF: > { %v1542_v33 = vld [vmem:[%s1783_s11 + $0x78] sm:$0xff]   ;;  %v1545_v36 = vld [vmem:[%s1783_s11 + $0x70] sm:$0xff]   ;;  %v1548_v39 = vld [vmem:[%s1783_s11 + $0x68] sm:$0xff]   ;;  %p942_p11 = scmp.eq.s32.totalorder %s1628_s17, 2 }
  0x3b   : > { %v1543_v34 = vld [vmem:[%s1783_s11 + $0x38] sm:$0xff]   ;;  %1386 = vmatprep.subr.bf16.mxu0 %v1542_v33  ;;  %v1546_v37 = vld [vmem:[%s1783_s11 + $0x30] sm:$0xff]   ;;  %v1549_v40 = vld [vmem:[%s1783_s11 + $0x28] sm:$0xff]  }
  0x3c   : > { %v1544_v35 = vld [vmem:[%s1783_s11 + $0xb8] sm:$0xff]   ;;  %1387 = vmatpush3.bf16.msra.mxu0 %v1543_v34  ;;  %v1547_v38 = vld [vmem:[%s1783_s11 + $0xb0] sm:$0xff]   ;;  %v1550_v41 = vld [vmem:[%s1783_s11 + $0xa8] sm:$0xff]  }
  0x3d   : > { %1466 = vmatprep.subr.bf16.mxu1 %v1544_v35  ;;  %1388 = vmatprep.subr.bf16.mxu0 %v1545_v36  ;;  %v1551_v42 = vld [vmem:[%s1783_s11 + $0x60] sm:$0xff]   ;;  %v1554_v45 = vld [vmem:[%s1783_s11 + $0x58] sm:$0xff]   ;;  %v1557_v48 = vld [vmem:[%s1783_s11 + $0x50] sm:$0xff]  }
  0x3e   : > { %1467 = vmatpush3.bf16.msra.mxu1 %v1544_v35  ;;  %v1552_v43 = vld [vmem:[%s1783_s11 + $0x20] sm:$0xff]   ;;  %v1556_v46 = vld [vmem:[%s1783_s11 + $0x98] sm:$0xff]   ;;  %v1559_v49 = vld [vmem:[%s1783_s11 + $0x90] sm:$0xff]  }
  0x3f   : > { %1468 = vmatprep.subr.bf16.mxu1 %v1547_v38  ;;  %v1553_v44 = vld [vmem:[%s1783_s11 + $0xa0] sm:$0xff]   ;;  %v1555_v47 = vld [vmem:[%s1783_s11 + $0x18] sm:$0xff]   ;;  %v1558_v50 = vld [vmem:[%s1783_s11 + $0x10] sm:$0xff]  }
  0x40   : > { %1389 = vmatpush3.bf16.msra.mxu0 %v1546_v37  ;;  %v1560_v51 = vld [vmem:[%s1783_s11 + $0x48] sm:$0xff]   ;;  %v1563_v54 = vld [vmem:[%s1783_s11 + $0x40] sm:$0xff]   ;;  %v1578_v1 = vld [vmem:[%s1785_s12 + $0x50] ss:$12 sps:$4 sm:$0xff]  }
  0x41   : > { %1390 = vmatprep.subr.bf16.mxu0 %v1548_v39  ;;  %v1561_v52 = vld [vmem:[%s1783_s11 + $0x8] sm:$0xff]   ;;  %v1565_v55 = vld [vmem:[%s1783_s11 + $0x80] sm:$0xff]   ;;  %v1576_v3 = vld [vmem:[%s1785_s12 + $0x30] ss:$12 sps:$4 sm:$0xff]  }
  0x42   : > { %1469 = vmatpush3.bf16.msra.mxu1 %v1547_v38  ;;  %v1562_v53 = vld [vmem:[%s1783_s11 + $0x88] sm:$0xff]   ;;  %v1568_v56 = vld [vmem:[%s1785_s12 + $0x4] ss:$12 sps:$4 sm:$0xff]   ;;  %v1574_v0 = vld [vmem:[%s1785_s12 + $0x34] ss:$12 sps:$4 sm:$0xff]  }
  0x43   : > { %1470 = vmatprep.subr.bf16.mxu1 %v1550_v41  ;;  %v1569_v57 = vld [vmem:[%s1785_s12 + $0x8] ss:$12 sps:$4 sm:$0xff]   ;;  %v1564_v58 = vld [vmem:[%s1783_s11] sm:$0xff]   ;;  %748 = vmatprep.mubr.bf16.mxu0 %v1568_v56  ;;  %v1579_v4 = vld [vmem:[%s1785_s12 + $0x4c] ss:$12 sps:$4 sm:$0xff]  }
  0x44   : > { %1391 = vmatpush3.bf16.msra.mxu0 %v1549_v40  ;;  %1482 = vmatprep.mubr.bf16.mxu1 %v1569_v57  ;;  %v1566_v59 = vld [vmem:[%s1785_s12] ss:$12 sps:$4 sm:$0xff]   ;;  %v1571_v60 = vld [vmem:[%s1785_s12 + $0x1c] ss:$12 sps:$4 sm:$0xff]   ;;  %v1577_v62 = vld [vmem:[%s1785_s12 + $0x38] ss:$12 sps:$4 sm:$0xff]  }
  0x45   : > { %1392 = vmatprep.subr.bf16.mxu0 %v1551_v42  ;;  %v1570_v61 = vld [vmem:[%s1785_s12 + $0x20] ss:$12 sps:$4 sm:$0xff]   ;;  %v1573_v63 = vld [vmem:[%s1785_s12 + $0x18] ss:$12 sps:$4 sm:$0xff]   ;;  %v1585_v2 = vld [vmem:[%s1785_s12 + $0x68] ss:$12 sps:$4 sm:$0xff]  }
  0x46   : > { %1471 = vmatpush3.bf16.msra.mxu1 %v1550_v41  ;;  %v1586_v5 = vld [vmem:[%s1785_s12 + $0x80] ss:$12 sps:$4 sm:$0xff]   ;;  %v1593_v6 = vld [vmem:[%s1785_s12 + $0x98] ss:$12 sps:$4 sm:$0xff]   ;;  %v1581_v7 = vld [vmem:[%s1785_s12 + $0x48] ss:$12 sps:$4 sm:$0xff]  }
  0x47   : > { %1472 = vmatprep.subr.bf16.mxu1 %v1553_v44  ;;  %v1582_v8 = vld [vmem:[%s1785_s12 + $0x64] ss:$12 sps:$4 sm:$0xff]   ;;  %v1584_v10 = vld [vmem:[%s1785_s12 + $0x60] ss:$12 sps:$4 sm:$0xff]   ;;  %v1587_v11 = vld [vmem:[%s1785_s12 + $0x7c] ss:$12 sps:$4 sm:$0xff]  }
  0x48   : > { %1393 = vmatpush3.bf16.msra.mxu0 %v1552_v43  ;;  %v1594_v9 = vld [vmem:[%s1785_s12 + $0xb0] ss:$12 sps:$4 sm:$0xff]   ;;  %v1589_v12 = vld [vmem:[%s1785_s12 + $0x78] ss:$12 sps:$4 sm:$0xff]   ;;  %v1590_v13 = vld [vmem:[%s1785_s12 + $0x94] ss:$12 sps:$4 sm:$0xff]  }
  0x49   : > { %1394 = vmatprep.subr.bf16.mxu0 %v1554_v45  ;;  %v1592_v14 = vld [vmem:[%s1785_s12 + $0x90] ss:$12 sps:$4 sm:$0xff]   ;;  %v1595_v15 = vld [vmem:[%s1785_s12 + $0xac] ss:$12 sps:$4 sm:$0xff]   ;;  %v1597_v16 = vld [vmem:[%s1785_s12 + $0xa8] ss:$12 sps:$4 sm:$0xff]  }
  0x4a   : > { %1473 = vmatpush3.bf16.msra.mxu1 %v1553_v44  ;;  %v348_v22 = vld [vmem:[#allocation2 + $0x30] sm:$0xff]  ;;  %v349_v30 = vld [vmem:[#allocation2] sm:$0xff]  ;;  %v350_v37 = vld [vmem:[#allocation2 + $0x58] sm:$0xff] }
  0x4b   : > { %1474 = vmatprep.subr.bf16.mxu1 %v1556_v46  ;;  %v351_v44 = vld [vmem:[#allocation2 + $0x18] sm:$0xff] }
  0x4c   : > { %1395 = vmatpush3.bf16.msra.mxu0 %v1555_v47 }
  0x4d   : > { %1396 = vmatprep.subr.bf16.mxu0 %v1557_v48 }
  0x4e   : > { %1475 = vmatpush3.bf16.msra.mxu1 %v1556_v46 }
  0x4f   : > { %1476 = vmatprep.subr.bf16.mxu1 %v1559_v49 }
  0x50   : > { %1397 = vmatpush3.bf16.msra.mxu0 %v1558_v50 }
  0x51   : > { %1398 = vmatprep.subr.bf16.mxu0 %v1560_v51 }
  0x52   : > { %1477 = vmatpush3.bf16.msra.mxu1 %v1559_v49 }
  0x53   : > { %1478 = vmatprep.subr.bf16.mxu1 %v1562_v53 }
  0x54   : > { %1399 = vmatpush3.bf16.msra.mxu0 %v1561_v52  ;;  %v352_v52 = vld [vmem:[#allocation2 + $0x50] sm:$0xff] }
  0x55   : > { %1400 = vmatprep.subr.bf16.mxu0 %v1563_v54 }
  0x56   : > { %1479 = vmatpush3.bf16.msra.mxu1 %v1562_v53 }
  0x57   : > { %1480 = vmatprep.subr.bf16.mxu1 %v1565_v55 }
  0x58   : > { %1401 = vmatpush3.bf16.msra.mxu0 %v1564_v58 }
  0x5a   : > { %1481 = vmatpush3.bf16.msra.mxu1 %v1565_v55 }
  0x5b   : > { %749 = vmatmul.mubr.bf16.vlgmr.msra.gmra.mxu0 %v1566_v59  ;;  %v353_v59 = vld [vmem:[#allocation2 + $0x68] sm:$0xff] }
  0x5c   : > { %756 = vmatprep.mubr.bf16.mxu0 %v1571_v60 }
  0x5d   : > { %1483 = vmatmul.mubr.bf16.vlgmr.msra.gmra.mxu1 %v1570_v61 }
  0x5e   : > { %1486 = vmatprep.mubr.bf16.mxu1 %v1577_v62 }
  0x63   : > { %757 = vmatmul.mubr.bf16.gmra.mxu0 %v1573_v63 }
  0x64   : > { %764 = vmatprep.mubr.bf16.mxu0 %v1574_v0 }
  0x65   : > { %1487 = vmatmul.mubr.bf16.gmra.mxu1 %v1578_v1  ;;  %v354_v1 = vld [vmem:[#allocation2 + $0x8] sm:$0xff] }
  0x66   : > { %1490 = vmatprep.mubr.bf16.mxu1 %v1585_v2 }
  0x6b   : > { %765 = vmatmul.mubr.bf16.gmra.mxu0 %v1576_v3 }
  0x6c   : > { %772 = vmatprep.mubr.bf16.mxu0 %v1579_v4 }
  0x6d   : > { %1491 = vmatmul.mubr.bf16.gmra.mxu1 %v1586_v5 }
  0x6e   : > { %1494 = vmatprep.mubr.bf16.mxu1 %v1593_v6 }
  0x73   : > { %773 = vmatmul.mubr.bf16.gmra.mxu0 %v1581_v7 }
  0x74   : > { %780 = vmatprep.mubr.bf16.mxu0 %v1582_v8  ;;  %v355_v8 = vld [vmem:[#allocation2 + $0x48] sm:$0xff] }
  0x75   : > { %1495 = vmatmul.mubr.bf16.gmra.mxu1 %v1594_v9 }
  0x7b   : > { %781 = vmatmul.mubr.bf16.gmra.mxu0 %v1584_v10 }
  0x7c   : > { %788 = vmatprep.mubr.bf16.mxu0 %v1587_v11 }
  0x83   : > { %789 = vmatmul.mubr.bf16.gmra.mxu0 %v1589_v12 }
  0x84   : > { %796 = vmatprep.mubr.bf16.mxu0 %v1590_v13 }
  0x8b   : > { %797 = vmatmul.mubr.bf16.gmra.mxu0 %v1592_v14 }
  0x8c   : > { %804 = vmatprep.mubr.bf16.mxu0 %v1595_v15 }
  0x93   : > { %805 = vmatmul.mubr.bf16.gmra.mxu0 %v1597_v16  ;;  %v356_v16 = vld [vmem:[#allocation2 + $0x40] sm:$0xff] }
 0x11b   : > { %v1402_v17 = vpop.f32.mrf.mxu0 }
 0x11d   : > { %v1403_v18 = vpop.f32.mrf.mxu0  ;;  %v1484_v19 = vpop.f32.mrf.mxu1 }
 0x11e   : > { %v1404_v20 = vadd.f32 %v1403_v18, %v1402_v17 }
 0x11f   : > { %v1405_v21 = vpop.f32.mrf.mxu0  ;;  %v847_v23 = vpop.f32.mrf.mxu1 }
 0x120   : > { %v848_v24 = vadd.f32 %v1404_v20, %v847_v23  ;;  %v357_v23 = vld [vmem:[#allocation2 + $0x20] sm:$0xff] }
 0x121   : > { %v1406_v25 = vpop.f32.mrf.mxu0  ;;  %v1485_v26 = vpop.f32.mrf.mxu1 }
 0x122   : > { %v910_v27 = vadd.f32 %v848_v24, %v348_v22  ;;  %v1407_v28 = vadd.f32 %v1406_v25, %v1405_v21 }
 0x123   : > { %v1408_v29 = vpop.f32.mrf.mxu0  ;;  %v850_v31 = vpop.f32.mrf.mxu1 }
 0x124   : > { %926 = vst [vmem:[#allocation2 + $0x30] sm:$0xff] %v910_v27  ;;  %v851_v32 = vadd.f32 %v1407_v28, %v850_v31 }
 0x125   : > { %v1409_v33 = vpop.f32.mrf.mxu0  ;;  %v1488_v34 = vpop.f32.mrf.mxu1 }
 0x126   : > { %v911_v35 = vadd.f32 %v851_v32, %v349_v30  ;;  %v1410_v36 = vadd.f32 %v1409_v33, %v1408_v29  ;;  %v358_v29 = vld [vmem:[#allocation2 + $0x10] sm:$0xff] }
 0x127   : > { %v1411_v38 = vpop.f32.mrf.mxu0  ;;  %v863_v41 = vpop.f32.mrf.mxu1 }
 0x128   : > { %927 = vst [vmem:[#allocation2] sm:$0xff] %v911_v35  ;;  %v856_v39 = vadd.f32 %v1484_v19, %v1410_v36  ;;  %v359_v36 = vld [vmem:[#allocation2 + $0x38] sm:$0xff] }
 0x129   : > { %v1412_v40 = vpop.f32.mrf.mxu0  ;;  %v1489_v48 = vpop.f32.mrf.mxu1 }
 0x12a   : > { %v912_v42 = vadd.f32 %v856_v39, %v350_v37  ;;  %v1413_v43 = vadd.f32 %v1412_v40, %v1411_v38 }
 0x12b   : > { %v1414_v45 = vpop.f32.mrf.mxu0  ;;  %v866_v55 = vpop.f32.mrf.mxu1 }
 0x12c   : > { %928 = vst [vmem:[#allocation2 + $0x58] sm:$0xff] %v912_v42  ;;  %v859_v46 = vadd.f32 %v1485_v26, %v1413_v43 }
 0x12d   : > { %v1415_v47 = vpop.f32.mrf.mxu0  ;;  %v1492_v62 = vpop.f32.mrf.mxu1 }
 0x12e   : > { %v913_v49 = vadd.f32 %v859_v46, %v351_v44  ;;  %v1416_v50 = vadd.f32 %v1415_v47, %v1414_v45  ;;  %v360_v44 = vld [vmem:[#allocation2 + $0x60] sm:$0xff] }
 0x12f   : > { %v1417_v51 = vpop.f32.mrf.mxu0  ;;  %v879_v5 = vpop.f32.mrf.mxu1 }
 0x130   : > { %929 = vst [vmem:[#allocation2 + $0x18] sm:$0xff] %v913_v49  ;;  %v864_v53 = vadd.f32 %v1416_v50, %v863_v41 }
 0x131   : > { %v1418_v54 = vpop.f32.mrf.mxu0  ;;  %v1493_v12 = vpop.f32.mrf.mxu1 }
 0x132   : > { %v914_v56 = vadd.f32 %v864_v53, %v352_v52  ;;  %v1419_v57 = vadd.f32 %v1418_v54, %v1417_v51  ;;  %v361_v51 = vld [vmem:[#allocation2 + $0x70] sm:$0xff] }
 0x133   : > { %v1420_v58 = vpop.f32.mrf.mxu0  ;;  %v882_v19 = vpop.f32.mrf.mxu1 }
 0x134   : > { %930 = vst [vmem:[#allocation2 + $0x50] sm:$0xff] %v914_v56  ;;  %v867_v60 = vadd.f32 %v1419_v57, %v866_v55  ;;  %v362_v56 = vld [vmem:[#allocation2 + $0x78] sm:$0xff] }
 0x135   : > { %v1421_v61 = vpop.f32.mrf.mxu0  ;;  %v1496_v26 = vpop.f32.mrf.mxu1 }
 0x136   : > { %v915_v63 = vadd.f32 %v867_v60, %v353_v59  ;;  %v1422_v0 = vadd.f32 %v1421_v61, %v1420_v58 }
 0x137   : > { %v1423_v2 = vpop.f32.mrf.mxu0  ;;  %v895_v33 = vpop.f32.mrf.mxu1 }
 0x138   : > { %931 = vst [vmem:[#allocation2 + $0x68] sm:$0xff] %v915_v63  ;;  %v872_v3 = vadd.f32 %v1488_v34, %v1422_v0 }
 0x139   : > { %v1424_v4 = vpop.f32.mrf.mxu0  ;;  %v1497_v40 = vpop.f32.mrf.mxu1 }
 0x13a   : > { %v916_v6 = vadd.f32 %v872_v3, %v354_v1  ;;  %v1425_v7 = vadd.f32 %v1424_v4, %v1423_v2  ;;  %v1639_v1 = vmov (%p942_p11), 0.0  }
 0x13b   : > { %v1426_v9 = vpop.f32.mrf.mxu0  ;;  %v898_v47 = vpop.f32.mrf.mxu1  ;;  %948 = vst [vmem:[%s1900_s3] sm:$0x1] (%p942_p11), %v1639_v1  ;;  %949 = vst [vmem:[%s1901_s4] sm:$0x1] (%p942_p11), %v1639_v1 }
 0x13c   : > { %932 = vst [vmem:[#allocation2 + $0x8] sm:$0xff] %v916_v6  ;;  %v875_v10 = vadd.f32 %v1489_v48, %v1425_v7 }
 0x13d   : > { %v1427_v11 = vpop.f32.mrf.mxu0 }
 0x13e   : > { %v917_v13 = vadd.f32 %v875_v10, %v355_v8  ;;  %v1428_v14 = vadd.f32 %v1427_v11, %v1426_v9 }
 0x13f   : > { %v1429_v15 = vpop.f32.mrf.mxu0 }
 0x140   : > { %933 = vst [vmem:[#allocation2 + $0x48] sm:$0xff] %v917_v13  ;;  %v880_v17 = vadd.f32 %v1428_v14, %v879_v5 }
 0x141   : > { %v1430_v18 = vpop.f32.mrf.mxu0 }
 0x142   : > { %v918_v20 = vadd.f32 %v880_v17, %v356_v16  ;;  %v1431_v21 = vadd.f32 %v1430_v18, %v1429_v15 }
 0x143   : > { %v1432_v22 = vpop.f32.mrf.mxu0 }
 0x144   : > { %934 = vst [vmem:[#allocation2 + $0x40] sm:$0xff] %v918_v20  ;;  %v883_v24 = vadd.f32 %v1431_v21, %v882_v19 }
 0x145   : > { %v1433_v25 = vpop.f32.mrf.mxu0 }
 0x146   : > { %v919_v27 = vadd.f32 %v883_v24, %v357_v23  ;;  %v1434_v28 = vadd.f32 %v1433_v25, %v1432_v22 }
 0x147   : > { %v1435_v30 = vpop.f32.mrf.mxu0 }
 0x148   : > { %935 = vst [vmem:[#allocation2 + $0x20] sm:$0xff] %v919_v27  ;;  %v888_v31 = vadd.f32 %v1492_v62, %v1434_v28  ;;  %v363_v62 = vld [vmem:[#allocation2 + $0x28] sm:$0xff] }
 0x149   : > { %v1436_v32 = vpop.f32.mrf.mxu0 }
 0x14a   : > { %v920_v34 = vadd.f32 %v888_v31, %v358_v29  ;;  %v1437_v35 = vadd.f32 %v1436_v32, %v1435_v30 }
 0x14b   : > { %v1438_v37 = vpop.f32.mrf.mxu0 }
 0x14c   : > { %936 = vst [vmem:[#allocation2 + $0x10] sm:$0xff] %v920_v34  ;;  %v891_v38 = vadd.f32 %v1493_v12, %v1437_v35 }
 0x14d   : > { %v1439_v39 = vpop.f32.mrf.mxu0 }
 0x14e   : > { %v921_v41 = vadd.f32 %v891_v38, %v359_v36  ;;  %v1440_v42 = vadd.f32 %v1439_v39, %v1438_v37 }
 0x14f   : > { %v1441_v43 = vpop.f32.mrf.mxu0 }
 0x150   : > { %937 = vst [vmem:[#allocation2 + $0x38] sm:$0xff] %v921_v41  ;;  %v896_v45 = vadd.f32 %v1440_v42, %v895_v33 }
 0x151   : > { %v1442_v46 = vpop.f32.mrf.mxu0 }
 0x152   : > { %v922_v48 = vadd.f32 %v896_v45, %v360_v44  ;;  %v1443_v49 = vadd.f32 %v1442_v46, %v1441_v43 }
 0x153   : > { %v1444_v50 = vpop.f32.mrf.mxu0 }
 0x154   : > { %938 = vst [vmem:[#allocation2 + $0x60] sm:$0xff] %v922_v48  ;;  %v899_v52 = vadd.f32 %v1443_v49, %v898_v47 }
 0x155   : > { %v1445_v53 = vpop.f32.mrf.mxu0 }
 0x156   : > { %v923_v54 = vadd.f32 %v899_v52, %v361_v51  ;;  %v1446_v55 = vadd.f32 %v1445_v53, %v1444_v50 }
 0x157   : > { %v1447_v57 = vpop.f32.mrf.mxu0 }
 0x158   : > { %939 = vst [vmem:[#allocation2 + $0x70] sm:$0xff] %v923_v54  ;;  %v904_v58 = vadd.f32 %v1496_v26, %v1446_v55 }
 0x159   : > { %v1448_v59 = vpop.f32.mrf.mxu0 }
 0x15a   : > { %v924_v60 = vadd.f32 %v904_v58, %v362_v56  ;;  %v1449_v61 = vadd.f32 %v1448_v59, %v1447_v57 }
 0x15c   : > { %940 = vst [vmem:[#allocation2 + $0x78] sm:$0xff] %v924_v60  ;;  %v907_v63 = vadd.f32 %v1497_v40, %v1449_v61  ;;  %947 = sbr.rel (!%p942_p11) target bundleno = 353 (0x161), region = 62 }
 0x15e   : > { %v925_v0 = vadd.f32 %v907_v63, %v363_v62 }
 0x160   : > { %941 = vst [vmem:[#allocation2 + $0x28] sm:$0xff] %v925_v0 }
 0x161 PF: > { %p1300_p12 = scmp.ne.s32.totalorder %s1628_s17, 2 }
 0x163   : > { %952 = sbr.rel (%p1300_p12) target bundleno = 408 (0x198), region = 66 }
 0x168   : > { %v953_v2 = vld [vmem:[#allocation2 + $0x30] sm:$0xff]  ;;  %v954_v3 = vld [vmem:[#allocation2] sm:$0xff]  ;;  %v955_v4 = vld [vmem:[#allocation2 + $0x58] sm:$0xff] }
 0x169   : > { %v1342_v5 = vpack.c.bf16 %v954_v3, %v953_v2  ;;  %v1050_v6 = vadd.f32 %v954_v3, %v953_v2  ;;  %v1074_v7 = vmul.f32 %v953_v2, %v953_v2  ;;  %v1075_v8 = vmul.f32 %v954_v3, %v954_v3  ;;  %v956_v9 = vld [vmem:[#allocation2 + $0x18] sm:$0xff]  ;;  %v957_v10 = vld [vmem:[#allocation2 + $0x50] sm:$0xff]  ;;  %v958_v11 = vld [vmem:[#allocation2 + $0x68] sm:$0xff] }
 0x16a   : > { %v1347_v12 = vpack.c.bf16 %v956_v9, %v955_v4  ;;  %v1076_v13 = vmul.f32 %v955_v4, %v955_v4  ;;  %v1352_v14 = vpack.c.bf16 %v958_v11, %v957_v10  ;;  %v959_v15 = vld [vmem:[#allocation2 + $0x8] sm:$0xff]  ;;  %v1077_v18 = vmul.f32 %v956_v9, %v956_v9  ;;  %v961_v20 = vld [vmem:[#allocation2 + $0x40] sm:$0xff]  ;;  %v963_v24 = vld [vmem:[#allocation2 + $0x10] sm:$0xff] }
 0x16b   : > { %1343 = vst [vmem:[%s1899_s2] sm:$0xff] %v1342_v5   ;;  %v1090_v16 = vadd.f32 %v1075_v8, %v1074_v7  ;;  %v1051_v17 = vadd.f32 %v1050_v6, %v955_v4  ;;  %v960_v19 = vld [vmem:[#allocation2 + $0x48] sm:$0xff]  ;;  %v962_v21 = vld [vmem:[#allocation2 + $0x20] sm:$0xff]  ;;  %v1078_v27 = vmul.f32 %v957_v10, %v957_v10  ;;  %v964_v28 = vld [vmem:[#allocation2 + $0x38] sm:$0xff]  ;;  %v1079_v35 = vmul.f32 %v958_v11, %v958_v11 }
 0x16c   : > { %1379 = vst [vmem:[%s1899_s2 + $0x8] sm:$0xff] %v1347_v12   ;;  %1380 = vst [vmem:[%s1899_s2 + $0x10] sm:$0xff] %v1352_v14   ;;  %v1357_v22 = vpack.c.bf16 %v960_v19, %v959_v15  ;;  %v1362_v23 = vpack.c.bf16 %v962_v21, %v961_v20  ;;  %v965_v29 = vld [vmem:[#allocation2 + $0x60] sm:$0xff]  ;;  %v966_v30 = vld [vmem:[#allocation2 + $0x70] sm:$0xff]  ;;  %v1367_v31 = vpack.c.bf16 %v964_v28, %v963_v24 }
 0x16d   : > { %v1052_v25 = vadd.f32 %v1051_v17, %v956_v9  ;;  %v1091_v26 = vadd.f32 %v1090_v16, %v1076_v13  ;;  %v1372_v32 = vpack.c.bf16 %v966_v30, %v965_v29  ;;  %v967_v36 = vld [vmem:[#allocation2 + $0x78] sm:$0xff]  ;;  %v968_v37 = vld [vmem:[#allocation2 + $0x28] sm:$0xff]  ;;  %v1080_v41 = vmul.f32 %v959_v15, %v959_v15  ;;  %v1049_v17 = vld [vmem:[%s1900_s3] sm:$0x1] }
 0x16e   : > { %1381 = vst [vmem:[%s1899_s2 + $0x18] sm:$0xff] %v1357_v22   ;;  %1382 = vst [vmem:[%s1899_s2 + $0x20] sm:$0xff] %v1362_v23   ;;  %v1377_v38 = vpack.c.bf16 %v968_v37, %v967_v36  ;;  %v1081_v44 = vmul.f32 %v960_v19, %v960_v19  ;;  %v1082_v47 = vmul.f32 %v961_v20, %v961_v20 }
 0x16f   : > { %v1092_v33 = vadd.f32 %v1091_v26, %v1077_v18  ;;  %v1053_v34 = vadd.f32 %v1052_v25, %v957_v10  ;;  %1383 = vst [vmem:[%s1899_s2 + $0x28] sm:$0xff] %v1367_v31   ;;  %1384 = vst [vmem:[%s1899_s2 + $0x30] sm:$0xff] %v1372_v32   ;;  %v1083_v50 = vmul.f32 %v962_v21, %v962_v21 }
 0x170   : > { %1385 = vst [vmem:[%s1899_s2 + $0x38] sm:$0xff] %v1377_v38   ;;  %v1084_v53 = vmul.f32 %v963_v24, %v963_v24  ;;  %v1085_v56 = vmul.f32 %v964_v28, %v964_v28  ;;  %v1086_v59 = vmul.f32 %v965_v29, %v965_v29  ;;  %v1087_v62 = vmul.f32 %v966_v30, %v966_v30 }
 0x171   : > { %v1054_v39 = vadd.f32 %v1053_v34, %v958_v11  ;;  %v1093_v40 = vadd.f32 %v1092_v33, %v1078_v27  ;;  %v1088_v1 = vmul.f32 %v967_v36, %v967_v36  ;;  %v1089_v4 = vmul.f32 %v968_v37, %v968_v37 }
 0x173   : > { %v1094_v42 = vadd.f32 %v1093_v40, %v1079_v35  ;;  %v1055_v43 = vadd.f32 %v1054_v39, %v959_v15 }
 0x175   : > { %v1056_v45 = vadd.f32 %v1055_v43, %v960_v19  ;;  %v1095_v46 = vadd.f32 %v1094_v42, %v1080_v41 }
 0x177   : > { %v1096_v48 = vadd.f32 %v1095_v46, %v1081_v44  ;;  %v1057_v49 = vadd.f32 %v1056_v45, %v961_v20  ;;  %v1073_v20 = vld [vmem:[%s1901_s4] sm:$0x1] }
 0x179   : > { %v1058_v51 = vadd.f32 %v1057_v49, %v962_v21  ;;  %v1097_v52 = vadd.f32 %v1096_v48, %v1082_v47 }
 0x17b   : > { %v1098_v54 = vadd.f32 %v1097_v52, %v1083_v50  ;;  %v1059_v55 = vadd.f32 %v1058_v51, %v963_v24 }
 0x17d   : > { %v1060_v57 = vadd.f32 %v1059_v55, %v964_v28  ;;  %v1099_v58 = vadd.f32 %v1098_v54, %v1084_v53 }
 0x17f   : > { %v1100_v60 = vadd.f32 %v1099_v58, %v1085_v56  ;;  %v1061_v61 = vadd.f32 %v1060_v57, %v965_v29 }
 0x181   : > { %v1062_v63 = vadd.f32 %v1061_v61, %v966_v30  ;;  %v1101_v0 = vadd.f32 %v1100_v60, %v1086_v59 }
 0x183   : > { %v1102_v2 = vadd.f32 %v1101_v0, %v1087_v62  ;;  %v1063_v3 = vadd.f32 %v1062_v63, %v967_v36 }
 0x185   : > { %v1064_v5 = vadd.f32 %v1063_v3, %v968_v37  ;;  %v1103_v6 = vadd.f32 %v1102_v2, %v1088_v1 }
 0x187   : > { %v1065_v7 = vrot.slane %v1064_v5, 4  ;;  %v1104_v8 = vadd.f32 %v1103_v6, %v1089_v4 }
 0x189   : > { %v1066_v9 = vadd.f32 %v1065_v7, %v1064_v5  ;;  %v1105_v10 = vrot.slane %v1104_v8, 4 }
 0x18b   : > { %v1067_v11 = vrot.slane %v1066_v9, 2  ;;  %v1106_v12 = vadd.f32 %v1105_v10, %v1104_v8 }
 0x18d   : > { %v1068_v13 = vadd.f32 %v1067_v11, %v1066_v9  ;;  %v1107_v14 = vrot.slane %v1106_v12, 2 }
 0x18f   : > { %v1069_v15 = vrot.slane %v1068_v13, 1  ;;  %v1108_v16 = vadd.f32 %v1107_v14, %v1106_v12 }
 0x191   : > { %v1070_v18 = vadd.f32 %v1069_v15, %v1068_v13  ;;  %v1109_v19 = vrot.slane %v1108_v16, 1 }
 0x193   : > { %v1071_v21 = vadd.f32 %v1070_v18, %v1049_v17  ;;  %v1110_v22 = vadd.f32 %v1109_v19, %v1108_v16 }
 0x195   : > { %1072 = vst [vmem:[%s1900_s3] sm:$0x1] %v1071_v21  ;;  %v1111_v23 = vadd.f32 %v1110_v22, %v1073_v20 }
 0x197   : > { %1112 = vst [vmem:[%s1901_s4] sm:$0x1] %v1111_v23 }
 0x198 PF: > { %s15_s19 = sadd.s32 1, %s1636_s19   ;;  %s1902_s15 = smov %s1624_s16 }
 0x199   : > { %p12_p13 = scmp.ge.s32.totalorder %s15_s19, 5   ;;  %s1903_s16 = smov %s1700_s23 }
 0x19a   : > { %s1904_s17 = smov %s1632_s18  ;;  %s1905_s18 = smov %s1907_s20 }
 0x19b   :  { %14 = sbr.rel (!%p12_p13) target bundleno = 3 (0x3), region = 126 }

// kernel: forward.54
= control target key start
LH: loop header
LB: loop body
LE: loop exit
PB: predicated region body
PF: predicated region fallthrough
CT: control target
= control target key end

     0   :  { %s647_s0 = inlined_call_operand.vmem [shape: bf16[128,128], index: 0, kind: input, shape index: {}]   ;;  %s648_s1 = inlined_call_operand.vmem [shape: f32[1,128], index: 1, kind: input, shape index: {}]   ;;  %s649_s2 = inlined_call_operand.vmem [shape: f32[1,128], index: 2, kind: input, shape index: {}]   ;;  %s650_s3 = inlined_call_operand.vmem [shape: bf16[128,128], index: 3, kind: input, shape index: {}]   ;;  %s651_s4 = inlined_call_operand.vmem [shape: f32[1,128], index: 4, kind: input, shape index: {}]   ;;  %s652_s5 = inlined_call_operand.vmem [shape: f32[1,128], index: 5, kind: input, shape index: {}]   ;;  %s653_s6 = inlined_call_operand.vmem [shape: bf16[128,128], index: 6, kind: output, shape index: {}]  }
   0x1   :  { %v332_v0 = vld [vmem:[%s647_s0] sm:$0xff]   ;;  %v435_v9 = vld [vmem:[%s647_s0 + $0x8] sm:$0xff]   ;;  %v436_v20 = vld [vmem:[%s647_s0 + $0x10] sm:$0xff]  }
   0x2   :  { %v497_v1 = vld [vmem:[%s648_s1] ss:$0 sm:$0xff]  ;;  %v333_v2 = vunpack.c.l.bf16 %v332_v0  ;;  %v334_v3 = vunpack.c.h.bf16 %v332_v0  ;;  %v442_v10 = vld [vmem:[%s650_s3 + $0x8] sm:$0xff]   ;;  %v337_v14 = vunpack.c.l.bf16 %v435_v9  ;;  %v338_v15 = vunpack.c.h.bf16 %v435_v9  ;;  %v443_v29 = vld [vmem:[%s650_s3 + $0x10] sm:$0xff]  }
   0x3   :  { %v364_v4 = vld [vmem:[%s650_s3] sm:$0xff]   ;;  %v369_v18 = vunpack.c.l.bf16 %v442_v10  ;;  %v370_v19 = vunpack.c.h.bf16 %v442_v10  ;;  %v341_v32 = vunpack.c.l.bf16 %v436_v20  ;;  %v342_v33 = vunpack.c.h.bf16 %v436_v20  ;;  %v437_v42 = vld [vmem:[%s647_s0 + $0x18] sm:$0xff]  }
   0x4   :  { %v505_v5 = vld [vmem:[%s651_s4] ss:$0 sm:$0xff]  ;;  %v365_v7 = vunpack.c.l.bf16 %v364_v4  ;;  %v366_v8 = vunpack.c.h.bf16 %v364_v4  ;;  %v62_v11 = vmul.f32 %v333_v2, %v497_v1  ;;  %v63_v12 = vmul.f32 %v334_v3, %v497_v1  ;;  %v444_v47 = vld [vmem:[%s650_s3 + $0x18] sm:$0xff]  }
   0x5   :  { %v510_v6 = vld [vmem:[%s649_s2] ss:$0 sm:$0xff]  ;;  %v64_v23 = vmul.f32 %v337_v14, %v497_v1  ;;  %v65_v24 = vmul.f32 %v338_v15, %v497_v1  ;;  %v142_v27 = vmul.f32 %v369_v18, %v505_v5  ;;  %v143_v28 = vmul.f32 %v370_v19, %v505_v5  ;;  %v439_v14 = vld [vmem:[%s647_s0 + $0x28] sm:$0xff]  }
   0x6   :  { %v523_v13 = vld [vmem:[%s652_s5] ss:$0 sm:$0xff]  ;;  %v140_v16 = vmul.f32 %v365_v7, %v505_v5  ;;  %v141_v17 = vmul.f32 %v366_v8, %v505_v5  ;;  %v85_v21 = vadd.f32 %v510_v6, %v62_v11  ;;  %v86_v22 = vadd.f32 %v510_v6, %v63_v12 }
   0x7   :  { %v87_v30 = vadd.f32 %v510_v6, %v64_v23  ;;  %v88_v31 = vadd.f32 %v510_v6, %v65_v24  ;;  %v165_v36 = vadd.f32 %v523_v13, %v142_v27  ;;  %v166_v37 = vadd.f32 %v523_v13, %v143_v28  ;;  %v438_v52 = vld [vmem:[%s647_s0 + $0x20] sm:$0xff]   ;;  %v446_v23 = vld [vmem:[%s650_s3 + $0x28] sm:$0xff]  }
   0x8   :  { %v163_v25 = vadd.f32 %v523_v13, %v140_v16  ;;  %v164_v26 = vadd.f32 %v523_v13, %v141_v17  ;;  %v66_v38 = vmul.f32 %v341_v32, %v497_v1  ;;  %v67_v39 = vmul.f32 %v342_v33, %v497_v1  ;;  %v445_v8 = vld [vmem:[%s650_s3 + $0x20] sm:$0xff]   ;;  %v440_v32 = vld [vmem:[%s647_s0 + $0x30] sm:$0xff]  }
   0x9   :  { %v373_v40 = vunpack.c.l.bf16 %v443_v29  ;;  %v374_v41 = vunpack.c.h.bf16 %v443_v29  ;;  %v181_v45 = vadd.f32 %v165_v36, %v87_v30  ;;  %v182_v46 = vadd.f32 %v166_v37, %v88_v31 }
   0xa   :  { %v179_v34 = vadd.f32 %v163_v25, %v85_v21  ;;  %v180_v35 = vadd.f32 %v164_v26, %v86_v22  ;;  %v89_v48 = vadd.f32 %v510_v6, %v66_v38  ;;  %v90_v49 = vadd.f32 %v510_v6, %v67_v39 }
   0xb   :  { %v144_v50 = vmul.f32 %v373_v40, %v505_v5  ;;  %v145_v51 = vmul.f32 %v374_v41, %v505_v5  ;;  %v197_v54 = vmax.f32 %v181_v45, 0.0  ;;  %v198_v55 = vmax.f32 %v182_v46, 0.0  ;;  %v447_v45 = vld [vmem:[%s650_s3 + $0x30] sm:$0xff]  }
   0xc   :  { %v195_v43 = vmax.f32 %v179_v34, 0.0  ;;  %v196_v44 = vmax.f32 %v180_v35, 0.0  ;;  %v345_v56 = vunpack.c.l.bf16 %v437_v42  ;;  %v346_v59 = vunpack.c.h.bf16 %v437_v42 }
   0xd   :  { %v167_v57 = vadd.f32 %v523_v13, %v144_v50  ;;  %v168_v58 = vadd.f32 %v523_v13, %v145_v51  ;;  %v377_v60 = vunpack.c.l.bf16 %v444_v47  ;;  %v403_v61 = vpack.c.bf16 %v198_v55, %v197_v54  ;;  %v441_v54 = vld [vmem:[%s647_s0 + $0x38] sm:$0xff]  }
   0xe   :  { %v398_v53 = vpack.c.bf16 %v196_v44, %v195_v43  ;;  %v68_v62 = vmul.f32 %v345_v56, %v497_v1  ;;  %v378_v63 = vunpack.c.h.bf16 %v444_v47  ;;  %v349_v0 = vunpack.c.l.bf16 %v438_v52 }
   0xf   :  { %v183_v2 = vadd.f32 %v167_v57, %v89_v48  ;;  %v184_v3 = vadd.f32 %v168_v58, %v90_v49  ;;  %v69_v4 = vmul.f32 %v346_v59, %v497_v1  ;;  %v146_v7 = vmul.f32 %v377_v60, %v505_v5  ;;  %449 = vst [vmem:[%s653_s6 + $0x8] sm:$0xff] %v403_v61  }
  0x10   :  { %399 = vst [vmem:[%s653_s6] sm:$0xff] %v398_v53   ;;  %v91_v9 = vadd.f32 %v510_v6, %v68_v62  ;;  %v147_v10 = vmul.f32 %v378_v63, %v505_v5  ;;  %v350_v11 = vunpack.c.h.bf16 %v438_v52  ;;  %v70_v12 = vmul.f32 %v349_v0, %v497_v1 }
  0x11   :  { %v199_v15 = vmax.f32 %v183_v2, 0.0  ;;  %v200_v16 = vmax.f32 %v184_v3, 0.0  ;;  %v92_v17 = vadd.f32 %v510_v6, %v69_v4  ;;  %v169_v18 = vadd.f32 %v523_v13, %v146_v7  ;;  %v448_v4 = vld [vmem:[%s650_s3 + $0x38] sm:$0xff]  }
  0x12   :  { %v170_v19 = vadd.f32 %v523_v13, %v147_v10  ;;  %v71_v20 = vmul.f32 %v350_v11, %v497_v1  ;;  %v93_v21 = vadd.f32 %v510_v6, %v70_v12  ;;  %v381_v22 = vunpack.c.l.bf16 %v445_v8 }
  0x13   :  { %v408_v24 = vpack.c.bf16 %v200_v16, %v199_v15  ;;  %v185_v25 = vadd.f32 %v169_v18, %v91_v9  ;;  %v382_v26 = vunpack.c.h.bf16 %v445_v8  ;;  %v353_v27 = vunpack.c.l.bf16 %v439_v14 }
  0x14   :  { %v186_v28 = vadd.f32 %v170_v19, %v92_v17  ;;  %v94_v29 = vadd.f32 %v510_v6, %v71_v20  ;;  %v148_v30 = vmul.f32 %v381_v22, %v505_v5  ;;  %v354_v31 = vunpack.c.h.bf16 %v439_v14 }
  0x15   :  { %450 = vst [vmem:[%s653_s6 + $0x10] sm:$0xff] %v408_v24   ;;  %v201_v33 = vmax.f32 %v185_v25, 0.0  ;;  %v149_v34 = vmul.f32 %v382_v26, %v505_v5  ;;  %v72_v35 = vmul.f32 %v353_v27, %v497_v1  ;;  %v385_v36 = vunpack.c.l.bf16 %v446_v23 }
  0x16   :  { %v202_v37 = vmax.f32 %v186_v28, 0.0  ;;  %v171_v38 = vadd.f32 %v523_v13, %v148_v30  ;;  %v73_v39 = vmul.f32 %v354_v31, %v497_v1  ;;  %v386_v40 = vunpack.c.h.bf16 %v446_v23 }
  0x17   :  { %v172_v41 = vadd.f32 %v523_v13, %v149_v34  ;;  %v95_v42 = vadd.f32 %v510_v6, %v72_v35  ;;  %v150_v43 = vmul.f32 %v385_v36, %v505_v5  ;;  %v357_v44 = vunpack.c.l.bf16 %v440_v32 }
  0x18   :  { %v413_v46 = vpack.c.bf16 %v202_v37, %v201_v33  ;;  %v187_v47 = vadd.f32 %v171_v38, %v93_v21  ;;  %v96_v48 = vadd.f32 %v510_v6, %v73_v39  ;;  %v151_v49 = vmul.f32 %v386_v40, %v505_v5 }
  0x19   :  { %v188_v50 = vadd.f32 %v172_v41, %v94_v29  ;;  %v173_v51 = vadd.f32 %v523_v13, %v150_v43  ;;  %v358_v52 = vunpack.c.h.bf16 %v440_v32  ;;  %v74_v53 = vmul.f32 %v357_v44, %v497_v1 }
  0x1a   :  { %451 = vst [vmem:[%s653_s6 + $0x18] sm:$0xff] %v413_v46   ;;  %v203_v55 = vmax.f32 %v187_v47, 0.0  ;;  %v174_v56 = vadd.f32 %v523_v13, %v151_v49  ;;  %v389_v57 = vunpack.c.l.bf16 %v447_v45  ;;  %v390_v58 = vunpack.c.h.bf16 %v447_v45 }
  0x1b   :  { %v204_v59 = vmax.f32 %v188_v50, 0.0  ;;  %v189_v60 = vadd.f32 %v173_v51, %v95_v42  ;;  %v75_v61 = vmul.f32 %v358_v52, %v497_v1  ;;  %v97_v62 = vadd.f32 %v510_v6, %v74_v53 }
  0x1c   :  { %v190_v63 = vadd.f32 %v174_v56, %v96_v48  ;;  %v152_v0 = vmul.f32 %v389_v57, %v505_v5  ;;  %v153_v2 = vmul.f32 %v390_v58, %v505_v5  ;;  %v361_v3 = vunpack.c.l.bf16 %v441_v54 }
  0x1d   :  { %v418_v7 = vpack.c.bf16 %v204_v59, %v203_v55  ;;  %v205_v8 = vmax.f32 %v189_v60, 0.0  ;;  %v98_v9 = vadd.f32 %v510_v6, %v75_v61  ;;  %v362_v10 = vunpack.c.h.bf16 %v441_v54 }
  0x1e   :  { %v206_v11 = vmax.f32 %v190_v63, 0.0  ;;  %v175_v12 = vadd.f32 %v523_v13, %v152_v0  ;;  %v176_v14 = vadd.f32 %v523_v13, %v153_v2  ;;  %v76_v15 = vmul.f32 %v361_v3, %v497_v1 }
  0x1f   :  { %452 = vst [vmem:[%s653_s6 + $0x20] sm:$0xff] %v418_v7   ;;  %v77_v16 = vmul.f32 %v362_v10, %v497_v1  ;;  %v393_v17 = vunpack.c.l.bf16 %v448_v4  ;;  %v394_v18 = vunpack.c.h.bf16 %v448_v4 }
  0x20   :  { %v423_v19 = vpack.c.bf16 %v206_v11, %v205_v8  ;;  %v191_v20 = vadd.f32 %v175_v12, %v97_v62  ;;  %v192_v21 = vadd.f32 %v176_v14, %v98_v9  ;;  %v99_v22 = vadd.f32 %v510_v6, %v76_v15 }
  0x21   :  { %v100_v23 = vadd.f32 %v510_v6, %v77_v16  ;;  %v154_v24 = vmul.f32 %v393_v17, %v505_v5  ;;  %v155_v25 = vmul.f32 %v394_v18, %v505_v5 }
  0x22   :  { %453 = vst [vmem:[%s653_s6 + $0x28] sm:$0xff] %v423_v19   ;;  %v207_v26 = vmax.f32 %v191_v20, 0.0  ;;  %v208_v27 = vmax.f32 %v192_v21, 0.0 }
  0x23   :  { %v177_v1 = vadd.f32 %v523_v13, %v154_v24  ;;  %v178_v28 = vadd.f32 %v523_v13, %v155_v25 }
  0x24   :  { %v428_v29 = vpack.c.bf16 %v208_v27, %v207_v26 }
  0x25   :  { %v193_v30 = vadd.f32 %v177_v1, %v99_v22  ;;  %v194_v31 = vadd.f32 %v178_v28, %v100_v23 }
  0x26   :  { %454 = vst [vmem:[%s653_s6 + $0x30] sm:$0xff] %v428_v29  }
  0x27   :  { %v209_v6 = vmax.f32 %v193_v30, 0.0  ;;  %v210_v32 = vmax.f32 %v194_v31, 0.0 }
  0x29   :  { %v433_v5 = vpack.c.bf16 %v210_v32, %v209_v6 }
  0x2b   :  { %455 = vst [vmem:[%s653_s6 + $0x38] sm:$0xff] %v433_v5  }

// kernel: forward.52
= control target key start
LH: loop header
LB: loop body
LE: loop exit
PB: predicated region body
PF: predicated region fallthrough
CT: control target
= control target key end

     0   :  { %v666_v16 = vmov 0.0   ;;  %s782_s1 = inlined_call_operand.vmem [shape: bf16[128,128], index: 1, kind: input, shape index: {}]   ;;  %s783_s0 = inlined_call_operand.vmem [shape: bf16[128,128], index: 0, kind: input, shape index: {}]   ;;  %s784_s3 = inlined_call_operand.vmem [shape: f32[1,128], index: 3, kind: output, shape index: {1}]   ;;  %s785_s4 = inlined_call_operand.vmem [shape: f32[1,128], index: 4, kind: output, shape index: {2}]   ;;  %s786_s2 = inlined_call_operand.vmem [shape: bf16[128,128], index: 2, kind: output, shape index: {0}]  }
   0x1   :  { %v650_v0 = vld [vmem:[%s782_s1 + $0x38] sm:$0xff]   ;;  %v651_v1 = vld [vmem:[%s782_s1 + $0x30] sm:$0xff]   ;;  %v652_v2 = vld [vmem:[%s782_s1 + $0x28] sm:$0xff]   ;;  %313 = vst [vmem:[%s784_s3] sm:$0x1] %v666_v16 }
   0x2   :  { %601 = vmatprep.subr.bf16.mxu0 %v650_v0  ;;  %633 = vmatprep.subr.bf16.mxu1 %v650_v0  ;;  %v653_v3 = vld [vmem:[%s782_s1 + $0x20] sm:$0xff]   ;;  %v654_v5 = vld [vmem:[%s782_s1 + $0x18] sm:$0xff]   ;;  %v655_v7 = vld [vmem:[%s782_s1 + $0x10] sm:$0xff]   ;;  %314 = vst [vmem:[%s785_s4] sm:$0x1] %v666_v16 }
   0x3   :  { %602 = vmatpush3.bf16.msra.mxu0 %v650_v0  ;;  %641 = vmatpush3.bf16.msra.mxu1 %v650_v0  ;;  %v658_v4 = vld [vmem:[%s783_s0] sm:$0xff]   ;;  %v656_v8 = vld [vmem:[%s782_s1 + $0x8] sm:$0xff]   ;;  %v660_v12 = vld [vmem:[%s783_s0 + $0x10] sm:$0xff]  }
   0x4   :  { %603 = vmatprep.subr.bf16.mxu0 %v651_v1  ;;  %634 = vmatprep.subr.bf16.mxu1 %v651_v1  ;;  %v662_v6 = vld [vmem:[%s783_s0 + $0x20] sm:$0xff]   ;;  %v659_v10 = vld [vmem:[%s783_s0 + $0x8] sm:$0xff]   ;;  %v664_v13 = vld [vmem:[%s783_s0 + $0x30] sm:$0xff]  }
   0x5   :  { %617 = vmatprep.mubr.bf16.mxu0 %v658_v4  ;;  %625 = vmatprep.mubr.bf16.mxu1 %v662_v6  ;;  %v657_v9 = vld [vmem:[%s782_s1] sm:$0xff]   ;;  %v663_v11 = vld [vmem:[%s783_s0 + $0x28] sm:$0xff]   ;;  %v661_v14 = vld [vmem:[%s783_s0 + $0x18] sm:$0xff]  }
   0x6   :  { %v665_v15 = vld [vmem:[%s783_s0 + $0x38] sm:$0xff]  }
   0x7   :  { %604 = vmatpush3.bf16.msra.mxu0 %v651_v1  ;;  %642 = vmatpush3.bf16.msra.mxu1 %v651_v1 }
   0x8   :  { %605 = vmatprep.subr.bf16.mxu0 %v652_v2  ;;  %635 = vmatprep.subr.bf16.mxu1 %v652_v2 }
   0xb   :  { %606 = vmatpush3.bf16.msra.mxu0 %v652_v2  ;;  %643 = vmatpush3.bf16.msra.mxu1 %v652_v2 }
   0xc   :  { %607 = vmatprep.subr.bf16.mxu0 %v653_v3  ;;  %636 = vmatprep.subr.bf16.mxu1 %v653_v3 }
   0xf   :  { %608 = vmatpush3.bf16.msra.mxu0 %v653_v3  ;;  %644 = vmatpush3.bf16.msra.mxu1 %v653_v3 }
  0x10   :  { %609 = vmatprep.subr.bf16.mxu0 %v654_v5  ;;  %637 = vmatprep.subr.bf16.mxu1 %v654_v5 }
  0x13   :  { %610 = vmatpush3.bf16.msra.mxu0 %v654_v5  ;;  %645 = vmatpush3.bf16.msra.mxu1 %v654_v5 }
  0x14   :  { %611 = vmatprep.subr.bf16.mxu0 %v655_v7  ;;  %638 = vmatprep.subr.bf16.mxu1 %v655_v7 }
  0x17   :  { %612 = vmatpush3.bf16.msra.mxu0 %v655_v7  ;;  %646 = vmatpush3.bf16.msra.mxu1 %v655_v7 }
  0x18   :  { %613 = vmatprep.subr.bf16.mxu0 %v656_v8  ;;  %639 = vmatprep.subr.bf16.mxu1 %v656_v8 }
  0x1b   :  { %614 = vmatpush3.bf16.msra.mxu0 %v656_v8  ;;  %647 = vmatpush3.bf16.msra.mxu1 %v656_v8 }
  0x1c   :  { %615 = vmatprep.subr.bf16.mxu0 %v657_v9  ;;  %640 = vmatprep.subr.bf16.mxu1 %v657_v9 }
  0x1f   :  { %616 = vmatpush3.bf16.msra.mxu0 %v657_v9  ;;  %648 = vmatpush3.bf16.msra.mxu1 %v657_v9 }
  0x22   :  { %618 = vmatmul.mubr.bf16.vlgmr.msra.gmra.mxu0 %v659_v10  ;;  %626 = vmatmul.mubr.bf16.vlgmr.msra.gmra.mxu1 %v663_v11 }
  0x23   :  { %621 = vmatprep.mubr.bf16.mxu0 %v660_v12  ;;  %629 = vmatprep.mubr.bf16.mxu1 %v664_v13 }
  0x2a   :  { %622 = vmatmul.mubr.bf16.gmra.mxu0 %v661_v14  ;;  %630 = vmatmul.mubr.bf16.gmra.mxu1 %v665_v15 }
  0xe2   :  { %v619_v17 = vpop.f32.mrf.mxu0  ;;  %v627_v18 = vpop.f32.mrf.mxu1 }
  0xe3   :  { %v441_v34 = vmul.f32 %v619_v17, %v619_v17  ;;  %v449_v4 = vmul.f32 %v627_v18, %v627_v18 }
  0xe4   :  { %v213_v19 = vpop.f32.mrf.mxu0  ;;  %v245_v20 = vpop.f32.mrf.mxu1 }
  0xe5   :  { %v439_v25 = vmul.f32 %v213_v19, %v213_v19  ;;  %v447_v62 = vmul.f32 %v245_v20, %v245_v20 }
  0xe6   :  { %v620_v21 = vpop.f32.mrf.mxu0  ;;  %v628_v22 = vpop.f32.mrf.mxu1 }
  0xe7   :  { %v546_v23 = vpack.c.bf16 %v620_v21, %v619_v17  ;;  %v566_v24 = vpack.c.bf16 %v628_v22, %v627_v18  ;;  %v442_v39 = vmul.f32 %v620_v21, %v620_v21  ;;  %v450_v7 = vmul.f32 %v628_v22, %v628_v22 }
  0xe8   :  { %v216_v26 = vpop.f32.mrf.mxu0  ;;  %v248_v27 = vpop.f32.mrf.mxu1 }
  0xe9   :  { %578 = vst [vmem:[%s786_s2 + $0x8] sm:$0xff] %v546_v23   ;;  %v541_v28 = vpack.c.bf16 %v216_v26, %v213_v19  ;;  %v415_v29 = vadd.f32 %v216_v26, %v213_v19  ;;  %v440_v30 = vmul.f32 %v216_v26, %v216_v26  ;;  %582 = vst [vmem:[%s786_s2 + $0x28] sm:$0xff] %v566_v24  }
  0xea   :  { %v561_v31 = vpack.c.bf16 %v248_v27, %v245_v20  ;;  %v623_v32 = vpop.f32.mrf.mxu0  ;;  %v631_v33 = vpop.f32.mrf.mxu1  ;;  %v448_v2 = vmul.f32 %v248_v27, %v248_v27 }
  0xeb   :  { %542 = vst [vmem:[%s786_s2] sm:$0xff] %v541_v28   ;;  %v416_v35 = vadd.f32 %v619_v17, %v415_v29  ;;  %v455_v36 = vadd.f32 %v440_v30, %v439_v25  ;;  %v445_v56 = vmul.f32 %v623_v32, %v623_v32  ;;  %v453_v16 = vmul.f32 %v631_v33, %v631_v33 }
  0xec   :  { %581 = vst [vmem:[%s786_s2 + $0x20] sm:$0xff] %v561_v31   ;;  %v229_v37 = vpop.f32.mrf.mxu0  ;;  %v261_v38 = vpop.f32.mrf.mxu1 }
  0xed   :  { %v456_v40 = vadd.f32 %v455_v36, %v441_v34  ;;  %v417_v41 = vadd.f32 %v620_v21, %v416_v35  ;;  %v443_v45 = vmul.f32 %v229_v37, %v229_v37  ;;  %v451_v11 = vmul.f32 %v261_v38, %v261_v38  ;;  %v438_v35 = vld [vmem:[%s785_s4] sm:$0x1] }
  0xee   :  { %v624_v42 = vpop.f32.mrf.mxu0  ;;  %v632_v43 = vpop.f32.mrf.mxu1 }
  0xef   :  { %v418_v44 = vadd.f32 %v417_v41, %v229_v37  ;;  %v457_v46 = vadd.f32 %v456_v40, %v442_v39  ;;  %v556_v47 = vpack.c.bf16 %v624_v42, %v623_v32  ;;  %v576_v49 = vpack.c.bf16 %v632_v43, %v631_v33 }
  0xf0   :  { %v232_v48 = vpop.f32.mrf.mxu0  ;;  %v264_v50 = vpop.f32.mrf.mxu1  ;;  %v446_v59 = vmul.f32 %v624_v42, %v624_v42  ;;  %v454_v21 = vmul.f32 %v632_v43, %v632_v43 }
  0xf1   :  { %v458_v51 = vadd.f32 %v457_v46, %v443_v45  ;;  %580 = vst [vmem:[%s786_s2 + $0x18] sm:$0xff] %v556_v47   ;;  %v551_v52 = vpack.c.bf16 %v232_v48, %v229_v37  ;;  %v419_v53 = vadd.f32 %v418_v44, %v232_v48  ;;  %v444_v54 = vmul.f32 %v232_v48, %v232_v48 }
  0xf2   :  { %584 = vst [vmem:[%s786_s2 + $0x38] sm:$0xff] %v576_v49   ;;  %v571_v55 = vpack.c.bf16 %v264_v50, %v261_v38  ;;  %v452_v15 = vmul.f32 %v264_v50, %v264_v50 }
  0xf3   :  { %579 = vst [vmem:[%s786_s2 + $0x10] sm:$0xff] %v551_v52   ;;  %v420_v57 = vadd.f32 %v623_v32, %v419_v53  ;;  %v459_v58 = vadd.f32 %v458_v51, %v444_v54  ;;  %v414_v32 = vld [vmem:[%s784_s3] sm:$0x1] }
  0xf4   :  { %583 = vst [vmem:[%s786_s2 + $0x30] sm:$0xff] %v571_v55  }
  0xf5   :  { %v421_v60 = vadd.f32 %v624_v42, %v420_v57  ;;  %v460_v61 = vadd.f32 %v459_v58, %v445_v56 }
  0xf7   :  { %v461_v63 = vadd.f32 %v460_v61, %v446_v59  ;;  %v422_v0 = vadd.f32 %v421_v60, %v245_v20 }
  0xf9   :  { %v423_v1 = vadd.f32 %v422_v0, %v248_v27  ;;  %v462_v3 = vadd.f32 %v461_v63, %v447_v62 }
  0xfb   :  { %v424_v5 = vadd.f32 %v627_v18, %v423_v1  ;;  %v463_v6 = vadd.f32 %v462_v3, %v448_v2 }
  0xfd   :  { %v464_v8 = vadd.f32 %v463_v6, %v449_v4  ;;  %v425_v9 = vadd.f32 %v628_v22, %v424_v5 }
  0xff   :  { %v426_v10 = vadd.f32 %v425_v9, %v261_v38  ;;  %v465_v12 = vadd.f32 %v464_v8, %v450_v7 }
 0x101   :  { %v466_v13 = vadd.f32 %v465_v12, %v451_v11  ;;  %v427_v14 = vadd.f32 %v426_v10, %v264_v50 }
 0x103   :  { %v428_v17 = vadd.f32 %v631_v33, %v427_v14  ;;  %v467_v19 = vadd.f32 %v466_v13, %v452_v15 }
 0x105   :  { %v429_v20 = vadd.f32 %v632_v43, %v428_v17  ;;  %v468_v23 = vadd.f32 %v467_v19, %v453_v16 }
 0x107   :  { %v430_v24 = vrot.slane %v429_v20, 4  ;;  %v469_v25 = vadd.f32 %v468_v23, %v454_v21 }
 0x109   :  { %v431_v26 = vadd.f32 %v430_v24, %v429_v20  ;;  %v470_v18 = vrot.slane %v469_v25, 4 }
 0x10b   :  { %v432_v27 = vrot.slane %v431_v26, 2  ;;  %v471_v28 = vadd.f32 %v470_v18, %v469_v25 }
 0x10d   :  { %v433_v29 = vadd.f32 %v432_v27, %v431_v26  ;;  %v472_v22 = vrot.slane %v471_v28, 2 }
 0x10f   :  { %v434_v30 = vrot.slane %v433_v29, 1  ;;  %v473_v31 = vadd.f32 %v472_v22, %v471_v28 }
 0x111   :  { %v435_v34 = vadd.f32 %v434_v30, %v433_v29  ;;  %v474_v33 = vrot.slane %v473_v31, 1 }
 0x113   :  { %v436_v36 = vadd.f32 %v435_v34, %v414_v32  ;;  %v475_v37 = vadd.f32 %v474_v33, %v473_v31 }
 0x115   :  { %437 = vst [vmem:[%s784_s3] sm:$0x1] %v436_v36  ;;  %v476_v38 = vadd.f32 %v475_v37, %v438_v35 }
 0x117   :  { %477 = vst [vmem:[%s785_s4] sm:$0x1] %v476_v38 }

// kernel: forward.77
= control target key start
LH: loop header
LB: loop body
LE: loop exit
PB: predicated region body
PF: predicated region fallthrough
CT: control target
= control target key end

     0   :  { %v180_v0 = vmov 0.0   ;;  %vm181_vm0 = vmmov 0   ;;  %s235_s1 = inlined_call_operand.vmem [shape: bf16[128,128], index: 1, kind: input, shape index: {}]   ;;  %s236_s0 = inlined_call_operand.vmem [shape: bf16[8,128], index: 0, kind: input, shape index: {}]   ;;  %s237_s2 = inlined_call_operand.vmem [shape: f32[1,128], index: 2, kind: input, shape index: {}]   ;;  %s238_s3 = inlined_call_operand.vmem [shape: f32[8,128], index: 3, kind: output, shape index: {}]  }
   0x1   :  { %150 = vmatprep.subr.bf16.mxu0 %v180_v0  ;;  %v172_v1 = vld [vmem:[%s235_s1 + $0x38] sm:$0xff]   ;;  %166 = vmatprep.mubr.msk.bf16.mxu0 %vm181_vm0, %v180_v0  ;;  %v173_v2 = vld [vmem:[%s235_s1 + $0x30] sm:$0xff]   ;;  %v174_v3 = vld [vmem:[%s235_s1 + $0x28] sm:$0xff]  }
   0x2   :  { %151 = vmatpush3.bf16.msra.mxu0 %v172_v1  ;;  %v175_v4 = vld [vmem:[%s235_s1 + $0x20] sm:$0xff]   ;;  %v176_v5 = vld [vmem:[%s235_s1 + $0x18] sm:$0xff]   ;;  %v177_v6 = vld [vmem:[%s235_s1 + $0x10] sm:$0xff]  }
   0x3   :  { %152 = vmatprep.subr.bf16.mxu0 %v180_v0  ;;  %v178_v7 = vld [vmem:[%s235_s1 + $0x8] sm:$0xff]   ;;  %v179_v8 = vld [vmem:[%s235_s1] sm:$0xff]  }
   0x4   :  { %v15_v9 = vld [vmem:[%s236_s0] sm:$0xf] }
   0x5   :  { %v132_v10 = vld [vmem:[%s237_s2] ss:$0 sm:$0xff] }
   0x6   :  { %153 = vmatpush3.bf16.msra.mxu0 %v173_v2 }
   0x7   :  { %154 = vmatprep.subr.bf16.mxu0 %v180_v0 }
   0xa   :  { %155 = vmatpush3.bf16.msra.mxu0 %v174_v3 }
   0xb   :  { %156 = vmatprep.subr.bf16.mxu0 %v180_v0 }
   0xe   :  { %157 = vmatpush3.bf16.msra.mxu0 %v175_v4 }
   0xf   :  { %158 = vmatprep.subr.bf16.mxu0 %v180_v0 }
  0x12   :  { %159 = vmatpush3.bf16.msra.mxu0 %v176_v5 }
  0x13   :  { %160 = vmatprep.subr.bf16.mxu0 %v180_v0 }
  0x16   :  { %161 = vmatpush3.bf16.msra.mxu0 %v177_v6 }
  0x17   :  { %162 = vmatprep.subr.bf16.mxu0 %v180_v0 }
  0x1a   :  { %163 = vmatpush3.bf16.msra.mxu0 %v178_v7 }
  0x1b   :  { %164 = vmatprep.subr.bf16.mxu0 %v180_v0 }
  0x1e   :  { %165 = vmatpush3.bf16.msra.mxu0 %v179_v8 }
  0x21   :  { %167 = vmatmul.mubr.bf16.vlgmr.msra.gmra.mxu0 %v15_v9 }
  0xe1   :  { %v121_v11 = vpop.f32.mrf.mxu0 }
  0xe2   :  { %v122_v12 = vadd.f32 %v132_v10, %v121_v11 }
  0xe3   :  { %v168_v13 = vpop.f32.mrf.mxu0 }
  0xe4   :  { %127 = vst [vmem:[%s238_s3] sm:$0xff] %v122_v12 }
  0xe5   :  { %v124_v14 = vpop.f32.mrf.mxu0 }
  0xe7   :  { %v169_v15 = vpop.f32.mrf.mxu0 }

</bundles_post_ra>
